<compile_context>
chip_gen: v5e
topology: v5e:2x2
jax: 0.10.0
libtpu: 0.0.40
codegen_flags: <defaults>
</compile_context>

<pallas_src>
import math
import functools

import jax
import jax.numpy as jnp
from jax.experimental import pallas as pl
from jax.experimental.pallas import tpu as pltpu

# ------------------------- model hyper-parameters ---------------------------
BATCH = 2
SEQ_LEN = 8
INPUT_SIZE = 4
EMB_SIZE = 32
NHEAD = 2
HEAD_DIM = EMB_SIZE // NHEAD
NHID = 64
NHID_TAR = 32
NHID_TASK = 32
NLAYERS = 2
NCLASSES = 3
EPS = 1e-5

_VMEM = pl.BlockSpec(memory_space=pltpu.MemorySpace.VMEM)


# ------------------------- shared math building blocks -----------------------
def _dense(x2d, w, b, relu=False):
    y = jnp.dot(x2d, w, preferred_element_type=jnp.float32) + b
    return jnp.maximum(y, 0.0) if relu else y


def _affine_norm(x, mean, var, g, b):
    return (x - mean) * jax.lax.rsqrt(var + EPS) * g + b


def _bn_batch(h, g, b):
    # BatchNorm1d(num_features=batch) on seq-major (S, B, E) == per batch
    # element stats over the (S, E) plane; here h is batch-major (B, S, E).
    m = jnp.mean(jnp.mean(h, axis=2, keepdims=True), axis=1, keepdims=True)
    v = jnp.mean(jnp.mean((h - m) ** 2, axis=2, keepdims=True), axis=1,
                 keepdims=True)
    return _affine_norm(h, m, v, g, b)


def _bn_rows(z, g, b):
    # Permute -> BatchNorm1d(batch) -> Permute on (B, H): per batch row,
    # stats over the H features (biased variance, training-mode semantics).
    m = jnp.mean(z, axis=1, keepdims=True)
    v = jnp.mean((z - m) ** 2, axis=1, keepdims=True)
    return _affine_norm(z, m, v, g, b)


def _ln(z, g, b):
    m = jnp.mean(z, axis=-1, keepdims=True)
    v = jnp.mean((z - m) ** 2, axis=-1, keepdims=True)
    return _affine_norm(z, m, v, g, b)


def _encoder_layer(h, lp, want_attn, in_kernel):
    # Standard post-LN TransformerEncoderLayer on batch-major (B, S, E).
    B, S, E = h.shape
    h2 = h.reshape(B * S, E)
    scale = 1.0 / math.sqrt(HEAD_DIM)

    proj = jnp.zeros((B * S, E), jnp.float32)
    attn_sum = None
    for hd in range(NHEAD):                                # static unroll
        # Per-head projections: separate small weights -> no lane slicing.
        qh = _dense(h2, lp["wq"][hd], lp["bq"][hd]).reshape(B, S, HEAD_DIM)
        kh = _dense(h2, lp["wk"][hd], lp["bk"][hd]).reshape(B, S, HEAD_DIM)
        vh = _dense(h2, lp["wv"][hd], lp["bv"][hd]).reshape(B, S, HEAD_DIM)

        s = jnp.einsum("bqd,bkd->bqk", qh, kh,
                       preferred_element_type=jnp.float32) * scale
        m = jnp.max(s, axis=-1, keepdims=True)
        e = jnp.exp(s - m)
        den = jnp.sum(e, axis=-1, keepdims=True)
        inv = pl.reciprocal(den, approx=True) if in_kernel else 1.0 / den
        p_attn = e * inv
        oh = jnp.einsum("bqk,bkd->bqd", p_attn, vh,
                        preferred_element_type=jnp.float32)

        # Per-head slice of output projection == concat(heads) @ W_out,
        # without any in-kernel concatenate.
        proj = proj + jnp.dot(oh.reshape(B * S, HEAD_DIM), lp["wo"][hd],
                              preferred_element_type=jnp.float32)
        if want_attn:
            attn_sum = p_attn if attn_sum is None else attn_sum + p_attn
    proj = proj + lp["out_b"]

    h2 = _ln(h2 + proj, lp["ln1_g"], lp["ln1_b"])
    ff = _dense(h2, lp["ff1_w"], lp["ff1_b"], relu=True)
    ff = _dense(ff, lp["ff2_w"], lp["ff2_b"])
    h2 = _ln(h2 + ff, lp["ln2_g"], lp["ln2_b"])

    attn_avg = attn_sum * (1.0 / NHEAD) if want_attn else None
    return h2.reshape(B, S, E), attn_avg


def _forward_math(x, pe, p, *, in_kernel):
    """Full forward. Used both inside the Pallas kernel and as pure-JAX ref."""
    B, S, F = x.shape
    E = EMB_SIZE

    # ---- trunk_net: Linear -> BN(batch) -> PositionalEncoding -> BN(batch)
    h = _dense(x.reshape(B * S, F), p["trunk_w"], p["trunk_b"]).reshape(B, S, E)
    h = _bn_batch(h, p["bn1_g"], p["bn1_b"])
    h = h + pe[None, :, :]
    # TODO(synk): nn.Dropout layers are treated as identity (inference behavior).
    h = _bn_batch(h, p["bn2_g"], p["bn2_b"])

    # ---- transformer encoder
    # TODO(synk): TARNet's custom `transformer` module source is unavailable;
    # a standard post-LN encoder-layer stack is assumed; attn is the last
    # layer's head-averaged attention map.
    attn = None
    for li, lp in enumerate(p["layers"]):
        h, a = _encoder_layer(h, lp, want_attn=(li == NLAYERS - 1),
                              in_kernel=in_kernel)
        if a is not None:
            attn = a

    h = _bn_batch(h, p["bnf_g"], p["bnf_b"])

    # ---- reconstruction head (tar_net); batch-major output == .permute(1,0,2)
    z = _dense(h.reshape(B * S, E), p["tar1_w"], p["tar1_b"]).reshape(B, S, NHID_TAR)
    z = _bn_batch(z, p["tar_bn1_g"], p["tar_bn1_b"])
    z = _dense(z.reshape(B * S, NHID_TAR), p["tar2_w"], p["tar2_b"]).reshape(B, S, NHID_TAR)
    z = _bn_batch(z, p["tar_bn2_g"], p["tar_bn2_b"])
    rec = _dense(z.reshape(B * S, NHID_TAR), p["tar3_w"], p["tar3_b"]).reshape(B, S, F)

    # ---- x[-1] of the seq-major reference == h[:, -1, :] in batch-major
    last = h[:, S - 1:S, :].reshape(B, E)

    # ---- classification head (class_net)
    c = _dense(last, p["cls1_w"], p["cls1_b"], relu=True)
    c = _bn_rows(c, p["cls_bn1_g"], p["cls_bn1_b"])
    c = _dense(c, p["cls2_w"], p["cls2_b"], relu=True)
    c = _bn_rows(c, p["cls_bn2_g"], p["cls_bn2_b"])
    cls = _dense(c, p["cls3_w"], p["cls3_b"])

    # ---- regression head (reg_net), sharing the same trunk/encoder
    r = _dense(last, p["reg1_w"], p["reg1_b"], relu=True)
    r = _bn_rows(r, p["reg_bn1_g"], p["reg_bn1_b"])
    r = _dense(r, p["reg2_w"], p["reg2_b"], relu=True)
    r = _bn_rows(r, p["reg_bn2_g"], p["reg_bn2_b"])
    reg = _dense(r, p["reg3_w"], p["reg3_b"])

    return rec, cls, reg, attn


# ------------------------------ fused kernel --------------------------------
def _fused_forward_kernel(*refs, treedef, n_params):
    x_ref, pe_ref = refs[0], refs[1]
    param_refs = refs[2:2 + n_params]
    rec_ref, cls_ref, reg_ref, attn_ref = refs[2 + n_params:]

    p = jax.tree_util.tree_unflatten(treedef, [r[...] for r in param_refs])
    rec, cls, reg, attn = _forward_math(x_ref[...], pe_ref[...], p,
                                        in_kernel=True)
    rec_ref[...] = rec
    cls_ref[...] = cls
    reg_ref[...] = reg
    attn_ref[...] = attn


# --------------------------------- wrappers ----------------------------------
def positional_encoding(seq_len, d_model):
    pos = jnp.arange(seq_len, dtype=jnp.float32)[:, None]
    div = jnp.exp(jnp.arange(0, d_model, 2, dtype=jnp.float32)
                  * (-math.log(10000.0) / d_model))
    pe = jnp.zeros((seq_len, d_model), jnp.float32)
    pe = pe.at[:, 0::2].set(jnp.sin(pos * div))
    pe = pe.at[:, 1::2].set(jnp.cos(pos * div))
    return pe  # (S, E)


@jax.jit
def forward_all(x, params):
    """One fused Pallas call: shared trunk + encoder, all task heads + attn."""
    b, s, f = x.shape
    pe = positional_encoding(s, EMB_SIZE)
    leaves, treedef = jax.tree_util.tree_flatten(params)
    kernel = functools.partial(_fused_forward_kernel,
                               treedef=treedef, n_params=len(leaves))
    out_shapes = (
        jax.ShapeDtypeStruct((b, s, f), jnp.float32),        # reconstruction
        jax.ShapeDtypeStruct((b, NCLASSES), jnp.float32),    # classification
        jax.ShapeDtypeStruct((b, 1), jnp.float32),           # regression
        jax.ShapeDtypeStruct((b, s, s), jnp.float32),        # attention (last layer)
    )
    return pl.pallas_call(
        kernel,
        out_shape=out_shapes,
        in_specs=[_VMEM] * (2 + len(leaves)),
        out_specs=(_VMEM, _VMEM, _VMEM, _VMEM),
    )(x, pe, *leaves)


@jax.jit
def forward_reference(x, params):
    """Pure-JAX (XLA) reference of the same math, for in-script validation."""
    pe = positional_encoding(x.shape[1], EMB_SIZE)
    return _forward_math(x, pe, params, in_kernel=False)


def forward(x, params, task_type):
    # API parity with the PyTorch module; the fused pass is shared internally.
    rec, cls, reg, attn = forward_all(x, params)
    if task_type == "reconstruction":
        return rec, attn
    if task_type == "classification":
        return cls, attn
    return reg, attn


# --------------------------- parameter initialization ------------------------
def init_params(key):
    keys = iter(jax.random.split(key, 128))

    def dense(kin, kout):
        w = jax.random.normal(next(keys), (kin, kout), jnp.float32) / math.sqrt(kin)
        return w, jnp.zeros((1, kout), jnp.float32)

    def bn_batch_affine():  # BatchNorm1d(batch) over (B, S, E)
        return (jnp.ones((BATCH, 1, 1), jnp.float32),
                jnp.zeros((BATCH, 1, 1), jnp.float32))

    def bn_row_affine():    # Permute->BatchNorm1d(batch)->Permute over (B, H)
        return (jnp.ones((BATCH, 1), jnp.float32),
                jnp.zeros((BATCH, 1), jnp.float32))

    def ln_affine(n):
        return jnp.ones((1, n), jnp.float32), jnp.zeros((1, n), jnp.float32)

    params = {}
    params["trunk_w"], params["trunk_b"] = dense(INPUT_SIZE, EMB_SIZE)
    params["bn1_g"], params["bn1_b"] = bn_batch_affine()
    params["bn2_g"], params["bn2_b"] = bn_batch_affine()
    params["bnf_g"], params["bnf_b"] = bn_batch_affine()

    layers = []
    for _ in range(NLAYERS):
        lp = {"wq": [], "bq": [], "wk": [], "bk": [], "wv": [], "bv": [], "wo": []}
        for _h in range(NHEAD):
            w, b = dense(EMB_SIZE, HEAD_DIM); lp["wq"].append(w); lp["bq"].append(b)
            w, b = dense(EMB_SIZE, HEAD_DIM); lp["wk"].append(w); lp["bk"].append(b)
            w, b = dense(EMB_SIZE, HEAD_DIM); lp["wv"].append(w); lp["bv"].append(b)
            w, _ = dense(HEAD_DIM, EMB_SIZE); lp["wo"].append(w)
        lp["out_b"] = jnp.zeros((1, EMB_SIZE), jnp.float32)
        lp["ln1_g"], lp["ln1_b"] = ln_affine(EMB_SIZE)
        lp["ff1_w"], lp["ff1_b"] = dense(EMB_SIZE, NHID)
        lp["ff2_w"], lp["ff2_b"] = dense(NHID, EMB_SIZE)
        lp["ln2_g"], lp["ln2_b"] = ln_affine(EMB_SIZE)
        layers.append(lp)
    params["layers"] = layers

    params["tar1_w"], params["tar1_b"] = dense(EMB_SIZE, NHID_TAR)
    params["tar_bn1_g"], params["tar_bn1_b"] = bn_batch_affine()
    params["tar2_w"], params["tar2_b"] = dense(NHID_TAR, NHID_TAR)
    params["tar_bn2_g"], params["tar_bn2_b"] = bn_batch_affine()
    params["tar3_w"], params["tar3_b"] = dense(NHID_TAR, INPUT_SIZE)

    params["cls1_w"], params["cls1_b"] = dense(EMB_SIZE, NHID_TASK)
    params["cls_bn1_g"], params["cls_bn1_b"] = bn_row_affine()
    params["cls2_w"], params["cls2_b"] = dense(NHID_TASK, NHID_TASK)
    params["cls_bn2_g"], params["cls_bn2_b"] = bn_row_affine()
    params["cls3_w"], params["cls3_b"] = dense(NHID_TASK, NCLASSES)

    params["reg1_w"], params["reg1_b"] = dense(EMB_SIZE, NHID_TASK)
    params["reg_bn1_g"], params["reg_bn1_b"] = bn_row_affine()
    params["reg2_w"], params["reg2_b"] = dense(NHID_TASK, NHID_TASK)
    params["reg_bn2_g"], params["reg_bn2_b"] = bn_row_affine()
    params["reg3_w"], params["reg3_b"] = dense(NHID_TASK, 1)
    return params


# ------------------------------------ main -----------------------------------
if __name__ == "__main__":
    key = jax.random.PRNGKey(0)
    k_x, k_p = jax.random.split(key)
    x = jax.random.normal(k_x, (BATCH, SEQ_LEN, INPUT_SIZE), jnp.float32)
    params = init_params(k_p)

    # Single fused Pallas pass; trunk + encoder shared across all task heads.
    rec_out, cls_out, reg_out, attn = forward_all(x, params)
    jax.block_until_ready((rec_out, cls_out, reg_out, attn))

    assert rec_out.shape == (BATCH, SEQ_LEN, INPUT_SIZE)
    assert cls_out.shape == (BATCH, NCLASSES)
    assert reg_out.shape == (BATCH, 1)
    assert attn.shape == (BATCH, SEQ_LEN, SEQ_LEN)
    assert bool(jnp.all(jnp.isfinite(rec_out)))
    assert bool(jnp.all(jnp.isfinite(cls_out)))
    assert bool(jnp.all(jnp.isfinite(reg_out)))
    assert bool(jnp.all(jnp.isfinite(attn)))

    # Cross-check against the pure-JAX reference of the same math
    # (loose tolerance: kernel uses the approximate EUP reciprocal in softmax).
    rec_r, cls_r, reg_r, attn_r = forward_reference(x, params)
    jax.block_until_ready((rec_r, cls_r, reg_r, attn_r))
    assert bool(jnp.allclose(rec_out, rec_r, atol=2e-2, rtol=2e-2))
    assert bool(jnp.allclose(cls_out, cls_r, atol=2e-2, rtol=2e-2))
    assert bool(jnp.allclose(reg_out, reg_r, atol=2e-2, rtol=2e-2))
    assert bool(jnp.allclose(attn, attn_r, atol=2e-2, rtol=2e-2))

    print("KERNEL_OK")
</pallas_src>

<mosaic_0001>
module attributes {stable_mosaic.version = 11 : i64} {
  func.func @_fused_forward_kernel(%arg0: memref<2x8x4xf32, #tpu.memory_space<vmem>>, %arg1: memref<8x32xf32, #tpu.memory_space<vmem>>, %arg2: memref<2x1x1xf32, #tpu.memory_space<vmem>>, %arg3: memref<2x1x1xf32, #tpu.memory_space<vmem>>, %arg4: memref<2x1x1xf32, #tpu.memory_space<vmem>>, %arg5: memref<2x1x1xf32, #tpu.memory_space<vmem>>, %arg6: memref<2x1x1xf32, #tpu.memory_space<vmem>>, %arg7: memref<2x1x1xf32, #tpu.memory_space<vmem>>, %arg8: memref<1x32xf32, #tpu.memory_space<vmem>>, %arg9: memref<32x32xf32, #tpu.memory_space<vmem>>, %arg10: memref<1x32xf32, #tpu.memory_space<vmem>>, %arg11: memref<32x32xf32, #tpu.memory_space<vmem>>, %arg12: memref<1x3xf32, #tpu.memory_space<vmem>>, %arg13: memref<32x3xf32, #tpu.memory_space<vmem>>, %arg14: memref<2x1xf32, #tpu.memory_space<vmem>>, %arg15: memref<2x1xf32, #tpu.memory_space<vmem>>, %arg16: memref<2x1xf32, #tpu.memory_space<vmem>>, %arg17: memref<2x1xf32, #tpu.memory_space<vmem>>, %arg18: memref<1x16xf32, #tpu.memory_space<vmem>>, %arg19: memref<1x16xf32, #tpu.memory_space<vmem>>, %arg20: memref<1x16xf32, #tpu.memory_space<vmem>>, %arg21: memref<1x16xf32, #tpu.memory_space<vmem>>, %arg22: memref<1x16xf32, #tpu.memory_space<vmem>>, %arg23: memref<1x16xf32, #tpu.memory_space<vmem>>, %arg24: memref<1x64xf32, #tpu.memory_space<vmem>>, %arg25: memref<32x64xf32, #tpu.memory_space<vmem>>, %arg26: memref<1x32xf32, #tpu.memory_space<vmem>>, %arg27: memref<64x32xf32, #tpu.memory_space<vmem>>, %arg28: memref<1x32xf32, #tpu.memory_space<vmem>>, %arg29: memref<1x32xf32, #tpu.memory_space<vmem>>, %arg30: memref<1x32xf32, #tpu.memory_space<vmem>>, %arg31: memref<1x32xf32, #tpu.memory_space<vmem>>, %arg32: memref<1x32xf32, #tpu.memory_space<vmem>>, %arg33: memref<32x16xf32, #tpu.memory_space<vmem>>, %arg34: memref<32x16xf32, #tpu.memory_space<vmem>>, %arg35: memref<16x32xf32, #tpu.memory_space<vmem>>, %arg36: memref<16x32xf32, #tpu.memory_space<vmem>>, %arg37: memref<32x16xf32, #tpu.memory_space<vmem>>, %arg38: memref<32x16xf32, #tpu.memory_space<vmem>>, %arg39: memref<32x16xf32, #tpu.memory_space<vmem>>, %arg40: memref<32x16xf32, #tpu.memory_space<vmem>>, %arg41: memref<1x16xf32, #tpu.memory_space<vmem>>, %arg42: memref<1x16xf32, #tpu.memory_space<vmem>>, %arg43: memref<1x16xf32, #tpu.memory_space<vmem>>, %arg44: memref<1x16xf32, #tpu.memory_space<vmem>>, %arg45: memref<1x16xf32, #tpu.memory_space<vmem>>, %arg46: memref<1x16xf32, #tpu.memory_space<vmem>>, %arg47: memref<1x64xf32, #tpu.memory_space<vmem>>, %arg48: memref<32x64xf32, #tpu.memory_space<vmem>>, %arg49: memref<1x32xf32, #tpu.memory_space<vmem>>, %arg50: memref<64x32xf32, #tpu.memory_space<vmem>>, %arg51: memref<1x32xf32, #tpu.memory_space<vmem>>, %arg52: memref<1x32xf32, #tpu.memory_space<vmem>>, %arg53: memref<1x32xf32, #tpu.memory_space<vmem>>, %arg54: memref<1x32xf32, #tpu.memory_space<vmem>>, %arg55: memref<1x32xf32, #tpu.memory_space<vmem>>, %arg56: memref<32x16xf32, #tpu.memory_space<vmem>>, %arg57: memref<32x16xf32, #tpu.memory_space<vmem>>, %arg58: memref<16x32xf32, #tpu.memory_space<vmem>>, %arg59: memref<16x32xf32, #tpu.memory_space<vmem>>, %arg60: memref<32x16xf32, #tpu.memory_space<vmem>>, %arg61: memref<32x16xf32, #tpu.memory_space<vmem>>, %arg62: memref<32x16xf32, #tpu.memory_space<vmem>>, %arg63: memref<32x16xf32, #tpu.memory_space<vmem>>, %arg64: memref<1x32xf32, #tpu.memory_space<vmem>>, %arg65: memref<32x32xf32, #tpu.memory_space<vmem>>, %arg66: memref<1x32xf32, #tpu.memory_space<vmem>>, %arg67: memref<32x32xf32, #tpu.memory_space<vmem>>, %arg68: memref<1x1xf32, #tpu.memory_space<vmem>>, %arg69: memref<32x1xf32, #tpu.memory_space<vmem>>, %arg70: memref<2x1xf32, #tpu.memory_space<vmem>>, %arg71: memref<2x1xf32, #tpu.memory_space<vmem>>, %arg72: memref<2x1xf32, #tpu.memory_space<vmem>>, %arg73: memref<2x1xf32, #tpu.memory_space<vmem>>, %arg74: memref<1x32xf32, #tpu.memory_space<vmem>>, %arg75: memref<32x32xf32, #tpu.memory_space<vmem>>, %arg76: memref<1x32xf32, #tpu.memory_space<vmem>>, %arg77: memref<32x32xf32, #tpu.memory_space<vmem>>, %arg78: memref<1x4xf32, #tpu.memory_space<vmem>>, %arg79: memref<32x4xf32, #tpu.memory_space<vmem>>, %arg80: memref<2x1x1xf32, #tpu.memory_space<vmem>>, %arg81: memref<2x1x1xf32, #tpu.memory_space<vmem>>, %arg82: memref<2x1x1xf32, #tpu.memory_space<vmem>>, %arg83: memref<2x1x1xf32, #tpu.memory_space<vmem>>, %arg84: memref<1x32xf32, #tpu.memory_space<vmem>>, %arg85: memref<4x32xf32, #tpu.memory_space<vmem>>, %arg86: memref<2x8x4xf32, #tpu.memory_space<vmem>>, %arg87: memref<2x3xf32, #tpu.memory_space<vmem>>, %arg88: memref<2x1xf32, #tpu.memory_space<vmem>>, %arg89: memref<2x8x8xf32, #tpu.memory_space<vmem>>) attributes {dimension_semantics = [], scalar_prefetch = 0 : i64, scratch_operands = 0 : i64, tpu.core_type = #tpu.core_type<tc>} {
    %c0 = arith.constant 0 : index
    %c0_0 = arith.constant 0 : index
    %c0_1 = arith.constant 0 : index
    %0 = vector.load %arg2[%c0, %c0_0, %c0_1] : memref<2x1x1xf32, #tpu.memory_space<vmem>>, vector<2x1x1xf32>
    %c0_2 = arith.constant 0 : index
    %c0_3 = arith.constant 0 : index
    %c0_4 = arith.constant 0 : index
    %1 = vector.load %arg3[%c0_2, %c0_3, %c0_4] : memref<2x1x1xf32, #tpu.memory_space<vmem>>, vector<2x1x1xf32>
    %c0_5 = arith.constant 0 : index
    %c0_6 = arith.constant 0 : index
    %c0_7 = arith.constant 0 : index
    %2 = vector.load %arg4[%c0_5, %c0_6, %c0_7] : memref<2x1x1xf32, #tpu.memory_space<vmem>>, vector<2x1x1xf32>
    %c0_8 = arith.constant 0 : index
    %c0_9 = arith.constant 0 : index
    %c0_10 = arith.constant 0 : index
    %3 = vector.load %arg5[%c0_8, %c0_9, %c0_10] : memref<2x1x1xf32, #tpu.memory_space<vmem>>, vector<2x1x1xf32>
    %c0_11 = arith.constant 0 : index
    %c0_12 = arith.constant 0 : index
    %c0_13 = arith.constant 0 : index
    %4 = vector.load %arg6[%c0_11, %c0_12, %c0_13] : memref<2x1x1xf32, #tpu.memory_space<vmem>>, vector<2x1x1xf32>
    %c0_14 = arith.constant 0 : index
    %c0_15 = arith.constant 0 : index
    %c0_16 = arith.constant 0 : index
    %5 = vector.load %arg7[%c0_14, %c0_15, %c0_16] : memref<2x1x1xf32, #tpu.memory_space<vmem>>, vector<2x1x1xf32>
    %c0_17 = arith.constant 0 : index
    %c0_18 = arith.constant 0 : index
    %6 = vector.load %arg8[%c0_17, %c0_18] : memref<1x32xf32, #tpu.memory_space<vmem>>, vector<1x32xf32>
    %c0_19 = arith.constant 0 : index
    %c0_20 = arith.constant 0 : index
    %7 = vector.load %arg9[%c0_19, %c0_20] : memref<32x32xf32, #tpu.memory_space<vmem>>, vector<32x32xf32>
    %c0_21 = arith.constant 0 : index
    %c0_22 = arith.constant 0 : index
    %8 = vector.load %arg10[%c0_21, %c0_22] : memref<1x32xf32, #tpu.memory_space<vmem>>, vector<1x32xf32>
    %c0_23 = arith.constant 0 : index
    %c0_24 = arith.constant 0 : index
    %9 = vector.load %arg11[%c0_23, %c0_24] : memref<32x32xf32, #tpu.memory_space<vmem>>, vector<32x32xf32>
    %c0_25 = arith.constant 0 : index
    %c0_26 = arith.constant 0 : index
    %10 = vector.load %arg12[%c0_25, %c0_26] : memref<1x3xf32, #tpu.memory_space<vmem>>, vector<1x3xf32>
    %c0_27 = arith.constant 0 : index
    %c0_28 = arith.constant 0 : index
    %11 = vector.load %arg13[%c0_27, %c0_28] : memref<32x3xf32, #tpu.memory_space<vmem>>, vector<32x3xf32>
    %c0_29 = arith.constant 0 : index
    %c0_30 = arith.constant 0 : index
    %12 = vector.load %arg14[%c0_29, %c0_30] : memref<2x1xf32, #tpu.memory_space<vmem>>, vector<2x1xf32>
    %c0_31 = arith.constant 0 : index
    %c0_32 = arith.constant 0 : index
    %13 = vector.load %arg15[%c0_31, %c0_32] : memref<2x1xf32, #tpu.memory_space<vmem>>, vector<2x1xf32>
    %c0_33 = arith.constant 0 : index
    %c0_34 = arith.constant 0 : index
    %14 = vector.load %arg16[%c0_33, %c0_34] : memref<2x1xf32, #tpu.memory_space<vmem>>, vector<2x1xf32>
    %c0_35 = arith.constant 0 : index
    %c0_36 = arith.constant 0 : index
    %15 = vector.load %arg17[%c0_35, %c0_36] : memref<2x1xf32, #tpu.memory_space<vmem>>, vector<2x1xf32>
    %c0_37 = arith.constant 0 : index
    %c0_38 = arith.constant 0 : index
    %16 = vector.load %arg18[%c0_37, %c0_38] : memref<1x16xf32, #tpu.memory_space<vmem>>, vector<1x16xf32>
    %c0_39 = arith.constant 0 : index
    %c0_40 = arith.constant 0 : index
    %17 = vector.load %arg19[%c0_39, %c0_40] : memref<1x16xf32, #tpu.memory_space<vmem>>, vector<1x16xf32>
    %c0_41 = arith.constant 0 : index
    %c0_42 = arith.constant 0 : index
    %18 = vector.load %arg20[%c0_41, %c0_42] : memref<1x16xf32, #tpu.memory_space<vmem>>, vector<1x16xf32>
    %c0_43 = arith.constant 0 : index
    %c0_44 = arith.constant 0 : index
    %19 = vector.load %arg21[%c0_43, %c0_44] : memref<1x16xf32, #tpu.memory_space<vmem>>, vector<1x16xf32>
    %c0_45 = arith.constant 0 : index
    %c0_46 = arith.constant 0 : index
    %20 = vector.load %arg22[%c0_45, %c0_46] : memref<1x16xf32, #tpu.memory_space<vmem>>, vector<1x16xf32>
    %c0_47 = arith.constant 0 : index
    %c0_48 = arith.constant 0 : index
    %21 = vector.load %arg23[%c0_47, %c0_48] : memref<1x16xf32, #tpu.memory_space<vmem>>, vector<1x16xf32>
    %c0_49 = arith.constant 0 : index
    %c0_50 = arith.constant 0 : index
    %22 = vector.load %arg24[%c0_49, %c0_50] : memref<1x64xf32, #tpu.memory_space<vmem>>, vector<1x64xf32>
    %c0_51 = arith.constant 0 : index
    %c0_52 = arith.constant 0 : index
    %23 = vector.load %arg25[%c0_51, %c0_52] : memref<32x64xf32, #tpu.memory_space<vmem>>, vector<32x64xf32>
    %c0_53 = arith.constant 0 : index
    %c0_54 = arith.constant 0 : index
    %24 = vector.load %arg26[%c0_53, %c0_54] : memref<1x32xf32, #tpu.memory_space<vmem>>, vector<1x32xf32>
    %c0_55 = arith.constant 0 : index
    %c0_56 = arith.constant 0 : index
    %25 = vector.load %arg27[%c0_55, %c0_56] : memref<64x32xf32, #tpu.memory_space<vmem>>, vector<64x32xf32>
    %c0_57 = arith.constant 0 : index
    %c0_58 = arith.constant 0 : index
    %26 = vector.load %arg28[%c0_57, %c0_58] : memref<1x32xf32, #tpu.memory_space<vmem>>, vector<1x32xf32>
    %c0_59 = arith.constant 0 : index
    %c0_60 = arith.constant 0 : index
    %27 = vector.load %arg29[%c0_59, %c0_60] : memref<1x32xf32, #tpu.memory_space<vmem>>, vector<1x32xf32>
    %c0_61 = arith.constant 0 : index
    %c0_62 = arith.constant 0 : index
    %28 = vector.load %arg30[%c0_61, %c0_62] : memref<1x32xf32, #tpu.memory_space<vmem>>, vector<1x32xf32>
    %c0_63 = arith.constant 0 : index
    %c0_64 = arith.constant 0 : index
    %29 = vector.load %arg31[%c0_63, %c0_64] : memref<1x32xf32, #tpu.memory_space<vmem>>, vector<1x32xf32>
    %c0_65 = arith.constant 0 : index
    %c0_66 = arith.constant 0 : index
    %30 = vector.load %arg32[%c0_65, %c0_66] : memref<1x32xf32, #tpu.memory_space<vmem>>, vector<1x32xf32>
    %c0_67 = arith.constant 0 : index
    %c0_68 = arith.constant 0 : index
    %31 = vector.load %arg33[%c0_67, %c0_68] : memref<32x16xf32, #tpu.memory_space<vmem>>, vector<32x16xf32>
    %c0_69 = arith.constant 0 : index
    %c0_70 = arith.constant 0 : index
    %32 = vector.load %arg34[%c0_69, %c0_70] : memref<32x16xf32, #tpu.memory_space<vmem>>, vector<32x16xf32>
    %c0_71 = arith.constant 0 : index
    %c0_72 = arith.constant 0 : index
    %33 = vector.load %arg35[%c0_71, %c0_72] : memref<16x32xf32, #tpu.memory_space<vmem>>, vector<16x32xf32>
    %c0_73 = arith.constant 0 : index
    %c0_74 = arith.constant 0 : index
    %34 = vector.load %arg36[%c0_73, %c0_74] : memref<16x32xf32, #tpu.memory_space<vmem>>, vector<16x32xf32>
    %c0_75 = arith.constant 0 : index
    %c0_76 = arith.constant 0 : index
    %35 = vector.load %arg37[%c0_75, %c0_76] : memref<32x16xf32, #tpu.memory_space<vmem>>, vector<32x16xf32>
    %c0_77 = arith.constant 0 : index
    %c0_78 = arith.constant 0 : index
    %36 = vector.load %arg38[%c0_77, %c0_78] : memref<32x16xf32, #tpu.memory_space<vmem>>, vector<32x16xf32>
    %c0_79 = arith.constant 0 : index
    %c0_80 = arith.constant 0 : index
    %37 = vector.load %arg39[%c0_79, %c0_80] : memref<32x16xf32, #tpu.memory_space<vmem>>, vector<32x16xf32>
    %c0_81 = arith.constant 0 : index
    %c0_82 = arith.constant 0 : index
    %38 = vector.load %arg40[%c0_81, %c0_82] : memref<32x16xf32, #tpu.memory_space<vmem>>, vector<32x16xf32>
    %c0_83 = arith.constant 0 : index
    %c0_84 = arith.constant 0 : index
    %39 = vector.load %arg41[%c0_83, %c0_84] : memref<1x16xf32, #tpu.memory_space<vmem>>, vector<1x16xf32>
    %c0_85 = arith.constant 0 : index
    %c0_86 = arith.constant 0 : index
    %40 = vector.load %arg42[%c0_85, %c0_86] : memref<1x16xf32, #tpu.memory_space<vmem>>, vector<1x16xf32>
    %c0_87 = arith.constant 0 : index
    %c0_88 = arith.constant 0 : index
    %41 = vector.load %arg43[%c0_87, %c0_88] : memref<1x16xf32, #tpu.memory_space<vmem>>, vector<1x16xf32>
    %c0_89 = arith.constant 0 : index
    %c0_90 = arith.constant 0 : index
    %42 = vector.load %arg44[%c0_89, %c0_90] : memref<1x16xf32, #tpu.memory_space<vmem>>, vector<1x16xf32>
    %c0_91 = arith.constant 0 : index
    %c0_92 = arith.constant 0 : index
    %43 = vector.load %arg45[%c0_91, %c0_92] : memref<1x16xf32, #tpu.memory_space<vmem>>, vector<1x16xf32>
    %c0_93 = arith.constant 0 : index
    %c0_94 = arith.constant 0 : index
    %44 = vector.load %arg46[%c0_93, %c0_94] : memref<1x16xf32, #tpu.memory_space<vmem>>, vector<1x16xf32>
    %c0_95 = arith.constant 0 : index
    %c0_96 = arith.constant 0 : index
    %45 = vector.load %arg47[%c0_95, %c0_96] : memref<1x64xf32, #tpu.memory_space<vmem>>, vector<1x64xf32>
    %c0_97 = arith.constant 0 : index
    %c0_98 = arith.constant 0 : index
    %46 = vector.load %arg48[%c0_97, %c0_98] : memref<32x64xf32, #tpu.memory_space<vmem>>, vector<32x64xf32>
    %c0_99 = arith.constant 0 : index
    %c0_100 = arith.constant 0 : index
    %47 = vector.load %arg49[%c0_99, %c0_100] : memref<1x32xf32, #tpu.memory_space<vmem>>, vector<1x32xf32>
    %c0_101 = arith.constant 0 : index
    %c0_102 = arith.constant 0 : index
    %48 = vector.load %arg50[%c0_101, %c0_102] : memref<64x32xf32, #tpu.memory_space<vmem>>, vector<64x32xf32>
    %c0_103 = arith.constant 0 : index
    %c0_104 = arith.constant 0 : index
    %49 = vector.load %arg51[%c0_103, %c0_104] : memref<1x32xf32, #tpu.memory_space<vmem>>, vector<1x32xf32>
    %c0_105 = arith.constant 0 : index
    %c0_106 = arith.constant 0 : index
    %50 = vector.load %arg52[%c0_105, %c0_106] : memref<1x32xf32, #tpu.memory_space<vmem>>, vector<1x32xf32>
    %c0_107 = arith.constant 0 : index
    %c0_108 = arith.constant 0 : index
    %51 = vector.load %arg53[%c0_107, %c0_108] : memref<1x32xf32, #tpu.memory_space<vmem>>, vector<1x32xf32>
    %c0_109 = arith.constant 0 : index
    %c0_110 = arith.constant 0 : index
    %52 = vector.load %arg54[%c0_109, %c0_110] : memref<1x32xf32, #tpu.memory_space<vmem>>, vector<1x32xf32>
    %c0_111 = arith.constant 0 : index
    %c0_112 = arith.constant 0 : index
    %53 = vector.load %arg55[%c0_111, %c0_112] : memref<1x32xf32, #tpu.memory_space<vmem>>, vector<1x32xf32>
    %c0_113 = arith.constant 0 : index
    %c0_114 = arith.constant 0 : index
    %54 = vector.load %arg56[%c0_113, %c0_114] : memref<32x16xf32, #tpu.memory_space<vmem>>, vector<32x16xf32>
    %c0_115 = arith.constant 0 : index
    %c0_116 = arith.constant 0 : index
    %55 = vector.load %arg57[%c0_115, %c0_116] : memref<32x16xf32, #tpu.memory_space<vmem>>, vector<32x16xf32>
    %c0_117 = arith.constant 0 : index
    %c0_118 = arith.constant 0 : index
    %56 = vector.load %arg58[%c0_117, %c0_118] : memref<16x32xf32, #tpu.memory_space<vmem>>, vector<16x32xf32>
    %c0_119 = arith.constant 0 : index
    %c0_120 = arith.constant 0 : index
    %57 = vector.load %arg59[%c0_119, %c0_120] : memref<16x32xf32, #tpu.memory_space<vmem>>, vector<16x32xf32>
    %c0_121 = arith.constant 0 : index
    %c0_122 = arith.constant 0 : index
    %58 = vector.load %arg60[%c0_121, %c0_122] : memref<32x16xf32, #tpu.memory_space<vmem>>, vector<32x16xf32>
    %c0_123 = arith.constant 0 : index
    %c0_124 = arith.constant 0 : index
    %59 = vector.load %arg61[%c0_123, %c0_124] : memref<32x16xf32, #tpu.memory_space<vmem>>, vector<32x16xf32>
    %c0_125 = arith.constant 0 : index
    %c0_126 = arith.constant 0 : index
    %60 = vector.load %arg62[%c0_125, %c0_126] : memref<32x16xf32, #tpu.memory_space<vmem>>, vector<32x16xf32>
    %c0_127 = arith.constant 0 : index
    %c0_128 = arith.constant 0 : index
    %61 = vector.load %arg63[%c0_127, %c0_128] : memref<32x16xf32, #tpu.memory_space<vmem>>, vector<32x16xf32>
    %c0_129 = arith.constant 0 : index
    %c0_130 = arith.constant 0 : index
    %62 = vector.load %arg64[%c0_129, %c0_130] : memref<1x32xf32, #tpu.memory_space<vmem>>, vector<1x32xf32>
    %c0_131 = arith.constant 0 : index
    %c0_132 = arith.constant 0 : index
    %63 = vector.load %arg65[%c0_131, %c0_132] : memref<32x32xf32, #tpu.memory_space<vmem>>, vector<32x32xf32>
    %c0_133 = arith.constant 0 : index
    %c0_134 = arith.constant 0 : index
    %64 = vector.load %arg66[%c0_133, %c0_134] : memref<1x32xf32, #tpu.memory_space<vmem>>, vector<1x32xf32>
    %c0_135 = arith.constant 0 : index
    %c0_136 = arith.constant 0 : index
    %65 = vector.load %arg67[%c0_135, %c0_136] : memref<32x32xf32, #tpu.memory_space<vmem>>, vector<32x32xf32>
    %c0_137 = arith.constant 0 : index
    %c0_138 = arith.constant 0 : index
    %66 = vector.load %arg68[%c0_137, %c0_138] : memref<1x1xf32, #tpu.memory_space<vmem>>, vector<1x1xf32>
    %c0_139 = arith.constant 0 : index
    %c0_140 = arith.constant 0 : index
    %67 = vector.load %arg69[%c0_139, %c0_140] : memref<32x1xf32, #tpu.memory_space<vmem>>, vector<32x1xf32>
    %c0_141 = arith.constant 0 : index
    %c0_142 = arith.constant 0 : index
    %68 = vector.load %arg70[%c0_141, %c0_142] : memref<2x1xf32, #tpu.memory_space<vmem>>, vector<2x1xf32>
    %c0_143 = arith.constant 0 : index
    %c0_144 = arith.constant 0 : index
    %69 = vector.load %arg71[%c0_143, %c0_144] : memref<2x1xf32, #tpu.memory_space<vmem>>, vector<2x1xf32>
    %c0_145 = arith.constant 0 : index
    %c0_146 = arith.constant 0 : index
    %70 = vector.load %arg72[%c0_145, %c0_146] : memref<2x1xf32, #tpu.memory_space<vmem>>, vector<2x1xf32>
    %c0_147 = arith.constant 0 : index
    %c0_148 = arith.constant 0 : index
    %71 = vector.load %arg73[%c0_147, %c0_148] : memref<2x1xf32, #tpu.memory_space<vmem>>, vector<2x1xf32>
    %c0_149 = arith.constant 0 : index
    %c0_150 = arith.constant 0 : index
    %72 = vector.load %arg74[%c0_149, %c0_150] : memref<1x32xf32, #tpu.memory_space<vmem>>, vector<1x32xf32>
    %c0_151 = arith.constant 0 : index
    %c0_152 = arith.constant 0 : index
    %73 = vector.load %arg75[%c0_151, %c0_152] : memref<32x32xf32, #tpu.memory_space<vmem>>, vector<32x32xf32>
    %c0_153 = arith.constant 0 : index
    %c0_154 = arith.constant 0 : index
    %74 = vector.load %arg76[%c0_153, %c0_154] : memref<1x32xf32, #tpu.memory_space<vmem>>, vector<1x32xf32>
    %c0_155 = arith.constant 0 : index
    %c0_156 = arith.constant 0 : index
    %75 = vector.load %arg77[%c0_155, %c0_156] : memref<32x32xf32, #tpu.memory_space<vmem>>, vector<32x32xf32>
    %c0_157 = arith.constant 0 : index
    %c0_158 = arith.constant 0 : index
    %76 = vector.load %arg78[%c0_157, %c0_158] : memref<1x4xf32, #tpu.memory_space<vmem>>, vector<1x4xf32>
    %c0_159 = arith.constant 0 : index
    %c0_160 = arith.constant 0 : index
    %77 = vector.load %arg79[%c0_159, %c0_160] : memref<32x4xf32, #tpu.memory_space<vmem>>, vector<32x4xf32>
    %c0_161 = arith.constant 0 : index
    %c0_162 = arith.constant 0 : index
    %c0_163 = arith.constant 0 : index
    %78 = vector.load %arg80[%c0_161, %c0_162, %c0_163] : memref<2x1x1xf32, #tpu.memory_space<vmem>>, vector<2x1x1xf32>
    %c0_164 = arith.constant 0 : index
    %c0_165 = arith.constant 0 : index
    %c0_166 = arith.constant 0 : index
    %79 = vector.load %arg81[%c0_164, %c0_165, %c0_166] : memref<2x1x1xf32, #tpu.memory_space<vmem>>, vector<2x1x1xf32>
    %c0_167 = arith.constant 0 : index
    %c0_168 = arith.constant 0 : index
    %c0_169 = arith.constant 0 : index
    %80 = vector.load %arg82[%c0_167, %c0_168, %c0_169] : memref<2x1x1xf32, #tpu.memory_space<vmem>>, vector<2x1x1xf32>
    %c0_170 = arith.constant 0 : index
    %c0_171 = arith.constant 0 : index
    %c0_172 = arith.constant 0 : index
    %81 = vector.load %arg83[%c0_170, %c0_171, %c0_172] : memref<2x1x1xf32, #tpu.memory_space<vmem>>, vector<2x1x1xf32>
    %c0_173 = arith.constant 0 : index
    %c0_174 = arith.constant 0 : index
    %82 = vector.load %arg84[%c0_173, %c0_174] : memref<1x32xf32, #tpu.memory_space<vmem>>, vector<1x32xf32>
    %c0_175 = arith.constant 0 : index
    %c0_176 = arith.constant 0 : index
    %83 = vector.load %arg85[%c0_175, %c0_176] : memref<4x32xf32, #tpu.memory_space<vmem>>, vector<4x32xf32>
    %c0_177 = arith.constant 0 : index
    %c0_178 = arith.constant 0 : index
    %c0_179 = arith.constant 0 : index
    %84 = vector.load %arg0[%c0_177, %c0_178, %c0_179] : memref<2x8x4xf32, #tpu.memory_space<vmem>>, vector<2x8x4xf32>
    %c0_180 = arith.constant 0 : index
    %c0_181 = arith.constant 0 : index
    %85 = vector.load %arg1[%c0_180, %c0_181] : memref<8x32xf32, #tpu.memory_space<vmem>>, vector<8x32xf32>
    %86 = vector.shape_cast %84 : vector<2x8x4xf32> to vector<16x4xf32>
    %cst = arith.constant dense<0.000000e+00> : vector<16x32xf32>
    %87 = tpu.matmul %86, %83, %cst {dimension_numbers = #tpu.dot_dimension_numbers<[1], [0], [0], [1], [0, 0, 1, 1], [], []>} : vector<16x4xf32>, vector<4x32xf32>, vector<16x32xf32> -> vector<16x32xf32>
    %88 = vector.broadcast %82 : vector<1x32xf32> to vector<16x32xf32>
    %89 = arith.addf %87, %88 : vector<16x32xf32>
    %90 = vector.shape_cast %89 : vector<16x32xf32> to vector<2x8x32xf32>
    %cst_182 = arith.constant dense<0.000000e+00> : vector<2x8xf32>
    %91 = vector.multi_reduction <add>, %90, %cst_182 [2] : vector<2x8x32xf32> to vector<2x8xf32>
    %92 = vector.shape_cast %91 : vector<2x8xf32> to vector<2x8x1xf32>
    %cst_183 = arith.constant 3.200000e+01 : f32
    %93 = vector.broadcast %cst_183 : f32 to vector<2x8x1xf32>
    %94 = arith.divf %92, %93 : vector<2x8x1xf32>
    %cst_184 = arith.constant dense<0.000000e+00> : vector<2x1xf32>
    %95 = vector.multi_reduction <add>, %94, %cst_184 [1] : vector<2x8x1xf32> to vector<2x1xf32>
    %96 = vector.shape_cast %95 : vector<2x1xf32> to vector<2x1x1xf32>
    %cst_185 = arith.constant 8.000000e+00 : f32
    %97 = vector.broadcast %cst_185 : f32 to vector<2x1x1xf32>
    %98 = arith.divf %96, %97 : vector<2x1x1xf32>
    %99 = vector.broadcast %98 : vector<2x1x1xf32> to vector<2x8x32xf32>
    %100 = arith.subf %90, %99 : vector<2x8x32xf32>
    %101 = arith.mulf %100, %100 : vector<2x8x32xf32>
    %cst_186 = arith.constant dense<0.000000e+00> : vector<2x8xf32>
    %102 = vector.multi_reduction <add>, %101, %cst_186 [2] : vector<2x8x32xf32> to vector<2x8xf32>
    %103 = vector.shape_cast %102 : vector<2x8xf32> to vector<2x8x1xf32>
    %cst_187 = arith.constant 3.200000e+01 : f32
    %104 = vector.broadcast %cst_187 : f32 to vector<2x8x1xf32>
    %105 = arith.divf %103, %104 : vector<2x8x1xf32>
    %cst_188 = arith.constant dense<0.000000e+00> : vector<2x1xf32>
    %106 = vector.multi_reduction <add>, %105, %cst_188 [1] : vector<2x8x1xf32> to vector<2x1xf32>
    %107 = vector.shape_cast %106 : vector<2x1xf32> to vector<2x1x1xf32>
    %cst_189 = arith.constant 8.000000e+00 : f32
    %108 = vector.broadcast %cst_189 : f32 to vector<2x1x1xf32>
    %109 = arith.divf %107, %108 : vector<2x1x1xf32>
    %110 = vector.broadcast %98 : vector<2x1x1xf32> to vector<2x8x32xf32>
    %111 = arith.subf %90, %110 : vector<2x8x32xf32>
    %cst_190 = arith.constant 9.99999974E-6 : f32
    %112 = vector.broadcast %cst_190 : f32 to vector<2x1x1xf32>
    %113 = arith.addf %109, %112 : vector<2x1x1xf32>
    %114 = math.rsqrt %113 : vector<2x1x1xf32>
    %115 = vector.broadcast %114 : vector<2x1x1xf32> to vector<2x8x32xf32>
    %116 = arith.mulf %111, %115 : vector<2x8x32xf32>
    %117 = vector.broadcast %1 : vector<2x1x1xf32> to vector<2x8x32xf32>
    %118 = arith.mulf %116, %117 : vector<2x8x32xf32>
    %119 = vector.broadcast %0 : vector<2x1x1xf32> to vector<2x8x32xf32>
    %120 = arith.addf %118, %119 : vector<2x8x32xf32>
    %121 = vector.shape_cast %85 : vector<8x32xf32> to vector<1x8x32xf32>
    %122 = vector.broadcast %121 : vector<1x8x32xf32> to vector<2x8x32xf32>
    %123 = arith.addf %120, %122 : vector<2x8x32xf32>
    %cst_191 = arith.constant dense<0.000000e+00> : vector<2x8xf32>
    %124 = vector.multi_reduction <add>, %123, %cst_191 [2] : vector<2x8x32xf32> to vector<2x8xf32>
    %125 = vector.shape_cast %124 : vector<2x8xf32> to vector<2x8x1xf32>
    %cst_192 = arith.constant 3.200000e+01 : f32
    %126 = vector.broadcast %cst_192 : f32 to vector<2x8x1xf32>
    %127 = arith.divf %125, %126 : vector<2x8x1xf32>
    %cst_193 = arith.constant dense<0.000000e+00> : vector<2x1xf32>
    %128 = vector.multi_reduction <add>, %127, %cst_193 [1] : vector<2x8x1xf32> to vector<2x1xf32>
    %129 = vector.shape_cast %128 : vector<2x1xf32> to vector<2x1x1xf32>
    %cst_194 = arith.constant 8.000000e+00 : f32
    %130 = vector.broadcast %cst_194 : f32 to vector<2x1x1xf32>
    %131 = arith.divf %129, %130 : vector<2x1x1xf32>
    %132 = vector.broadcast %131 : vector<2x1x1xf32> to vector<2x8x32xf32>
    %133 = arith.subf %123, %132 : vector<2x8x32xf32>
    %134 = arith.mulf %133, %133 : vector<2x8x32xf32>
    %cst_195 = arith.constant dense<0.000000e+00> : vector<2x8xf32>
    %135 = vector.multi_reduction <add>, %134, %cst_195 [2] : vector<2x8x32xf32> to vector<2x8xf32>
    %136 = vector.shape_cast %135 : vector<2x8xf32> to vector<2x8x1xf32>
    %cst_196 = arith.constant 3.200000e+01 : f32
    %137 = vector.broadcast %cst_196 : f32 to vector<2x8x1xf32>
    %138 = arith.divf %136, %137 : vector<2x8x1xf32>
    %cst_197 = arith.constant dense<0.000000e+00> : vector<2x1xf32>
    %139 = vector.multi_reduction <add>, %138, %cst_197 [1] : vector<2x8x1xf32> to vector<2x1xf32>
    %140 = vector.shape_cast %139 : vector<2x1xf32> to vector<2x1x1xf32>
    %cst_198 = arith.constant 8.000000e+00 : f32
    %141 = vector.broadcast %cst_198 : f32 to vector<2x1x1xf32>
    %142 = arith.divf %140, %141 : vector<2x1x1xf32>
    %143 = vector.broadcast %131 : vector<2x1x1xf32> to vector<2x8x32xf32>
    %144 = arith.subf %123, %143 : vector<2x8x32xf32>
    %cst_199 = arith.constant 9.99999974E-6 : f32
    %145 = vector.broadcast %cst_199 : f32 to vector<2x1x1xf32>
    %146 = arith.addf %142, %145 : vector<2x1x1xf32>
    %147 = math.rsqrt %146 : vector<2x1x1xf32>
    %148 = vector.broadcast %147 : vector<2x1x1xf32> to vector<2x8x32xf32>
    %149 = arith.mulf %144, %148 : vector<2x8x32xf32>
    %150 = vector.broadcast %3 : vector<2x1x1xf32> to vector<2x8x32xf32>
    %151 = arith.mulf %149, %150 : vector<2x8x32xf32>
    %152 = vector.broadcast %2 : vector<2x1x1xf32> to vector<2x8x32xf32>
    %153 = arith.addf %151, %152 : vector<2x8x32xf32>
    %154 = vector.shape_cast %153 : vector<2x8x32xf32> to vector<16x32xf32>
    %cst_200 = arith.constant 0.000000e+00 : f32
    %155 = vector.broadcast %cst_200 : f32 to vector<16x32xf32>
    %cst_201 = arith.constant dense<0.000000e+00> : vector<16x16xf32>
    %156 = tpu.matmul %154, %35, %cst_201 {dimension_numbers = #tpu.dot_dimension_numbers<[1], [0], [0], [1], [0, 0, 1, 1], [], []>} : vector<16x32xf32>, vector<32x16xf32>, vector<16x16xf32> -> vector<16x16xf32>
    %157 = vector.broadcast %18 : vector<1x16xf32> to vector<16x16xf32>
    %158 = arith.addf %156, %157 : vector<16x16xf32>
    %159 = vector.shape_cast %158 : vector<16x16xf32> to vector<2x8x16xf32>
    %cst_202 = arith.constant dense<0.000000e+00> : vector<16x16xf32>
    %160 = tpu.matmul %154, %31, %cst_202 {dimension_numbers = #tpu.dot_dimension_numbers<[1], [0], [0], [1], [0, 0, 1, 1], [], []>} : vector<16x32xf32>, vector<32x16xf32>, vector<16x16xf32> -> vector<16x16xf32>
    %161 = vector.broadcast %16 : vector<1x16xf32> to vector<16x16xf32>
    %162 = arith.addf %160, %161 : vector<16x16xf32>
    %163 = vector.shape_cast %162 : vector<16x16xf32> to vector<2x8x16xf32>
    %cst_203 = arith.constant dense<0.000000e+00> : vector<16x16xf32>
    %164 = tpu.matmul %154, %37, %cst_203 {dimension_numbers = #tpu.dot_dimension_numbers<[1], [0], [0], [1], [0, 0, 1, 1], [], []>} : vector<16x32xf32>, vector<32x16xf32>, vector<16x16xf32> -> vector<16x16xf32>
    %165 = vector.broadcast %20 : vector<1x16xf32> to vector<16x16xf32>
    %166 = arith.addf %164, %165 : vector<16x16xf32>
    %167 = vector.shape_cast %166 : vector<16x16xf32> to vector<2x8x16xf32>
    "tpu.trace_start"() <{level = 10 : i32, message = "bqd,bkd->bqk"}> : () -> ()
    %cst_204 = arith.constant dense<0.000000e+00> : vector<2x8x8xf32>
    %168 = tpu.matmul %159, %163, %cst_204 {dimension_numbers = #tpu.dot_dimension_numbers<[2], [2], [1], [1], [0, 0, 0, 1, 1, 1], [0], [0]>} : vector<2x8x16xf32>, vector<2x8x16xf32>, vector<2x8x8xf32> -> vector<2x8x8xf32>
    "tpu.trace_stop"() : () -> ()
    %cst_205 = arith.constant 2.500000e-01 : f32
    %169 = vector.broadcast %cst_205 : f32 to vector<2x8x8xf32>
    %170 = arith.mulf %168, %169 : vector<2x8x8xf32>
    %cst_206 = arith.constant dense<0xFF800000> : vector<2x8xf32>
    %171 = vector.multi_reduction <maximumf>, %170, %cst_206 [2] : vector<2x8x8xf32> to vector<2x8xf32>
    %172 = vector.shape_cast %171 : vector<2x8xf32> to vector<2x8x1xf32>
    %173 = vector.broadcast %172 : vector<2x8x1xf32> to vector<2x8x8xf32>
    %174 = arith.subf %170, %173 : vector<2x8x8xf32>
    %175 = math.exp %174 : vector<2x8x8xf32>
    %cst_207 = arith.constant dense<0.000000e+00> : vector<2x8xf32>
    %176 = vector.multi_reduction <add>, %175, %cst_207 [2] : vector<2x8x8xf32> to vector<2x8xf32>
    %177 = vector.shape_cast %176 : vector<2x8xf32> to vector<2x8x1xf32>
    %178 = tpu.reciprocal %177 {approx = true} : vector<2x8x1xf32> -> vector<2x8x1xf32>
    %179 = vector.broadcast %178 : vector<2x8x1xf32> to vector<2x8x8xf32>
    %180 = arith.mulf %175, %179 : vector<2x8x8xf32>
    "tpu.trace_start"() <{level = 10 : i32, message = "bqk,bkd->bqd"}> : () -> ()
    %cst_208 = arith.constant dense<0.000000e+00> : vector<2x8x16xf32>
    %181 = tpu.matmul %180, %167, %cst_208 {dimension_numbers = #tpu.dot_dimension_numbers<[2], [1], [1], [2], [0, 0, 0, 1, 1, 2], [0], [0]>} : vector<2x8x8xf32>, vector<2x8x16xf32>, vector<2x8x16xf32> -> vector<2x8x16xf32>
    "tpu.trace_stop"() : () -> ()
    %182 = vector.shape_cast %181 : vector<2x8x16xf32> to vector<16x16xf32>
    %cst_209 = arith.constant dense<0.000000e+00> : vector<16x32xf32>
    %183 = tpu.matmul %182, %33, %cst_209 {dimension_numbers = #tpu.dot_dimension_numbers<[1], [0], [0], [1], [0, 0, 1, 1], [], []>} : vector<16x16xf32>, vector<16x32xf32>, vector<16x32xf32> -> vector<16x32xf32>
    %184 = arith.addf %155, %183 : vector<16x32xf32>
    %cst_210 = arith.constant dense<0.000000e+00> : vector<16x16xf32>
    %185 = tpu.matmul %154, %36, %cst_210 {dimension_numbers = #tpu.dot_dimension_numbers<[1], [0], [0], [1], [0, 0, 1, 1], [], []>} : vector<16x32xf32>, vector<32x16xf32>, vector<16x16xf32> -> vector<16x16xf32>
    %186 = vector.broadcast %19 : vector<1x16xf32> to vector<16x16xf32>
    %187 = arith.addf %185, %186 : vector<16x16xf32>
    %188 = vector.shape_cast %187 : vector<16x16xf32> to vector<2x8x16xf32>
    %cst_211 = arith.constant dense<0.000000e+00> : vector<16x16xf32>
    %189 = tpu.matmul %154, %32, %cst_211 {dimension_numbers = #tpu.dot_dimension_numbers<[1], [0], [0], [1], [0, 0, 1, 1], [], []>} : vector<16x32xf32>, vector<32x16xf32>, vector<16x16xf32> -> vector<16x16xf32>
    %190 = vector.broadcast %17 : vector<1x16xf32> to vector<16x16xf32>
    %191 = arith.addf %189, %190 : vector<16x16xf32>
    %192 = vector.shape_cast %191 : vector<16x16xf32> to vector<2x8x16xf32>
    %cst_212 = arith.constant dense<0.000000e+00> : vector<16x16xf32>
    %193 = tpu.matmul %154, %38, %cst_212 {dimension_numbers = #tpu.dot_dimension_numbers<[1], [0], [0], [1], [0, 0, 1, 1], [], []>} : vector<16x32xf32>, vector<32x16xf32>, vector<16x16xf32> -> vector<16x16xf32>
    %194 = vector.broadcast %21 : vector<1x16xf32> to vector<16x16xf32>
    %195 = arith.addf %193, %194 : vector<16x16xf32>
    %196 = vector.shape_cast %195 : vector<16x16xf32> to vector<2x8x16xf32>
    "tpu.trace_start"() <{level = 10 : i32, message = "bqd,bkd->bqk"}> : () -> ()
    %cst_213 = arith.constant dense<0.000000e+00> : vector<2x8x8xf32>
    %197 = tpu.matmul %188, %192, %cst_213 {dimension_numbers = #tpu.dot_dimension_numbers<[2], [2], [1], [1], [0, 0, 0, 1, 1, 1], [0], [0]>} : vector<2x8x16xf32>, vector<2x8x16xf32>, vector<2x8x8xf32> -> vector<2x8x8xf32>
    "tpu.trace_stop"() : () -> ()
    %cst_214 = arith.constant 2.500000e-01 : f32
    %198 = vector.broadcast %cst_214 : f32 to vector<2x8x8xf32>
    %199 = arith.mulf %197, %198 : vector<2x8x8xf32>
    %cst_215 = arith.constant dense<0xFF800000> : vector<2x8xf32>
    %200 = vector.multi_reduction <maximumf>, %199, %cst_215 [2] : vector<2x8x8xf32> to vector<2x8xf32>
    %201 = vector.shape_cast %200 : vector<2x8xf32> to vector<2x8x1xf32>
    %202 = vector.broadcast %201 : vector<2x8x1xf32> to vector<2x8x8xf32>
    %203 = arith.subf %199, %202 : vector<2x8x8xf32>
    %204 = math.exp %203 : vector<2x8x8xf32>
    %cst_216 = arith.constant dense<0.000000e+00> : vector<2x8xf32>
    %205 = vector.multi_reduction <add>, %204, %cst_216 [2] : vector<2x8x8xf32> to vector<2x8xf32>
    %206 = vector.shape_cast %205 : vector<2x8xf32> to vector<2x8x1xf32>
    %207 = tpu.reciprocal %206 {approx = true} : vector<2x8x1xf32> -> vector<2x8x1xf32>
    %208 = vector.broadcast %207 : vector<2x8x1xf32> to vector<2x8x8xf32>
    %209 = arith.mulf %204, %208 : vector<2x8x8xf32>
    "tpu.trace_start"() <{level = 10 : i32, message = "bqk,bkd->bqd"}> : () -> ()
    %cst_217 = arith.constant dense<0.000000e+00> : vector<2x8x16xf32>
    %210 = tpu.matmul %209, %196, %cst_217 {dimension_numbers = #tpu.dot_dimension_numbers<[2], [1], [1], [2], [0, 0, 0, 1, 1, 2], [0], [0]>} : vector<2x8x8xf32>, vector<2x8x16xf32>, vector<2x8x16xf32> -> vector<2x8x16xf32>
    "tpu.trace_stop"() : () -> ()
    %211 = vector.shape_cast %210 : vector<2x8x16xf32> to vector<16x16xf32>
    %cst_218 = arith.constant dense<0.000000e+00> : vector<16x32xf32>
    %212 = tpu.matmul %211, %34, %cst_218 {dimension_numbers = #tpu.dot_dimension_numbers<[1], [0], [0], [1], [0, 0, 1, 1], [], []>} : vector<16x16xf32>, vector<16x32xf32>, vector<16x32xf32> -> vector<16x32xf32>
    %213 = arith.addf %184, %212 : vector<16x32xf32>
    %214 = vector.broadcast %30 : vector<1x32xf32> to vector<16x32xf32>
    %215 = arith.addf %213, %214 : vector<16x32xf32>
    %216 = arith.addf %154, %215 : vector<16x32xf32>
    %cst_219 = arith.constant dense<0.000000e+00> : vector<16xf32>
    %217 = vector.multi_reduction <add>, %216, %cst_219 [1] : vector<16x32xf32> to vector<16xf32>
    %218 = vector.shape_cast %217 : vector<16xf32> to vector<16x1xf32>
    %cst_220 = arith.constant 3.200000e+01 : f32
    %219 = vector.broadcast %cst_220 : f32 to vector<16x1xf32>
    %220 = arith.divf %218, %219 : vector<16x1xf32>
    %221 = vector.broadcast %220 : vector<16x1xf32> to vector<16x32xf32>
    %222 = arith.subf %216, %221 : vector<16x32xf32>
    %223 = arith.mulf %222, %222 : vector<16x32xf32>
    %cst_221 = arith.constant dense<0.000000e+00> : vector<16xf32>
    %224 = vector.multi_reduction <add>, %223, %cst_221 [1] : vector<16x32xf32> to vector<16xf32>
    %225 = vector.shape_cast %224 : vector<16xf32> to vector<16x1xf32>
    %cst_222 = arith.constant 3.200000e+01 : f32
    %226 = vector.broadcast %cst_222 : f32 to vector<16x1xf32>
    %227 = arith.divf %225, %226 : vector<16x1xf32>
    %228 = vector.broadcast %220 : vector<16x1xf32> to vector<16x32xf32>
    %229 = arith.subf %216, %228 : vector<16x32xf32>
    %cst_223 = arith.constant 9.99999974E-6 : f32
    %230 = vector.broadcast %cst_223 : f32 to vector<16x1xf32>
    %231 = arith.addf %227, %230 : vector<16x1xf32>
    %232 = math.rsqrt %231 : vector<16x1xf32>
    %233 = vector.broadcast %232 : vector<16x1xf32> to vector<16x32xf32>
    %234 = arith.mulf %229, %233 : vector<16x32xf32>
    %235 = vector.broadcast %27 : vector<1x32xf32> to vector<16x32xf32>
    %236 = arith.mulf %234, %235 : vector<16x32xf32>
    %237 = vector.broadcast %26 : vector<1x32xf32> to vector<16x32xf32>
    %238 = arith.addf %236, %237 : vector<16x32xf32>
    %cst_224 = arith.constant dense<0.000000e+00> : vector<16x64xf32>
    %239 = tpu.matmul %238, %23, %cst_224 {dimension_numbers = #tpu.dot_dimension_numbers<[1], [0], [0], [1], [0, 0, 1, 1], [], []>} : vector<16x32xf32>, vector<32x64xf32>, vector<16x64xf32> -> vector<16x64xf32>
    %240 = vector.broadcast %22 : vector<1x64xf32> to vector<16x64xf32>
    %241 = arith.addf %239, %240 : vector<16x64xf32>
    %cst_225 = arith.constant 0.000000e+00 : f32
    %242 = vector.broadcast %cst_225 : f32 to vector<16x64xf32>
    %243 = arith.maximumf %241, %242 : vector<16x64xf32>
    %cst_226 = arith.constant dense<0.000000e+00> : vector<16x32xf32>
    %244 = tpu.matmul %243, %25, %cst_226 {dimension_numbers = #tpu.dot_dimension_numbers<[1], [0], [0], [1], [0, 0, 1, 1], [], []>} : vector<16x64xf32>, vector<64x32xf32>, vector<16x32xf32> -> vector<16x32xf32>
    %245 = vector.broadcast %24 : vector<1x32xf32> to vector<16x32xf32>
    %246 = arith.addf %244, %245 : vector<16x32xf32>
    %247 = arith.addf %238, %246 : vector<16x32xf32>
    %cst_227 = arith.constant dense<0.000000e+00> : vector<16xf32>
    %248 = vector.multi_reduction <add>, %247, %cst_227 [1] : vector<16x32xf32> to vector<16xf32>
    %249 = vector.shape_cast %248 : vector<16xf32> to vector<16x1xf32>
    %cst_228 = arith.constant 3.200000e+01 : f32
    %250 = vector.broadcast %cst_228 : f32 to vector<16x1xf32>
    %251 = arith.divf %249, %250 : vector<16x1xf32>
    %252 = vector.broadcast %251 : vector<16x1xf32> to vector<16x32xf32>
    %253 = arith.subf %247, %252 : vector<16x32xf32>
    %254 = arith.mulf %253, %253 : vector<16x32xf32>
    %cst_229 = arith.constant dense<0.000000e+00> : vector<16xf32>
    %255 = vector.multi_reduction <add>, %254, %cst_229 [1] : vector<16x32xf32> to vector<16xf32>
    %256 = vector.shape_cast %255 : vector<16xf32> to vector<16x1xf32>
    %cst_230 = arith.constant 3.200000e+01 : f32
    %257 = vector.broadcast %cst_230 : f32 to vector<16x1xf32>
    %258 = arith.divf %256, %257 : vector<16x1xf32>
    %259 = vector.broadcast %251 : vector<16x1xf32> to vector<16x32xf32>
    %260 = arith.subf %247, %259 : vector<16x32xf32>
    %cst_231 = arith.constant 9.99999974E-6 : f32
    %261 = vector.broadcast %cst_231 : f32 to vector<16x1xf32>
    %262 = arith.addf %258, %261 : vector<16x1xf32>
    %263 = math.rsqrt %262 : vector<16x1xf32>
    %264 = vector.broadcast %263 : vector<16x1xf32> to vector<16x32xf32>
    %265 = arith.mulf %260, %264 : vector<16x32xf32>
    %266 = vector.broadcast %29 : vector<1x32xf32> to vector<16x32xf32>
    %267 = arith.mulf %265, %266 : vector<16x32xf32>
    %268 = vector.broadcast %28 : vector<1x32xf32> to vector<16x32xf32>
    %269 = arith.addf %267, %268 : vector<16x32xf32>
    %270 = vector.shape_cast %269 : vector<16x32xf32> to vector<2x8x32xf32>
    %271 = vector.shape_cast %270 : vector<2x8x32xf32> to vector<16x32xf32>
    %cst_232 = arith.constant 0.000000e+00 : f32
    %272 = vector.broadcast %cst_232 : f32 to vector<16x32xf32>
    %cst_233 = arith.constant dense<0.000000e+00> : vector<16x16xf32>
    %273 = tpu.matmul %271, %58, %cst_233 {dimension_numbers = #tpu.dot_dimension_numbers<[1], [0], [0], [1], [0, 0, 1, 1], [], []>} : vector<16x32xf32>, vector<32x16xf32>, vector<16x16xf32> -> vector<16x16xf32>
    %274 = vector.broadcast %41 : vector<1x16xf32> to vector<16x16xf32>
    %275 = arith.addf %273, %274 : vector<16x16xf32>
    %276 = vector.shape_cast %275 : vector<16x16xf32> to vector<2x8x16xf32>
    %cst_234 = arith.constant dense<0.000000e+00> : vector<16x16xf32>
    %277 = tpu.matmul %271, %54, %cst_234 {dimension_numbers = #tpu.dot_dimension_numbers<[1], [0], [0], [1], [0, 0, 1, 1], [], []>} : vector<16x32xf32>, vector<32x16xf32>, vector<16x16xf32> -> vector<16x16xf32>
    %278 = vector.broadcast %39 : vector<1x16xf32> to vector<16x16xf32>
    %279 = arith.addf %277, %278 : vector<16x16xf32>
    %280 = vector.shape_cast %279 : vector<16x16xf32> to vector<2x8x16xf32>
    %cst_235 = arith.constant dense<0.000000e+00> : vector<16x16xf32>
    %281 = tpu.matmul %271, %60, %cst_235 {dimension_numbers = #tpu.dot_dimension_numbers<[1], [0], [0], [1], [0, 0, 1, 1], [], []>} : vector<16x32xf32>, vector<32x16xf32>, vector<16x16xf32> -> vector<16x16xf32>
    %282 = vector.broadcast %43 : vector<1x16xf32> to vector<16x16xf32>
    %283 = arith.addf %281, %282 : vector<16x16xf32>
    %284 = vector.shape_cast %283 : vector<16x16xf32> to vector<2x8x16xf32>
    "tpu.trace_start"() <{level = 10 : i32, message = "bqd,bkd->bqk"}> : () -> ()
    %cst_236 = arith.constant dense<0.000000e+00> : vector<2x8x8xf32>
    %285 = tpu.matmul %276, %280, %cst_236 {dimension_numbers = #tpu.dot_dimension_numbers<[2], [2], [1], [1], [0, 0, 0, 1, 1, 1], [0], [0]>} : vector<2x8x16xf32>, vector<2x8x16xf32>, vector<2x8x8xf32> -> vector<2x8x8xf32>
    "tpu.trace_stop"() : () -> ()
    %cst_237 = arith.constant 2.500000e-01 : f32
    %286 = vector.broadcast %cst_237 : f32 to vector<2x8x8xf32>
    %287 = arith.mulf %285, %286 : vector<2x8x8xf32>
    %cst_238 = arith.constant dense<0xFF800000> : vector<2x8xf32>
    %288 = vector.multi_reduction <maximumf>, %287, %cst_238 [2] : vector<2x8x8xf32> to vector<2x8xf32>
    %289 = vector.shape_cast %288 : vector<2x8xf32> to vector<2x8x1xf32>
    %290 = vector.broadcast %289 : vector<2x8x1xf32> to vector<2x8x8xf32>
    %291 = arith.subf %287, %290 : vector<2x8x8xf32>
    %292 = math.exp %291 : vector<2x8x8xf32>
    %cst_239 = arith.constant dense<0.000000e+00> : vector<2x8xf32>
    %293 = vector.multi_reduction <add>, %292, %cst_239 [2] : vector<2x8x8xf32> to vector<2x8xf32>
    %294 = vector.shape_cast %293 : vector<2x8xf32> to vector<2x8x1xf32>
    %295 = tpu.reciprocal %294 {approx = true} : vector<2x8x1xf32> -> vector<2x8x1xf32>
    %296 = vector.broadcast %295 : vector<2x8x1xf32> to vector<2x8x8xf32>
    %297 = arith.mulf %292, %296 : vector<2x8x8xf32>
    "tpu.trace_start"() <{level = 10 : i32, message = "bqk,bkd->bqd"}> : () -> ()
    %cst_240 = arith.constant dense<0.000000e+00> : vector<2x8x16xf32>
    %298 = tpu.matmul %297, %284, %cst_240 {dimension_numbers = #tpu.dot_dimension_numbers<[2], [1], [1], [2], [0, 0, 0, 1, 1, 2], [0], [0]>} : vector<2x8x8xf32>, vector<2x8x16xf32>, vector<2x8x16xf32> -> vector<2x8x16xf32>
    "tpu.trace_stop"() : () -> ()
    %299 = vector.shape_cast %298 : vector<2x8x16xf32> to vector<16x16xf32>
    %cst_241 = arith.constant dense<0.000000e+00> : vector<16x32xf32>
    %300 = tpu.matmul %299, %56, %cst_241 {dimension_numbers = #tpu.dot_dimension_numbers<[1], [0], [0], [1], [0, 0, 1, 1], [], []>} : vector<16x16xf32>, vector<16x32xf32>, vector<16x32xf32> -> vector<16x32xf32>
    %301 = arith.addf %272, %300 : vector<16x32xf32>
    %cst_242 = arith.constant dense<0.000000e+00> : vector<16x16xf32>
    %302 = tpu.matmul %271, %59, %cst_242 {dimension_numbers = #tpu.dot_dimension_numbers<[1], [0], [0], [1], [0, 0, 1, 1], [], []>} : vector<16x32xf32>, vector<32x16xf32>, vector<16x16xf32> -> vector<16x16xf32>
    %303 = vector.broadcast %42 : vector<1x16xf32> to vector<16x16xf32>
    %304 = arith.addf %302, %303 : vector<16x16xf32>
    %305 = vector.shape_cast %304 : vector<16x16xf32> to vector<2x8x16xf32>
    %cst_243 = arith.constant dense<0.000000e+00> : vector<16x16xf32>
    %306 = tpu.matmul %271, %55, %cst_243 {dimension_numbers = #tpu.dot_dimension_numbers<[1], [0], [0], [1], [0, 0, 1, 1], [], []>} : vector<16x32xf32>, vector<32x16xf32>, vector<16x16xf32> -> vector<16x16xf32>
    %307 = vector.broadcast %40 : vector<1x16xf32> to vector<16x16xf32>
    %308 = arith.addf %306, %307 : vector<16x16xf32>
    %309 = vector.shape_cast %308 : vector<16x16xf32> to vector<2x8x16xf32>
    %cst_244 = arith.constant dense<0.000000e+00> : vector<16x16xf32>
    %310 = tpu.matmul %271, %61, %cst_244 {dimension_numbers = #tpu.dot_dimension_numbers<[1], [0], [0], [1], [0, 0, 1, 1], [], []>} : vector<16x32xf32>, vector<32x16xf32>, vector<16x16xf32> -> vector<16x16xf32>
    %311 = vector.broadcast %44 : vector<1x16xf32> to vector<16x16xf32>
    %312 = arith.addf %310, %311 : vector<16x16xf32>
    %313 = vector.shape_cast %312 : vector<16x16xf32> to vector<2x8x16xf32>
    "tpu.trace_start"() <{level = 10 : i32, message = "bqd,bkd->bqk"}> : () -> ()
    %cst_245 = arith.constant dense<0.000000e+00> : vector<2x8x8xf32>
    %314 = tpu.matmul %305, %309, %cst_245 {dimension_numbers = #tpu.dot_dimension_numbers<[2], [2], [1], [1], [0, 0, 0, 1, 1, 1], [0], [0]>} : vector<2x8x16xf32>, vector<2x8x16xf32>, vector<2x8x8xf32> -> vector<2x8x8xf32>
    "tpu.trace_stop"() : () -> ()
    %cst_246 = arith.constant 2.500000e-01 : f32
    %315 = vector.broadcast %cst_246 : f32 to vector<2x8x8xf32>
    %316 = arith.mulf %314, %315 : vector<2x8x8xf32>
    %cst_247 = arith.constant dense<0xFF800000> : vector<2x8xf32>
    %317 = vector.multi_reduction <maximumf>, %316, %cst_247 [2] : vector<2x8x8xf32> to vector<2x8xf32>
    %318 = vector.shape_cast %317 : vector<2x8xf32> to vector<2x8x1xf32>
    %319 = vector.broadcast %318 : vector<2x8x1xf32> to vector<2x8x8xf32>
    %320 = arith.subf %316, %319 : vector<2x8x8xf32>
    %321 = math.exp %320 : vector<2x8x8xf32>
    %cst_248 = arith.constant dense<0.000000e+00> : vector<2x8xf32>
    %322 = vector.multi_reduction <add>, %321, %cst_248 [2] : vector<2x8x8xf32> to vector<2x8xf32>
    %323 = vector.shape_cast %322 : vector<2x8xf32> to vector<2x8x1xf32>
    %324 = tpu.reciprocal %323 {approx = true} : vector<2x8x1xf32> -> vector<2x8x1xf32>
    %325 = vector.broadcast %324 : vector<2x8x1xf32> to vector<2x8x8xf32>
    %326 = arith.mulf %321, %325 : vector<2x8x8xf32>
    "tpu.trace_start"() <{level = 10 : i32, message = "bqk,bkd->bqd"}> : () -> ()
    %cst_249 = arith.constant dense<0.000000e+00> : vector<2x8x16xf32>
    %327 = tpu.matmul %326, %313, %cst_249 {dimension_numbers = #tpu.dot_dimension_numbers<[2], [1], [1], [2], [0, 0, 0, 1, 1, 2], [0], [0]>} : vector<2x8x8xf32>, vector<2x8x16xf32>, vector<2x8x16xf32> -> vector<2x8x16xf32>
    "tpu.trace_stop"() : () -> ()
    %328 = vector.shape_cast %327 : vector<2x8x16xf32> to vector<16x16xf32>
    %cst_250 = arith.constant dense<0.000000e+00> : vector<16x32xf32>
    %329 = tpu.matmul %328, %57, %cst_250 {dimension_numbers = #tpu.dot_dimension_numbers<[1], [0], [0], [1], [0, 0, 1, 1], [], []>} : vector<16x16xf32>, vector<16x32xf32>, vector<16x32xf32> -> vector<16x32xf32>
    %330 = arith.addf %301, %329 : vector<16x32xf32>
    %331 = arith.addf %297, %326 : vector<2x8x8xf32>
    %332 = vector.broadcast %53 : vector<1x32xf32> to vector<16x32xf32>
    %333 = arith.addf %330, %332 : vector<16x32xf32>
    %334 = arith.addf %271, %333 : vector<16x32xf32>
    %cst_251 = arith.constant dense<0.000000e+00> : vector<16xf32>
    %335 = vector.multi_reduction <add>, %334, %cst_251 [1] : vector<16x32xf32> to vector<16xf32>
    %336 = vector.shape_cast %335 : vector<16xf32> to vector<16x1xf32>
    %cst_252 = arith.constant 3.200000e+01 : f32
    %337 = vector.broadcast %cst_252 : f32 to vector<16x1xf32>
    %338 = arith.divf %336, %337 : vector<16x1xf32>
    %339 = vector.broadcast %338 : vector<16x1xf32> to vector<16x32xf32>
    %340 = arith.subf %334, %339 : vector<16x32xf32>
    %341 = arith.mulf %340, %340 : vector<16x32xf32>
    %cst_253 = arith.constant dense<0.000000e+00> : vector<16xf32>
    %342 = vector.multi_reduction <add>, %341, %cst_253 [1] : vector<16x32xf32> to vector<16xf32>
    %343 = vector.shape_cast %342 : vector<16xf32> to vector<16x1xf32>
    %cst_254 = arith.constant 3.200000e+01 : f32
    %344 = vector.broadcast %cst_254 : f32 to vector<16x1xf32>
    %345 = arith.divf %343, %344 : vector<16x1xf32>
    %346 = vector.broadcast %338 : vector<16x1xf32> to vector<16x32xf32>
    %347 = arith.subf %334, %346 : vector<16x32xf32>
    %cst_255 = arith.constant 9.99999974E-6 : f32
    %348 = vector.broadcast %cst_255 : f32 to vector<16x1xf32>
    %349 = arith.addf %345, %348 : vector<16x1xf32>
    %350 = math.rsqrt %349 : vector<16x1xf32>
    %351 = vector.broadcast %350 : vector<16x1xf32> to vector<16x32xf32>
    %352 = arith.mulf %347, %351 : vector<16x32xf32>
    %353 = vector.broadcast %50 : vector<1x32xf32> to vector<16x32xf32>
    %354 = arith.mulf %352, %353 : vector<16x32xf32>
    %355 = vector.broadcast %49 : vector<1x32xf32> to vector<16x32xf32>
    %356 = arith.addf %354, %355 : vector<16x32xf32>
    %cst_256 = arith.constant dense<0.000000e+00> : vector<16x64xf32>
    %357 = tpu.matmul %356, %46, %cst_256 {dimension_numbers = #tpu.dot_dimension_numbers<[1], [0], [0], [1], [0, 0, 1, 1], [], []>} : vector<16x32xf32>, vector<32x64xf32>, vector<16x64xf32> -> vector<16x64xf32>
    %358 = vector.broadcast %45 : vector<1x64xf32> to vector<16x64xf32>
    %359 = arith.addf %357, %358 : vector<16x64xf32>
    %cst_257 = arith.constant 0.000000e+00 : f32
    %360 = vector.broadcast %cst_257 : f32 to vector<16x64xf32>
    %361 = arith.maximumf %359, %360 : vector<16x64xf32>
    %cst_258 = arith.constant dense<0.000000e+00> : vector<16x32xf32>
    %362 = tpu.matmul %361, %48, %cst_258 {dimension_numbers = #tpu.dot_dimension_numbers<[1], [0], [0], [1], [0, 0, 1, 1], [], []>} : vector<16x64xf32>, vector<64x32xf32>, vector<16x32xf32> -> vector<16x32xf32>
    %363 = vector.broadcast %47 : vector<1x32xf32> to vector<16x32xf32>
    %364 = arith.addf %362, %363 : vector<16x32xf32>
    %365 = arith.addf %356, %364 : vector<16x32xf32>
    %cst_259 = arith.constant dense<0.000000e+00> : vector<16xf32>
    %366 = vector.multi_reduction <add>, %365, %cst_259 [1] : vector<16x32xf32> to vector<16xf32>
    %367 = vector.shape_cast %366 : vector<16xf32> to vector<16x1xf32>
    %cst_260 = arith.constant 3.200000e+01 : f32
    %368 = vector.broadcast %cst_260 : f32 to vector<16x1xf32>
    %369 = arith.divf %367, %368 : vector<16x1xf32>
    %370 = vector.broadcast %369 : vector<16x1xf32> to vector<16x32xf32>
    %371 = arith.subf %365, %370 : vector<16x32xf32>
    %372 = arith.mulf %371, %371 : vector<16x32xf32>
    %cst_261 = arith.constant dense<0.000000e+00> : vector<16xf32>
    %373 = vector.multi_reduction <add>, %372, %cst_261 [1] : vector<16x32xf32> to vector<16xf32>
    %374 = vector.shape_cast %373 : vector<16xf32> to vector<16x1xf32>
    %cst_262 = arith.constant 3.200000e+01 : f32
    %375 = vector.broadcast %cst_262 : f32 to vector<16x1xf32>
    %376 = arith.divf %374, %375 : vector<16x1xf32>
    %377 = vector.broadcast %369 : vector<16x1xf32> to vector<16x32xf32>
    %378 = arith.subf %365, %377 : vector<16x32xf32>
    %cst_263 = arith.constant 9.99999974E-6 : f32
    %379 = vector.broadcast %cst_263 : f32 to vector<16x1xf32>
    %380 = arith.addf %376, %379 : vector<16x1xf32>
    %381 = math.rsqrt %380 : vector<16x1xf32>
    %382 = vector.broadcast %381 : vector<16x1xf32> to vector<16x32xf32>
    %383 = arith.mulf %378, %382 : vector<16x32xf32>
    %384 = vector.broadcast %52 : vector<1x32xf32> to vector<16x32xf32>
    %385 = arith.mulf %383, %384 : vector<16x32xf32>
    %386 = vector.broadcast %51 : vector<1x32xf32> to vector<16x32xf32>
    %387 = arith.addf %385, %386 : vector<16x32xf32>
    %cst_264 = arith.constant 5.000000e-01 : f32
    %388 = vector.broadcast %cst_264 : f32 to vector<2x8x8xf32>
    %389 = arith.mulf %331, %388 : vector<2x8x8xf32>
    %390 = vector.shape_cast %387 : vector<16x32xf32> to vector<2x8x32xf32>
    %cst_265 = arith.constant dense<0.000000e+00> : vector<2x8xf32>
    %391 = vector.multi_reduction <add>, %390, %cst_265 [2] : vector<2x8x32xf32> to vector<2x8xf32>
    %392 = vector.shape_cast %391 : vector<2x8xf32> to vector<2x8x1xf32>
    %cst_266 = arith.constant 3.200000e+01 : f32
    %393 = vector.broadcast %cst_266 : f32 to vector<2x8x1xf32>
    %394 = arith.divf %392, %393 : vector<2x8x1xf32>
    %cst_267 = arith.constant dense<0.000000e+00> : vector<2x1xf32>
    %395 = vector.multi_reduction <add>, %394, %cst_267 [1] : vector<2x8x1xf32> to vector<2x1xf32>
    %396 = vector.shape_cast %395 : vector<2x1xf32> to vector<2x1x1xf32>
    %cst_268 = arith.constant 8.000000e+00 : f32
    %397 = vector.broadcast %cst_268 : f32 to vector<2x1x1xf32>
    %398 = arith.divf %396, %397 : vector<2x1x1xf32>
    %399 = vector.broadcast %398 : vector<2x1x1xf32> to vector<2x8x32xf32>
    %400 = arith.subf %390, %399 : vector<2x8x32xf32>
    %401 = arith.mulf %400, %400 : vector<2x8x32xf32>
    %cst_269 = arith.constant dense<0.000000e+00> : vector<2x8xf32>
    %402 = vector.multi_reduction <add>, %401, %cst_269 [2] : vector<2x8x32xf32> to vector<2x8xf32>
    %403 = vector.shape_cast %402 : vector<2x8xf32> to vector<2x8x1xf32>
    %cst_270 = arith.constant 3.200000e+01 : f32
    %404 = vector.broadcast %cst_270 : f32 to vector<2x8x1xf32>
    %405 = arith.divf %403, %404 : vector<2x8x1xf32>
    %cst_271 = arith.constant dense<0.000000e+00> : vector<2x1xf32>
    %406 = vector.multi_reduction <add>, %405, %cst_271 [1] : vector<2x8x1xf32> to vector<2x1xf32>
    %407 = vector.shape_cast %406 : vector<2x1xf32> to vector<2x1x1xf32>
    %cst_272 = arith.constant 8.000000e+00 : f32
    %408 = vector.broadcast %cst_272 : f32 to vector<2x1x1xf32>
    %409 = arith.divf %407, %408 : vector<2x1x1xf32>
    %410 = vector.broadcast %398 : vector<2x1x1xf32> to vector<2x8x32xf32>
    %411 = arith.subf %390, %410 : vector<2x8x32xf32>
    %cst_273 = arith.constant 9.99999974E-6 : f32
    %412 = vector.broadcast %cst_273 : f32 to vector<2x1x1xf32>
    %413 = arith.addf %409, %412 : vector<2x1x1xf32>
    %414 = math.rsqrt %413 : vector<2x1x1xf32>
    %415 = vector.broadcast %414 : vector<2x1x1xf32> to vector<2x8x32xf32>
    %416 = arith.mulf %411, %415 : vector<2x8x32xf32>
    %417 = vector.broadcast %5 : vector<2x1x1xf32> to vector<2x8x32xf32>
    %418 = arith.mulf %416, %417 : vector<2x8x32xf32>
    %419 = vector.broadcast %4 : vector<2x1x1xf32> to vector<2x8x32xf32>
    %420 = arith.addf %418, %419 : vector<2x8x32xf32>
    %421 = vector.shape_cast %420 : vector<2x8x32xf32> to vector<16x32xf32>
    %cst_274 = arith.constant dense<0.000000e+00> : vector<16x32xf32>
    %422 = tpu.matmul %421, %73, %cst_274 {dimension_numbers = #tpu.dot_dimension_numbers<[1], [0], [0], [1], [0, 0, 1, 1], [], []>} : vector<16x32xf32>, vector<32x32xf32>, vector<16x32xf32> -> vector<16x32xf32>
    %423 = vector.broadcast %72 : vector<1x32xf32> to vector<16x32xf32>
    %424 = arith.addf %422, %423 : vector<16x32xf32>
    %425 = vector.shape_cast %424 : vector<16x32xf32> to vector<2x8x32xf32>
    %cst_275 = arith.constant dense<0.000000e+00> : vector<2x8xf32>
    %426 = vector.multi_reduction <add>, %425, %cst_275 [2] : vector<2x8x32xf32> to vector<2x8xf32>
    %427 = vector.shape_cast %426 : vector<2x8xf32> to vector<2x8x1xf32>
    %cst_276 = arith.constant 3.200000e+01 : f32
    %428 = vector.broadcast %cst_276 : f32 to vector<2x8x1xf32>
    %429 = arith.divf %427, %428 : vector<2x8x1xf32>
    %cst_277 = arith.constant dense<0.000000e+00> : vector<2x1xf32>
    %430 = vector.multi_reduction <add>, %429, %cst_277 [1] : vector<2x8x1xf32> to vector<2x1xf32>
    %431 = vector.shape_cast %430 : vector<2x1xf32> to vector<2x1x1xf32>
    %cst_278 = arith.constant 8.000000e+00 : f32
    %432 = vector.broadcast %cst_278 : f32 to vector<2x1x1xf32>
    %433 = arith.divf %431, %432 : vector<2x1x1xf32>
    %434 = vector.broadcast %433 : vector<2x1x1xf32> to vector<2x8x32xf32>
    %435 = arith.subf %425, %434 : vector<2x8x32xf32>
    %436 = arith.mulf %435, %435 : vector<2x8x32xf32>
    %cst_279 = arith.constant dense<0.000000e+00> : vector<2x8xf32>
    %437 = vector.multi_reduction <add>, %436, %cst_279 [2] : vector<2x8x32xf32> to vector<2x8xf32>
    %438 = vector.shape_cast %437 : vector<2x8xf32> to vector<2x8x1xf32>
    %cst_280 = arith.constant 3.200000e+01 : f32
    %439 = vector.broadcast %cst_280 : f32 to vector<2x8x1xf32>
    %440 = arith.divf %438, %439 : vector<2x8x1xf32>
    %cst_281 = arith.constant dense<0.000000e+00> : vector<2x1xf32>
    %441 = vector.multi_reduction <add>, %440, %cst_281 [1] : vector<2x8x1xf32> to vector<2x1xf32>
    %442 = vector.shape_cast %441 : vector<2x1xf32> to vector<2x1x1xf32>
    %cst_282 = arith.constant 8.000000e+00 : f32
    %443 = vector.broadcast %cst_282 : f32 to vector<2x1x1xf32>
    %444 = arith.divf %442, %443 : vector<2x1x1xf32>
    %445 = vector.broadcast %433 : vector<2x1x1xf32> to vector<2x8x32xf32>
    %446 = arith.subf %425, %445 : vector<2x8x32xf32>
    %cst_283 = arith.constant 9.99999974E-6 : f32
    %447 = vector.broadcast %cst_283 : f32 to vector<2x1x1xf32>
    %448 = arith.addf %444, %447 : vector<2x1x1xf32>
    %449 = math.rsqrt %448 : vector<2x1x1xf32>
    %450 = vector.broadcast %449 : vector<2x1x1xf32> to vector<2x8x32xf32>
    %451 = arith.mulf %446, %450 : vector<2x8x32xf32>
    %452 = vector.broadcast %79 : vector<2x1x1xf32> to vector<2x8x32xf32>
    %453 = arith.mulf %451, %452 : vector<2x8x32xf32>
    %454 = vector.broadcast %78 : vector<2x1x1xf32> to vector<2x8x32xf32>
    %455 = arith.addf %453, %454 : vector<2x8x32xf32>
    %456 = vector.shape_cast %455 : vector<2x8x32xf32> to vector<16x32xf32>
    %cst_284 = arith.constant dense<0.000000e+00> : vector<16x32xf32>
    %457 = tpu.matmul %456, %75, %cst_284 {dimension_numbers = #tpu.dot_dimension_numbers<[1], [0], [0], [1], [0, 0, 1, 1], [], []>} : vector<16x32xf32>, vector<32x32xf32>, vector<16x32xf32> -> vector<16x32xf32>
    %458 = vector.broadcast %74 : vector<1x32xf32> to vector<16x32xf32>
    %459 = arith.addf %457, %458 : vector<16x32xf32>
    %460 = vector.shape_cast %459 : vector<16x32xf32> to vector<2x8x32xf32>
    %cst_285 = arith.constant dense<0.000000e+00> : vector<2x8xf32>
    %461 = vector.multi_reduction <add>, %460, %cst_285 [2] : vector<2x8x32xf32> to vector<2x8xf32>
    %462 = vector.shape_cast %461 : vector<2x8xf32> to vector<2x8x1xf32>
    %cst_286 = arith.constant 3.200000e+01 : f32
    %463 = vector.broadcast %cst_286 : f32 to vector<2x8x1xf32>
    %464 = arith.divf %462, %463 : vector<2x8x1xf32>
    %cst_287 = arith.constant dense<0.000000e+00> : vector<2x1xf32>
    %465 = vector.multi_reduction <add>, %464, %cst_287 [1] : vector<2x8x1xf32> to vector<2x1xf32>
    %466 = vector.shape_cast %465 : vector<2x1xf32> to vector<2x1x1xf32>
    %cst_288 = arith.constant 8.000000e+00 : f32
    %467 = vector.broadcast %cst_288 : f32 to vector<2x1x1xf32>
    %468 = arith.divf %466, %467 : vector<2x1x1xf32>
    %469 = vector.broadcast %468 : vector<2x1x1xf32> to vector<2x8x32xf32>
    %470 = arith.subf %460, %469 : vector<2x8x32xf32>
    %471 = arith.mulf %470, %470 : vector<2x8x32xf32>
    %cst_289 = arith.constant dense<0.000000e+00> : vector<2x8xf32>
    %472 = vector.multi_reduction <add>, %471, %cst_289 [2] : vector<2x8x32xf32> to vector<2x8xf32>
    %473 = vector.shape_cast %472 : vector<2x8xf32> to vector<2x8x1xf32>
    %cst_290 = arith.constant 3.200000e+01 : f32
    %474 = vector.broadcast %cst_290 : f32 to vector<2x8x1xf32>
    %475 = arith.divf %473, %474 : vector<2x8x1xf32>
    %cst_291 = arith.constant dense<0.000000e+00> : vector<2x1xf32>
    %476 = vector.multi_reduction <add>, %475, %cst_291 [1] : vector<2x8x1xf32> to vector<2x1xf32>
    %477 = vector.shape_cast %476 : vector<2x1xf32> to vector<2x1x1xf32>
    %cst_292 = arith.constant 8.000000e+00 : f32
    %478 = vector.broadcast %cst_292 : f32 to vector<2x1x1xf32>
    %479 = arith.divf %477, %478 : vector<2x1x1xf32>
    %480 = vector.broadcast %468 : vector<2x1x1xf32> to vector<2x8x32xf32>
    %481 = arith.subf %460, %480 : vector<2x8x32xf32>
    %cst_293 = arith.constant 9.99999974E-6 : f32
    %482 = vector.broadcast %cst_293 : f32 to vector<2x1x1xf32>
    %483 = arith.addf %479, %482 : vector<2x1x1xf32>
    %484 = math.rsqrt %483 : vector<2x1x1xf32>
    %485 = vector.broadcast %484 : vector<2x1x1xf32> to vector<2x8x32xf32>
    %486 = arith.mulf %481, %485 : vector<2x8x32xf32>
    %487 = vector.broadcast %81 : vector<2x1x1xf32> to vector<2x8x32xf32>
    %488 = arith.mulf %486, %487 : vector<2x8x32xf32>
    %489 = vector.broadcast %80 : vector<2x1x1xf32> to vector<2x8x32xf32>
    %490 = arith.addf %488, %489 : vector<2x8x32xf32>
    %491 = vector.shape_cast %490 : vector<2x8x32xf32> to vector<16x32xf32>
    %cst_294 = arith.constant dense<0.000000e+00> : vector<16x4xf32>
    %492 = tpu.matmul %491, %77, %cst_294 {dimension_numbers = #tpu.dot_dimension_numbers<[1], [0], [0], [1], [0, 0, 1, 1], [], []>} : vector<16x32xf32>, vector<32x4xf32>, vector<16x4xf32> -> vector<16x4xf32>
    %493 = vector.broadcast %76 : vector<1x4xf32> to vector<16x4xf32>
    %494 = arith.addf %492, %493 : vector<16x4xf32>
    %495 = vector.shape_cast %494 : vector<16x4xf32> to vector<2x8x4xf32>
    %496 = vector.extract_strided_slice %420 {offsets = [0, 7, 0], sizes = [2, 1, 32], strides = [1, 1, 1]} : vector<2x8x32xf32> to vector<2x1x32xf32>
    %497 = vector.shape_cast %496 : vector<2x1x32xf32> to vector<2x32xf32>
    %cst_295 = arith.constant dense<0.000000e+00> : vector<2x32xf32>
    %498 = tpu.matmul %497, %7, %cst_295 {dimension_numbers = #tpu.dot_dimension_numbers<[1], [0], [0], [1], [0, 0, 1, 1], [], []>} : vector<2x32xf32>, vector<32x32xf32>, vector<2x32xf32> -> vector<2x32xf32>
    %499 = vector.broadcast %6 : vector<1x32xf32> to vector<2x32xf32>
    %500 = arith.addf %498, %499 : vector<2x32xf32>
    %cst_296 = arith.constant 0.000000e+00 : f32
    %501 = vector.broadcast %cst_296 : f32 to vector<2x32xf32>
    %502 = arith.maximumf %500, %501 : vector<2x32xf32>
    %cst_297 = arith.constant dense<0.000000e+00> : vector<2xf32>
    %503 = vector.multi_reduction <add>, %502, %cst_297 [1] : vector<2x32xf32> to vector<2xf32>
    %504 = vector.shape_cast %503 : vector<2xf32> to vector<2x1xf32>
    %cst_298 = arith.constant 3.200000e+01 : f32
    %505 = vector.broadcast %cst_298 : f32 to vector<2x1xf32>
    %506 = arith.divf %504, %505 : vector<2x1xf32>
    %507 = vector.broadcast %506 : vector<2x1xf32> to vector<2x32xf32>
    %508 = arith.subf %502, %507 : vector<2x32xf32>
    %509 = arith.mulf %508, %508 : vector<2x32xf32>
    %cst_299 = arith.constant dense<0.000000e+00> : vector<2xf32>
    %510 = vector.multi_reduction <add>, %509, %cst_299 [1] : vector<2x32xf32> to vector<2xf32>
    %511 = vector.shape_cast %510 : vector<2xf32> to vector<2x1xf32>
    %cst_300 = arith.constant 3.200000e+01 : f32
    %512 = vector.broadcast %cst_300 : f32 to vector<2x1xf32>
    %513 = arith.divf %511, %512 : vector<2x1xf32>
    %514 = vector.broadcast %506 : vector<2x1xf32> to vector<2x32xf32>
    %515 = arith.subf %502, %514 : vector<2x32xf32>
    %cst_301 = arith.constant 9.99999974E-6 : f32
    %516 = vector.broadcast %cst_301 : f32 to vector<2x1xf32>
    %517 = arith.addf %513, %516 : vector<2x1xf32>
    %518 = math.rsqrt %517 : vector<2x1xf32>
    %519 = vector.broadcast %518 : vector<2x1xf32> to vector<2x32xf32>
    %520 = arith.mulf %515, %519 : vector<2x32xf32>
    %521 = vector.broadcast %13 : vector<2x1xf32> to vector<2x32xf32>
    %522 = arith.mulf %520, %521 : vector<2x32xf32>
    %523 = vector.broadcast %12 : vector<2x1xf32> to vector<2x32xf32>
    %524 = arith.addf %522, %523 : vector<2x32xf32>
    %cst_302 = arith.constant dense<0.000000e+00> : vector<2x32xf32>
    %525 = tpu.matmul %524, %9, %cst_302 {dimension_numbers = #tpu.dot_dimension_numbers<[1], [0], [0], [1], [0, 0, 1, 1], [], []>} : vector<2x32xf32>, vector<32x32xf32>, vector<2x32xf32> -> vector<2x32xf32>
    %526 = vector.broadcast %8 : vector<1x32xf32> to vector<2x32xf32>
    %527 = arith.addf %525, %526 : vector<2x32xf32>
    %cst_303 = arith.constant 0.000000e+00 : f32
    %528 = vector.broadcast %cst_303 : f32 to vector<2x32xf32>
    %529 = arith.maximumf %527, %528 : vector<2x32xf32>
    %cst_304 = arith.constant dense<0.000000e+00> : vector<2xf32>
    %530 = vector.multi_reduction <add>, %529, %cst_304 [1] : vector<2x32xf32> to vector<2xf32>
    %531 = vector.shape_cast %530 : vector<2xf32> to vector<2x1xf32>
    %cst_305 = arith.constant 3.200000e+01 : f32
    %532 = vector.broadcast %cst_305 : f32 to vector<2x1xf32>
    %533 = arith.divf %531, %532 : vector<2x1xf32>
    %534 = vector.broadcast %533 : vector<2x1xf32> to vector<2x32xf32>
    %535 = arith.subf %529, %534 : vector<2x32xf32>
    %536 = arith.mulf %535, %535 : vector<2x32xf32>
    %cst_306 = arith.constant dense<0.000000e+00> : vector<2xf32>
    %537 = vector.multi_reduction <add>, %536, %cst_306 [1] : vector<2x32xf32> to vector<2xf32>
    %538 = vector.shape_cast %537 : vector<2xf32> to vector<2x1xf32>
    %cst_307 = arith.constant 3.200000e+01 : f32
    %539 = vector.broadcast %cst_307 : f32 to vector<2x1xf32>
    %540 = arith.divf %538, %539 : vector<2x1xf32>
    %541 = vector.broadcast %533 : vector<2x1xf32> to vector<2x32xf32>
    %542 = arith.subf %529, %541 : vector<2x32xf32>
    %cst_308 = arith.constant 9.99999974E-6 : f32
    %543 = vector.broadcast %cst_308 : f32 to vector<2x1xf32>
    %544 = arith.addf %540, %543 : vector<2x1xf32>
    %545 = math.rsqrt %544 : vector<2x1xf32>
    %546 = vector.broadcast %545 : vector<2x1xf32> to vector<2x32xf32>
    %547 = arith.mulf %542, %546 : vector<2x32xf32>
    %548 = vector.broadcast %15 : vector<2x1xf32> to vector<2x32xf32>
    %549 = arith.mulf %547, %548 : vector<2x32xf32>
    %550 = vector.broadcast %14 : vector<2x1xf32> to vector<2x32xf32>
    %551 = arith.addf %549, %550 : vector<2x32xf32>
    %cst_309 = arith.constant dense<0.000000e+00> : vector<2x3xf32>
    %552 = tpu.matmul %551, %11, %cst_309 {dimension_numbers = #tpu.dot_dimension_numbers<[1], [0], [0], [1], [0, 0, 1, 1], [], []>} : vector<2x32xf32>, vector<32x3xf32>, vector<2x3xf32> -> vector<2x3xf32>
    %553 = vector.broadcast %10 : vector<1x3xf32> to vector<2x3xf32>
    %554 = arith.addf %552, %553 : vector<2x3xf32>
    %cst_310 = arith.constant dense<0.000000e+00> : vector<2x32xf32>
    %555 = tpu.matmul %497, %63, %cst_310 {dimension_numbers = #tpu.dot_dimension_numbers<[1], [0], [0], [1], [0, 0, 1, 1], [], []>} : vector<2x32xf32>, vector<32x32xf32>, vector<2x32xf32> -> vector<2x32xf32>
    %556 = vector.broadcast %62 : vector<1x32xf32> to vector<2x32xf32>
    %557 = arith.addf %555, %556 : vector<2x32xf32>
    %cst_311 = arith.constant 0.000000e+00 : f32
    %558 = vector.broadcast %cst_311 : f32 to vector<2x32xf32>
    %559 = arith.maximumf %557, %558 : vector<2x32xf32>
    %cst_312 = arith.constant dense<0.000000e+00> : vector<2xf32>
    %560 = vector.multi_reduction <add>, %559, %cst_312 [1] : vector<2x32xf32> to vector<2xf32>
    %561 = vector.shape_cast %560 : vector<2xf32> to vector<2x1xf32>
    %cst_313 = arith.constant 3.200000e+01 : f32
    %562 = vector.broadcast %cst_313 : f32 to vector<2x1xf32>
    %563 = arith.divf %561, %562 : vector<2x1xf32>
    %564 = vector.broadcast %563 : vector<2x1xf32> to vector<2x32xf32>
    %565 = arith.subf %559, %564 : vector<2x32xf32>
    %566 = arith.mulf %565, %565 : vector<2x32xf32>
    %cst_314 = arith.constant dense<0.000000e+00> : vector<2xf32>
    %567 = vector.multi_reduction <add>, %566, %cst_314 [1] : vector<2x32xf32> to vector<2xf32>
    %568 = vector.shape_cast %567 : vector<2xf32> to vector<2x1xf32>
    %cst_315 = arith.constant 3.200000e+01 : f32
    %569 = vector.broadcast %cst_315 : f32 to vector<2x1xf32>
    %570 = arith.divf %568, %569 : vector<2x1xf32>
    %571 = vector.broadcast %563 : vector<2x1xf32> to vector<2x32xf32>
    %572 = arith.subf %559, %571 : vector<2x32xf32>
    %cst_316 = arith.constant 9.99999974E-6 : f32
    %573 = vector.broadcast %cst_316 : f32 to vector<2x1xf32>
    %574 = arith.addf %570, %573 : vector<2x1xf32>
    %575 = math.rsqrt %574 : vector<2x1xf32>
    %576 = vector.broadcast %575 : vector<2x1xf32> to vector<2x32xf32>
    %577 = arith.mulf %572, %576 : vector<2x32xf32>
    %578 = vector.broadcast %69 : vector<2x1xf32> to vector<2x32xf32>
    %579 = arith.mulf %577, %578 : vector<2x32xf32>
    %580 = vector.broadcast %68 : vector<2x1xf32> to vector<2x32xf32>
    %581 = arith.addf %579, %580 : vector<2x32xf32>
    %cst_317 = arith.constant dense<0.000000e+00> : vector<2x32xf32>
    %582 = tpu.matmul %581, %65, %cst_317 {dimension_numbers = #tpu.dot_dimension_numbers<[1], [0], [0], [1], [0, 0, 1, 1], [], []>} : vector<2x32xf32>, vector<32x32xf32>, vector<2x32xf32> -> vector<2x32xf32>
    %583 = vector.broadcast %64 : vector<1x32xf32> to vector<2x32xf32>
    %584 = arith.addf %582, %583 : vector<2x32xf32>
    %cst_318 = arith.constant 0.000000e+00 : f32
    %585 = vector.broadcast %cst_318 : f32 to vector<2x32xf32>
    %586 = arith.maximumf %584, %585 : vector<2x32xf32>
    %cst_319 = arith.constant dense<0.000000e+00> : vector<2xf32>
    %587 = vector.multi_reduction <add>, %586, %cst_319 [1] : vector<2x32xf32> to vector<2xf32>
    %588 = vector.shape_cast %587 : vector<2xf32> to vector<2x1xf32>
    %cst_320 = arith.constant 3.200000e+01 : f32
    %589 = vector.broadcast %cst_320 : f32 to vector<2x1xf32>
    %590 = arith.divf %588, %589 : vector<2x1xf32>
    %591 = vector.broadcast %590 : vector<2x1xf32> to vector<2x32xf32>
    %592 = arith.subf %586, %591 : vector<2x32xf32>
    %593 = arith.mulf %592, %592 : vector<2x32xf32>
    %cst_321 = arith.constant dense<0.000000e+00> : vector<2xf32>
    %594 = vector.multi_reduction <add>, %593, %cst_321 [1] : vector<2x32xf32> to vector<2xf32>
    %595 = vector.shape_cast %594 : vector<2xf32> to vector<2x1xf32>
    %cst_322 = arith.constant 3.200000e+01 : f32
    %596 = vector.broadcast %cst_322 : f32 to vector<2x1xf32>
    %597 = arith.divf %595, %596 : vector<2x1xf32>
    %598 = vector.broadcast %590 : vector<2x1xf32> to vector<2x32xf32>
    %599 = arith.subf %586, %598 : vector<2x32xf32>
    %cst_323 = arith.constant 9.99999974E-6 : f32
    %600 = vector.broadcast %cst_323 : f32 to vector<2x1xf32>
    %601 = arith.addf %597, %600 : vector<2x1xf32>
    %602 = math.rsqrt %601 : vector<2x1xf32>
    %603 = vector.broadcast %602 : vector<2x1xf32> to vector<2x32xf32>
    %604 = arith.mulf %599, %603 : vector<2x32xf32>
    %605 = vector.broadcast %71 : vector<2x1xf32> to vector<2x32xf32>
    %606 = arith.mulf %604, %605 : vector<2x32xf32>
    %607 = vector.broadcast %70 : vector<2x1xf32> to vector<2x32xf32>
    %608 = arith.addf %606, %607 : vector<2x32xf32>
    %cst_324 = arith.constant dense<0.000000e+00> : vector<2x1xf32>
    %609 = tpu.matmul %608, %67, %cst_324 {dimension_numbers = #tpu.dot_dimension_numbers<[1], [0], [0], [1], [0, 0, 1, 1], [], []>} : vector<2x32xf32>, vector<32x1xf32>, vector<2x1xf32> -> vector<2x1xf32>
    %610 = vector.broadcast %66 : vector<1x1xf32> to vector<2x1xf32>
    %611 = arith.addf %609, %610 : vector<2x1xf32>
    %c0_325 = arith.constant 0 : index
    %c0_326 = arith.constant 0 : index
    %c0_327 = arith.constant 0 : index
    %612 = vector.load %arg86[%c0_325, %c0_326, %c0_327] : memref<2x8x4xf32, #tpu.memory_space<vmem>>, vector<2x8x4xf32>
    tpu.vector_store %arg86[%c0_325, %c0_326, %c0_327], %495 {strides = array<i32>} : memref<2x8x4xf32, #tpu.memory_space<vmem>>, vector<2x8x4xf32>,
    %c0_328 = arith.constant 0 : index
    %c0_329 = arith.constant 0 : index
    %613 = vector.load %arg87[%c0_328, %c0_329] : memref<2x3xf32, #tpu.memory_space<vmem>>, vector<2x3xf32>
    tpu.vector_store %arg87[%c0_328, %c0_329], %554 {strides = array<i32>} : memref<2x3xf32, #tpu.memory_space<vmem>>, vector<2x3xf32>,
    %c0_330 = arith.constant 0 : index
    %c0_331 = arith.constant 0 : index
    %614 = vector.load %arg88[%c0_330, %c0_331] : memref<2x1xf32, #tpu.memory_space<vmem>>, vector<2x1xf32>
    tpu.vector_store %arg88[%c0_330, %c0_331], %611 {strides = array<i32>} : memref<2x1xf32, #tpu.memory_space<vmem>>, vector<2x1xf32>,
    %c0_332 = arith.constant 0 : index
    %c0_333 = arith.constant 0 : index
    %c0_334 = arith.constant 0 : index
    %615 = vector.load %arg89[%c0_332, %c0_333, %c0_334] : memref<2x8x8xf32, #tpu.memory_space<vmem>>, vector<2x8x8xf32>
    tpu.vector_store %arg89[%c0_332, %c0_333, %c0_334], %389 {strides = array<i32>} : memref<2x8x8xf32, #tpu.memory_space<vmem>>, vector<2x8x8xf32>,
    return
  }
}

</mosaic_0001>

<bundles_post_ra>
// kernel: forward_all.1
= control target key start
LH: loop header
LB: loop body
LE: loop exit
PB: predicated region body
PF: predicated region fallthrough
CT: control target
= control target key end

     0   :  { %s4022_s6 = smov 1   ;;  %s4023_s10 = smov 2   ;;  %s5132_s0 = inlined_call_operand.smem [shape: u32[90], index: -1, kind: input, shape index: {}] }
   0x1   :  { %s4144_s5 = sld [smem:[%s5132_s0]]   ;;  %s4024_s14 = smov 3  }
   0x2   :  { %s4149_s9 = sld [smem:[%s5132_s0 + %s4022_s6]]   ;;  %s4025_s18 = smov 4  }
   0x3   :  { %s4154_s13 = sld [smem:[%s5132_s0 + %s4023_s10]]   ;;  %s4026_s22 = smov 5  }
   0x4   :  { %s4159_s17 = sld [smem:[%s5132_s0 + %s4024_s14]]   ;;  %s4027_s26 = smov 6  }
   0x5   :  { %s4164_s21 = sld [smem:[%s5132_s0 + %s4025_s18]]   ;;  %s4028_s30 = smov 7  }
   0x6   :  { %s4169_s25 = sld [smem:[%s5132_s0 + %s4026_s22]]   ;;  %s4029_s4 = smov 8  }
   0x7   :  { %5177 = sst [smem:[#allocation47_spill]] %s4144_s5  ;;  %s4030_s10 = smov 9  }
   0x8   :  { %5178 = sst [smem:[#allocation48_spill]] %s4149_s9  ;;  %s4031_s15 = smov 10  }
   0x9   :  { %5179 = sst [smem:[#allocation49_spill]] %s4154_s13  ;;  %s4032_s20 = smov 11  }
   0xa   :  { %5180 = sst [smem:[#allocation50_spill]] %s4159_s17  ;;  %s4034_s1 = smov 13  }
   0xb   :  { %5181 = sst [smem:[#allocation51_spill]] %s4164_s21  ;;  %s4035_s7 = smov 14  }
   0xc   :  { %5182 = sst [smem:[#allocation52_spill]] %s4169_s25  ;;  %s4037_s22 = smov 16  }
   0xd   :  { %s4174_s29 = sld [smem:[%s5132_s0 + %s4027_s26]]   ;;  %s4033_s26 = smov 12  }
   0xe   :  { %s4179_s3 = sld [smem:[%s5132_s0 + %s4028_s30]]   ;;  %s4038_s28 = smov 17  }
   0xf   :  { %s4184_s8 = sld [smem:[%s5132_s0 + %s4029_s4]]   ;;  %s4092_s16 = smov 71  }
  0x10   :  { %s4189_s14 = sld [smem:[%s5132_s0 + %s4030_s10]]   ;;  %s4091_s10 = smov 70  }
  0x11   :  { %s4194_s19 = sld [smem:[%s5132_s0 + %s4031_s15]]   ;;  %s4036_s15 = smov 15  }
  0x12   :  { %s4199_s24 = sld [smem:[%s5132_s0 + %s4032_s20]]   ;;  %s4093_s23 = smov 72  }
  0x13   :  { %5183 = sst [smem:[#allocation53_spill]] %s4174_s29 }
  0x14   :  { %5184 = sst [smem:[#allocation54_spill]] %s4179_s3 }
  0x15   :  { %5185 = sst [smem:[#allocation55_spill]] %s4184_s8 }
  0x16   :  { %5186 = sst [smem:[#allocation56_spill]] %s4189_s14 }
  0x17   :  { %5187 = sst [smem:[#allocation57_spill]] %s4194_s19 }
  0x18   :  { %5188 = sst [smem:[#allocation58_spill]] %s4199_s24 }
  0x19   :  { %s4204_s30 = sld [smem:[%s5132_s0 + %s4033_s26]]  }
  0x1a   :  { %s4209_s6 = sld [smem:[%s5132_s0 + %s4034_s1]]   ;;  %s4090_s1 = smov 69  }
  0x1b   :  { %s4214_s12 = sld [smem:[%s5132_s0 + %s4035_s7]]   ;;  %s4039_s7 = smov 18  }
  0x1c   :  { %s4219_s20 = sld [smem:[%s5132_s0 + %s4036_s15]]   ;;  %s4040_s15 = smov 19  }
  0x1d   :  { %s4224_s27 = sld [smem:[%s5132_s0 + %s4037_s22]]   ;;  %s4041_s22 = smov 20  }
  0x1e   :  { %s4229_s4 = sld [smem:[%s5132_s0 + %s4038_s28]]   ;;  %s4042_s28 = smov 21  }
  0x1f   :  { %5189 = sst [smem:[#allocation59_spill]] %s4204_s30 }
  0x20   :  { %5190 = sst [smem:[#allocation60_spill]] %s4209_s6 }
  0x21   :  { %5191 = sst [smem:[#allocation61_spill]] %s4214_s12 }
  0x22   :  { %5192 = sst [smem:[#allocation62_spill]] %s4219_s20 }
  0x23   :  { %5193 = sst [smem:[#allocation63_spill]] %s4224_s27 }
  0x24   :  { %5194 = sst [smem:[#allocation64_spill]] %s4229_s4 }
  0x25   :  { %s4234_s30 = sld [smem:[%s5132_s0 + %s4039_s7]]   ;;  %s4043_s7 = smov 22  }
  0x26   :  { %s4239_s6 = sld [smem:[%s5132_s0 + %s4040_s15]]   ;;  %s4044_s15 = smov 23  }
  0x27   :  { %s4244_s27 = sld [smem:[%s5132_s0 + %s4041_s22]]   ;;  %s4045_s22 = smov 24  }
  0x28   :  { %s4249_s4 = sld [smem:[%s5132_s0 + %s4042_s28]]   ;;  %s4046_s28 = smov 25  }
  0x29   :  { %s4254_s19 = sld [smem:[%s5132_s0 + %s4043_s7]]   ;;  %s4047_s7 = smov 26  }
  0x2a   :  { %s4259_s24 = sld [smem:[%s5132_s0 + %s4044_s15]]   ;;  %s4048_s15 = smov 27  }
  0x2b   :  { %5195 = sst [smem:[#allocation65_spill]] %s4234_s30 }
  0x2c   :  { %5196 = sst [smem:[#allocation66_spill]] %s4239_s6 }
  0x2d   :  { %5197 = sst [smem:[#allocation67_spill]] %s4244_s27 }
  0x2e   :  { %5198 = sst [smem:[#allocation68_spill]] %s4249_s4 }
  0x2f   :  { %5199 = sst [smem:[#allocation69_spill]] %s4254_s19 }
  0x30   :  { %5200 = sst [smem:[#allocation70_spill]] %s4259_s24 }
  0x31   :  { %s4264_s20 = sld [smem:[%s5132_s0 + %s4045_s22]]   ;;  %s4049_s22 = smov 28  }
  0x32   :  { %s4269_s12 = sld [smem:[%s5132_s0 + %s4046_s28]]   ;;  %s4050_s28 = smov 29  }
  0x33   :  { %s4274_s8 = sld [smem:[%s5132_s0 + %s4047_s7]]   ;;  %s4051_s7 = smov 30  }
  0x34   :  { %s4279_s14 = sld [smem:[%s5132_s0 + %s4048_s15]]   ;;  %s4052_s15 = smov 31  }
  0x35   :  { %s4284_s29 = sld [smem:[%s5132_s0 + %s4049_s22]]   ;;  %s4053_s22 = smov 32  }
  0x36   :  { %s4289_s3 = sld [smem:[%s5132_s0 + %s4050_s28]]   ;;  %s4054_s28 = smov 33  }
  0x37   :  { %5201 = sst [smem:[#allocation71_spill]] %s4264_s20 }
  0x38   :  { %5202 = sst [smem:[#allocation72_spill]] %s4269_s12 }
  0x39   :  { %5203 = sst [smem:[#allocation73_spill]] %s4274_s8 }
  0x3a   :  { %5204 = sst [smem:[#allocation74_spill]] %s4279_s14 }
  0x3b   :  { %5205 = sst [smem:[#allocation75_spill]] %s4284_s29 }
  0x3c   :  { %5206 = sst [smem:[#allocation76_spill]] %s4289_s3 }
  0x3d   :  { %s4294_s8 = sld [smem:[%s5132_s0 + %s4051_s7]]   ;;  %s4055_s7 = smov 34  }
  0x3e   :  { %s4299_s20 = sld [smem:[%s5132_s0 + %s4052_s15]]   ;;  %s4056_s15 = smov 35  }
  0x3f   :  { %s4304_s29 = sld [smem:[%s5132_s0 + %s4053_s22]]   ;;  %s4057_s22 = smov 36  }
  0x40   :  { %s4309_s3 = sld [smem:[%s5132_s0 + %s4054_s28]]   ;;  %s4058_s28 = smov 37  }
  0x41   :  { %s4324_s14 = sld [smem:[%s5132_s0 + %s4057_s22]]   ;;  %s4061_s22 = smov 40  }
  0x42   :  { %s4329_s12 = sld [smem:[%s5132_s0 + %s4058_s28]]   ;;  %s4062_s28 = smov 41  }
  0x43   :  { %5207 = sst [smem:[#allocation77_spill]] %s4294_s8 }
  0x44   :  { %5208 = sst [smem:[#allocation78_spill]] %s4299_s20 }
  0x45   :  { %5209 = sst [smem:[#allocation79_spill]] %s4304_s29 }
  0x46   :  { %5210 = sst [smem:[#allocation80_spill]] %s4309_s3 }
  0x47   :  { %s4314_s8 = sld [smem:[%s5132_s0 + %s4055_s7]]   ;;  %s4059_s7 = smov 38  }
  0x48   :  { %s4319_s20 = sld [smem:[%s5132_s0 + %s4056_s15]]   ;;  %s4060_s15 = smov 39  }
  0x49   :  { %5213 = sst [smem:[#allocation83_spill]] %s4324_s14 }
  0x4a   :  { %5214 = sst [smem:[#allocation84_spill]] %s4329_s12 }
  0x4b   :  { %s4334_s29 = sld [smem:[%s5132_s0 + %s4059_s7]]   ;;  %s4063_s7 = smov 42  }
  0x4c   :  { %s4339_s24 = sld [smem:[%s5132_s0 + %s4060_s15]]   ;;  %s4064_s15 = smov 43  }
  0x4d   :  { %5211 = sst [smem:[#allocation81_spill]] %s4314_s8 }
  0x4e   :  { %5212 = sst [smem:[#allocation82_spill]] %s4319_s20 }
  0x4f   :  { %s4344_s14 = sld [smem:[%s5132_s0 + %s4061_s22]]   ;;  %s4065_s22 = smov 44  }
  0x50   :  { %s4349_s20 = sld [smem:[%s5132_s0 + %s4062_s28]]   ;;  %s4066_s28 = smov 45  }
  0x51   :  { %5215 = sst [smem:[#allocation85_spill]] %s4334_s29 }
  0x52   :  { %5216 = sst [smem:[#allocation86_spill]] %s4339_s24 }
  0x53   :  { %s4354_s4 = sld [smem:[%s5132_s0 + %s4063_s7]]   ;;  %s4067_s7 = smov 46  }
  0x54   :  { %s4359_s6 = sld [smem:[%s5132_s0 + %s4064_s15]]   ;;  %s4068_s15 = smov 47  }
  0x55   :  { %5217 = sst [smem:[#allocation87_spill]] %s4344_s14 }
  0x56   :  { %5218 = sst [smem:[#allocation88_spill]] %s4349_s20 }
  0x57   :  { %s4364_s14 = sld [smem:[%s5132_s0 + %s4065_s22]]   ;;  %s4069_s22 = smov 48  }
  0x58   :  { %s4369_s20 = sld [smem:[%s5132_s0 + %s4066_s28]]   ;;  %s4070_s28 = smov 49  }
  0x59   :  { %s4374_s8 = sld [smem:[%s5132_s0 + %s4067_s7]]   ;;  %s4071_s7 = smov 50  }
  0x5a   :  { %s4379_s29 = sld [smem:[%s5132_s0 + %s4068_s15]]   ;;  %s4072_s15 = smov 51  }
  0x5b   :  { %s4384_s27 = sld [smem:[%s5132_s0 + %s4069_s22]]   ;;  %s4073_s22 = smov 52  }
  0x5c   :  { %s4389_s19 = sld [smem:[%s5132_s0 + %s4070_s28]]   ;;  %s4074_s28 = smov 53  }
  0x5d   :  { %s4394_s30 = sld [smem:[%s5132_s0 + %s4071_s7]]   ;;  %s4075_s7 = smov 54  }
  0x5e   :  { %s4399_s24 = sld [smem:[%s5132_s0 + %s4072_s15]]   ;;  %s4076_s15 = smov 55  }
  0x5f   :  { %s4409_s3 = sld [smem:[%s5132_s0 + %s4074_s28]]   ;;  %s4078_s28 = smov 57  }
  0x60   :  { %s4419_s12 = sld [smem:[%s5132_s0 + %s4076_s15]]   ;;  %s4080_s15 = smov 59  }
  0x61   :  { %5219 = sst [smem:[#allocation89_spill]] %s4384_s27 }
  0x62   :  { %s4404_s27 = sld [smem:[%s5132_s0 + %s4073_s22]]   ;;  %s4077_s22 = smov 56  }
  0x63   :  { %5220 = sst [smem:[#allocation90_spill]] %s4394_s30 }
  0x64   :  { %s4414_s30 = sld [smem:[%s5132_s0 + %s4075_s7]]   ;;  %s4079_s7 = smov 58  }
  0x65   :  { %s4424_s21 = sld [smem:[%s5132_s0 + %s4077_s22]]   ;;  %s4081_s22 = smov 60  }
  0x66   :  { %s4429_s25 = sld [smem:[%s5132_s0 + %s4078_s28]]   ;;  %s4082_s28 = smov 61  }
  0x67   :  { %s4434_s9 = sld [smem:[%s5132_s0 + %s4079_s7]]   ;;  %s4083_s7 = smov 62  }
  0x68   :  { %s4439_s13 = sld [smem:[%s5132_s0 + %s4080_s15]]   ;;  %s4084_s15 = smov 63  }
  0x69   :  { %s4492_s5 = sld [smem:[%s5132_s0 + %s4091_s10]]   ;;  %s4095_s10 = smov 74  }
  0x6b   :  { %5221 = sst [smem:[#allocation91_spill]] %s4424_s21 }
  0x6c   :  { %5222 = sst [smem:[#allocation92_spill]] %s4429_s25 }
  0x6d   :  { %5223 = sst [smem:[#allocation93_spill]] %s4434_s9 }
  0x6e   :  { %5224 = sst [smem:[#allocation94_spill]] %s4439_s13 }
  0x6f   :  { %s4444_s21 = sld [smem:[%s5132_s0 + %s4081_s22]]   ;;  %s4085_s22 = smov 64  }
  0x70   :  { %s4449_s25 = sld [smem:[%s5132_s0 + %s4082_s28]]   ;;  %s4086_s28 = smov 65  }
  0x71   :  { %s4454_s9 = sld [smem:[%s5132_s0 + %s4083_s7]]   ;;  %s4087_s7 = smov 66  }
  0x72   :  { %s4459_s13 = sld [smem:[%s5132_s0 + %s4084_s15]]   ;;  %s4088_s15 = smov 67  }
  0x73   :  { %5233 = sst [smem:[#allocation103_spill]] %s4492_s5 }
  0x74   :  { %s4512_s5 = sld [smem:[%s5132_s0 + %s4095_s10]]  }
  0x75   :  { %5225 = sst [smem:[#allocation95_spill]] %s4444_s21 }
  0x76   :  { %5226 = sst [smem:[#allocation96_spill]] %s4449_s25 }
  0x77   :  { %5227 = sst [smem:[#allocation97_spill]] %s4454_s9 }
  0x78   :  { %5228 = sst [smem:[#allocation98_spill]] %s4459_s13 }
  0x79   :  { %s4464_s21 = sld [smem:[%s5132_s0 + %s4085_s22]]   ;;  %s4089_s22 = smov 68  }
  0x7a   :  { %s4469_s25 = sld [smem:[%s5132_s0 + %s4086_s28]]   ;;  %s4098_s28 = smov 77  }
  0x7b   :  { %s4474_s9 = sld [smem:[%s5132_s0 + %s4087_s7]]  }
  0x7c   :  { %s4479_s13 = sld [smem:[%s5132_s0 + %s4088_s15]]  }
  0x7d   :  { %s3164_s17 = sld [smem:[%s5132_s0 + %s4089_s22]]  }
  0x7e   :  { %5237 = sst [smem:[#allocation107_spill]] %s4512_s5 }
  0x7f   :  { %5229 = sst [smem:[#allocation99_spill]] %s4464_s21 }
  0x80   :  { %5230 = sst [smem:[#allocation100_spill]] %s4469_s25 }
  0x81   :  { %s4487_s25 = sld [smem:[%s5132_s0 + %s4090_s1]]   ;;  %s4094_s1 = smov 73  }
  0x82   :  { %5231 = sst [smem:[#allocation101_spill]] %s4479_s13 }
  0x83   :  { %s4497_s13 = sld [smem:[%s5132_s0 + %s4092_s16]]   ;;  %v185_v0 = vstv %s3164_s17  ;;  %s4096_s16 = smov 75  }
  0x84   :  { %s4502_s21 = sld [smem:[%s5132_s0 + %s4093_s23]]   ;;  %186 = vst [vmem:[#allocation2] sm:$0x1] %v185_v0  ;;  %s4097_s23 = smov 76  }
  0x85   :  { %s4517_s22 = sld [smem:[%s5132_s0 + %s4096_s16]]   ;;  %s4099_s17 = smov 78  }
  0x86   :  { %s4527_s10 = sld [smem:[%s5132_s0 + %s4098_s28]]   ;;  %s4100_s16 = smov 79  }
  0x87   :  { %5232 = sst [smem:[#allocation102_spill]] %s4487_s25 }
  0x88   :  { %s4507_s25 = sld [smem:[%s5132_s0 + %s4094_s1]]  }
  0x89   :  { %5234 = sst [smem:[#allocation104_spill]] %s4497_s13  ;;  %s4104_s13 = smov 83  }
  0x8a   :  { %5235 = sst [smem:[#allocation105_spill]] %s4502_s21  ;;  %s4101_s21 = smov 80  }
  0x8b   :  { %5238 = sst [smem:[#allocation108_spill]] %s4517_s22 }
  0x8c   :  { %s4522_s1 = sld [smem:[%s5132_s0 + %s4097_s23]]  }
  0x8d   :  { %5239 = sst [smem:[#allocation109_spill]] %s4527_s10 }
  0x8e   :  { %5236 = sst [smem:[#allocation106_spill]] %s4507_s25  ;;  %s4102_s25 = smov 81  }
  0x8f   :  { %s4532_s15 = sld [smem:[%s5132_s0 + %s4099_s17]]   ;;  %s4103_s17 = smov 82  }
  0x90   :  { %s4537_s22 = sld [smem:[%s5132_s0 + %s4100_s16]]  }
  0x91   :  { %s4542_s5 = sld [smem:[%s5132_s0 + %s4101_s21]]   ;;  %s4105_s21 = smov 84  }
  0x92   :  { %s4547_s10 = sld [smem:[%s5132_s0 + %s4102_s25]]   ;;  %s4106_s25 = smov 85  }
  0x95   :  { %5240 = sst [smem:[#allocation110_spill]] %s4532_s15 }
  0x96   :  { %5241 = sst [smem:[#allocation111_spill]] %s4537_s22 }
  0x97   :  { %5242 = sst [smem:[#allocation112_spill]] %s4542_s5 }
  0x98   :  { %5243 = sst [smem:[#allocation113_spill]] %s4547_s10 }
  0x99   :  { %s4552_s15 = sld [smem:[%s5132_s0 + %s4103_s17]]   ;;  %s4107_s17 = smov 86  }
  0x9a   :  { %s4557_s22 = sld [smem:[%s5132_s0 + %s4104_s13]]   ;;  %s4108_s13 = smov 87  }
  0x9b   :  { %s4562_s5 = sld [smem:[%s5132_s0 + %s4105_s21]]   ;;  %s4109_s21 = smov 88  }
  0x9c   :  { %s4567_s10 = sld [smem:[%s5132_s0 + %s4106_s25]]   ;;  %s4110_s25 = smov 89  }
  0x9f   :  { %5244 = sst [smem:[#allocation114_spill]] %s4552_s15 }
  0xa0   :  { %5245 = sst [smem:[#allocation115_spill]] %s4557_s22 }
  0xa1   :  { %5246 = sst [smem:[#allocation116_spill]] %s4562_s5 }
  0xa2   :  { %5247 = sst [smem:[#allocation117_spill]] %s4567_s10 }
  0xa3   :  { %s4572_s15 = sld [smem:[%s5132_s0 + %s4107_s17]]  }
  0xa4   :  { %s4577_s22 = sld [smem:[%s5132_s0 + %s4108_s13]]  }
  0xa5   :  { %s4582_s5 = sld [smem:[%s5132_s0 + %s4109_s21]]  }
  0xa6   :  { %s4587_s10 = sld [smem:[%s5132_s0 + %s4110_s25]]  }
  0xa7   :  { %187 = vsyncpa [#allocation4], 0 }
  0xa8   :  { %188 = vsyncpa [#allocation7], 0 }
  0xa9   :  { %189 = vsyncpa [#allocation10], 0 }
  0xaa   :  { %190 = vsyncpa [#allocation13], 0 }
  0xab   :  { %191 = vsyncpa [#allocation16], 0 }
  0xac   :  { %192 = vsyncpa [#allocation19], 0 }
  0xad   :  { %193 = vsyncpa [#allocation22], 0 }
  0xae   :  { %194 = vsyncpa [#allocation25], 0 }
  0xaf   :  { %195 = vsyncpa [#allocation28], 0 }
  0xb0   :  { %196 = vsyncpa [#allocation31], 0 }
  0xb1   :  { %197 = vsyncpa [#allocation5], 0  ;;  %s299_s17 = sshll.u32 %s4359_s6, 4  ;;  %s300_s17 = int_to_ptr.hbm [resolvable:$true] %s299_s17 }
  0xb2   :  { %198 = vsyncpa [#allocation34], 0  ;;  %s4111_s0 = smov [#allocation6]   ;;  %s321_s11 = sshll.u32 %s4369_s20, 4  ;;  %s322_s11 = int_to_ptr.hbm [resolvable:$true] %s321_s11 }
  0xb3   :  { %s301_s7 = sshll.u32 %s4111_s0, 4  ;;  %s3518_s13 = sshra.s32 %s300_s17, 4  ;;  %s302_s7 = int_to_ptr.vmem [resolvable:$true] %s301_s7  ;;  %s3519_s13 = int_to_ptr.hbm [resolvable:$true] %s3518_s13 }
  0xb4   :  { %s3520_s16 = scalar_lea.hbm %s3519_s13, 1  ;;  %s3522_s18 = scalar_lea.hbm %s4359_s6, 1 }
  0xb5   :  { %p3521_p0 = scmp.ne.s32.totalorder %s3519_s13, %s3520_s16  ;;  %p3523_p1 = scmp.lt.s32.totalorder %s3519_s13, %s4359_s6 }
  0xb6   :  { %p3524_p2 = scmp.lt.s32.totalorder %s3522_s18, %s3520_s16 }
  0xb8   :  { %p3525_p3 = por %p3524_p2, %p3523_p1 }
  0xba   :  { %p3526_p4 = pnand %p3525_p3, %p3521_p0 }
  0xbc   :  { %3529 = shalt.err (!%p3526_p4)
}
  0xbd   :  { %304 = dma.hbm_to_vmem [thread:$0]  %s300_s17, 16, %s302_s7, [#allocation7]  }
  0xbe   :  { %s4112_s21 = smov [#allocation9]   ;;  %s343_s26 = sshll.u32 %s4379_s29, 4  ;;  %s344_s26 = int_to_ptr.hbm [resolvable:$true] %s343_s26 }
  0xbf   :  { %s323_s23 = sshll.u32 %s4112_s21, 4  ;;  %s3542_s25 = sshra.s32 %s322_s11, 4  ;;  %s324_s23 = int_to_ptr.vmem [resolvable:$true] %s323_s23  ;;  %s3543_s25 = int_to_ptr.hbm [resolvable:$true] %s3542_s25 }
  0xc0   :  { %s3544_s28 = scalar_lea.hbm %s3543_s25, 1  ;;  %s3546_s2 = scalar_lea.hbm %s4369_s20, 1 }
  0xc1   :  { %p3545_p5 = scmp.ne.s32.totalorder %s3543_s25, %s3544_s28  ;;  %p3547_p6 = scmp.lt.s32.totalorder %s3543_s25, %s4369_s20 }
  0xc2   :  { %p3548_p7 = scmp.lt.s32.totalorder %s3546_s2, %s3544_s28 }
  0xc4   :  { %p3549_p8 = por %p3548_p7, %p3547_p6 }
  0xc6   :  { %p3550_p9 = pnand %p3549_p8, %p3545_p5 }
  0xc8   :  { %3553 = shalt.err (!%p3550_p9)
}
  0xc9   :  { %326 = dma.hbm_to_vmem [thread:$0]  %s322_s11, 16, %s324_s23, [#allocation10]  }
  0xca   :  { %s369_s6 = sshll.u32 %s4399_s24, 4  ;;  %s4113_s17 = smov [#allocation12]   ;;  %s370_s6 = int_to_ptr.hbm [resolvable:$true] %s369_s6 }
  0xcb   :  { %s345_s0 = sshll.u32 %s4113_s17, 4  ;;  %s3566_s7 = sshra.s32 %s344_s26, 4  ;;  %s346_s0 = int_to_ptr.vmem [resolvable:$true] %s345_s0  ;;  %s3567_s7 = int_to_ptr.hbm [resolvable:$true] %s3566_s7 }
  0xcc   :  { %s3568_s13 = scalar_lea.hbm %s3567_s7, 1  ;;  %s3570_s16 = scalar_lea.hbm %s4379_s29, 1 }
  0xcd   :  { %p3569_p10 = scmp.ne.s32.totalorder %s3567_s7, %s3568_s13  ;;  %p3571_p11 = scmp.lt.s32.totalorder %s3567_s7, %s4379_s29 }
  0xce   :  { %p3572_p12 = scmp.lt.s32.totalorder %s3570_s16, %s3568_s13 }
  0xd0   :  { %p3573_p13 = por %p3572_p12, %p3571_p11 }
  0xd2   :  { %p3574_p0 = pnand %p3573_p13, %p3569_p10 }
  0xd4   :  { %3577 = shalt.err (!%p3574_p0)
}
  0xd5   :  { %348 = dma.hbm_to_vmem [thread:$0]  %s344_s26, 16, %s346_s0, [#allocation13]  }
  0xd6   :  { %s4114_s20 = smov [#allocation15]   ;;  %s391_s18 = sshll.u32 %s4409_s3, 4  ;;  %s392_s18 = int_to_ptr.hbm [resolvable:$true] %s391_s18 }
  0xd7   :  { %s371_s11 = sshll.u32 %s4114_s20, 4  ;;  %s3590_s21 = sshra.s32 %s370_s6, 4  ;;  %s372_s11 = int_to_ptr.vmem [resolvable:$true] %s371_s11  ;;  %s3591_s21 = int_to_ptr.hbm [resolvable:$true] %s3590_s21 }
  0xd8   :  { %s3592_s23 = scalar_lea.hbm %s3591_s21, 1  ;;  %s3594_s25 = scalar_lea.hbm %s4399_s24, 1 }
  0xd9   :  { %p3593_p1 = scmp.ne.s32.totalorder %s3591_s21, %s3592_s23  ;;  %p3595_p2 = scmp.lt.s32.totalorder %s3591_s21, %s4399_s24 }
  0xda   :  { %p3596_p3 = scmp.lt.s32.totalorder %s3594_s25, %s3592_s23 }
  0xdc   :  { %p3597_p4 = por %p3596_p3, %p3595_p2 }
  0xde   :  { %p3598_p5 = pnand %p3597_p4, %p3593_p1 }
  0xe0   :  { %3601 = shalt.err (!%p3598_p5)
}
  0xe1   :  { %374 = dma.hbm_to_vmem [thread:$0]  %s370_s6, 16, %s372_s11, [#allocation16]  }
  0xe2   :  { %s413_s29 = sshll.u32 %s4419_s12, 4  ;;  %s4115_s26 = smov [#allocation18]   ;;  %s414_s29 = int_to_ptr.hbm [resolvable:$true] %s413_s29 }
  0xe3   :  { %s393_s28 = sshll.u32 %s4115_s26, 4  ;;  %s3614_s2 = sshra.s32 %s392_s18, 4  ;;  %s394_s28 = int_to_ptr.vmem [resolvable:$true] %s393_s28  ;;  %s3615_s2 = int_to_ptr.hbm [resolvable:$true] %s3614_s2 }
  0xe4   :  { %s3616_s17 = scalar_lea.hbm %s3615_s2, 1  ;;  %s3618_s0 = scalar_lea.hbm %s4409_s3, 1 }
  0xe5   :  { %p3617_p6 = scmp.ne.s32.totalorder %s3615_s2, %s3616_s17  ;;  %p3619_p7 = scmp.lt.s32.totalorder %s3615_s2, %s4409_s3 }
  0xe6   :  { %p3620_p8 = scmp.lt.s32.totalorder %s3618_s0, %s3616_s17 }
  0xe8   :  { %p3621_p9 = por %p3620_p8, %p3619_p7 }
  0xea   :  { %p3622_p10 = pnand %p3621_p9, %p3617_p6 }
  0xec   :  { %3625 = shalt.err (!%p3622_p10)
}
  0xed   :  { %396 = dma.hbm_to_vmem [thread:$0]  %s392_s18, 16, %s394_s28, [#allocation19]  }
  0xee   :  { %s4116_s24 = smov [#allocation21]   ;;  %s453_s7 = sshll.u32 %s4474_s9, 4  ;;  %s454_s7 = int_to_ptr.hbm [resolvable:$true] %s453_s7 }
  0xef   :  { %s415_s6 = sshll.u32 %s4116_s24, 4  ;;  %s3638_s13 = sshra.s32 %s414_s29, 4  ;;  %s416_s6 = int_to_ptr.vmem [resolvable:$true] %s415_s6  ;;  %s3639_s13 = int_to_ptr.hbm [resolvable:$true] %s3638_s13 }
  0xf0   :  { %s3640_s16 = scalar_lea.hbm %s3639_s13, 1  ;;  %s3642_s20 = scalar_lea.hbm %s4419_s12, 1 }
  0xf1   :  { %p3641_p11 = scmp.ne.s32.totalorder %s3639_s13, %s3640_s16  ;;  %p3643_p12 = scmp.lt.s32.totalorder %s3639_s13, %s4419_s12 }
  0xf2   :  { %p3644_p13 = scmp.lt.s32.totalorder %s3642_s20, %s3640_s16 }
  0xf4   :  { %p3645_p0 = por %p3644_p13, %p3643_p12 }
  0xf6   :  { %p3646_p1 = pnand %p3645_p0, %p3641_p11 }
  0xf8   :  { %3649 = shalt.err (!%p3646_p1)
}
  0xf9   :  { %418 = dma.hbm_to_vmem [thread:$0]  %s414_s29, 16, %s416_s6, [#allocation22]  }
  0xfa   :  { %s491_s3 = sshll.u32 %s4522_s1, 4  ;;  %s4117_s11 = smov [#allocation24]   ;;  %s492_s3 = int_to_ptr.hbm [resolvable:$true] %s491_s3 }
  0xfb   :  { %s455_s18 = sshll.u32 %s4117_s11, 4  ;;  %s3662_s21 = sshra.s32 %s454_s7, 4  ;;  %s456_s18 = int_to_ptr.vmem [resolvable:$true] %s455_s18  ;;  %s3663_s21 = int_to_ptr.hbm [resolvable:$true] %s3662_s21 }
  0xfc   :  { %s3664_s23 = scalar_lea.hbm %s3663_s21, 1  ;;  %s3666_s25 = scalar_lea.hbm %s4474_s9, 1 }
  0xfd   :  { %p3665_p2 = scmp.ne.s32.totalorder %s3663_s21, %s3664_s23  ;;  %p3667_p3 = scmp.lt.s32.totalorder %s3663_s21, %s4474_s9 }
  0xfe   :  { %p3668_p4 = scmp.lt.s32.totalorder %s3666_s25, %s3664_s23 }
 0x100   :  { %p3669_p5 = por %p3668_p4, %p3667_p3 }
 0x102   :  { %p3670_p6 = pnand %p3669_p5, %p3665_p2 }
 0x104   :  { %3673 = shalt.err (!%p3670_p6)
}
 0x105   :  { %458 = dma.hbm_to_vmem [thread:$0]  %s454_s7, 16, %s456_s18, [#allocation25]  }
 0x106   :  { %s4118_s12 = smov [#allocation27]   ;;  %s288_s26 = sshll.u32 %s4354_s4, 4  ;;  %s289_s26 = int_to_ptr.hbm [resolvable:$true] %s288_s26 }
 0x107   :  { %s493_s29 = sshll.u32 %s4118_s12, 4  ;;  %s3686_s28 = sshra.s32 %s492_s3, 4  ;;  %s494_s29 = int_to_ptr.vmem [resolvable:$true] %s493_s29  ;;  %s3687_s28 = int_to_ptr.hbm [resolvable:$true] %s3686_s28 }
 0x108   :  { %s3688_s2 = scalar_lea.hbm %s3687_s28, 1  ;;  %s3690_s17 = scalar_lea.hbm %s4522_s1, 1 }
 0x109   :  { %p3689_p7 = scmp.ne.s32.totalorder %s3687_s28, %s3688_s2  ;;  %p3691_p8 = scmp.lt.s32.totalorder %s3687_s28, %s4522_s1 }
 0x10a   :  { %p3692_p9 = scmp.lt.s32.totalorder %s3690_s17, %s3688_s2 }
 0x10c   :  { %p3693_p10 = por %p3692_p9, %p3691_p8 }
 0x10e   :  { %p3694_p11 = pnand %p3693_p10, %p3689_p7 }
 0x110   :  { %3697 = shalt.err (!%p3694_p11)
}
 0x111   :  { %496 = dma.hbm_to_vmem [thread:$0]  %s492_s3, 16, %s494_s29, [#allocation28]  }
 0x112   :  { %s310_s9 = sshll.u32 %s4364_s14, 4  ;;  %s4119_s0 = smov [#allocation3]   ;;  %s311_s9 = int_to_ptr.hbm [resolvable:$true] %s310_s9 }
 0x113   :  { %s290_s24 = sshll.u32 %s4119_s0, 4  ;;  %s3710_s6 = sshra.s32 %s289_s26, 4  ;;  %s291_s24 = int_to_ptr.vmem [resolvable:$true] %s290_s24  ;;  %s3711_s6 = int_to_ptr.hbm [resolvable:$true] %s3710_s6 }
 0x114   :  { %s3712_s7 = scalar_lea.hbm %s3711_s6, 1  ;;  %s3714_s13 = scalar_lea.hbm %s4354_s4, 1 }
 0x115   :  { %p3713_p12 = scmp.ne.s32.totalorder %s3711_s6, %s3712_s7  ;;  %p3715_p13 = scmp.lt.s32.totalorder %s3711_s6, %s4354_s4 }
 0x116   :  { %p3716_p0 = scmp.lt.s32.totalorder %s3714_s13, %s3712_s7 }
 0x118   :  { %p3717_p1 = por %p3716_p0, %p3715_p13 }
 0x11a   :  { %p3718_p2 = pnand %p3717_p1, %p3713_p12 }
 0x11c   :  { %3721 = shalt.err (!%p3718_p2)
}
 0x11d   :  { %293 = dma.hbm_to_vmem [thread:$0]  %s289_s26, 16, %s291_s24, [#allocation4]  }
 0x11e   :  { %s4120_s1 = smov [#allocation8]   ;;  %s332_s20 = sshll.u32 %s4374_s8, 4  ;;  %s333_s20 = int_to_ptr.hbm [resolvable:$true] %s332_s20 }
 0x11f   :  { %s312_s16 = sshll.u32 %s4120_s1, 4  ;;  %s3734_s3 = sshra.s32 %s311_s9, 4  ;;  %s313_s16 = int_to_ptr.vmem [resolvable:$true] %s312_s16  ;;  %s3735_s3 = int_to_ptr.hbm [resolvable:$true] %s3734_s3 }
 0x120   :  { %s3736_s11 = scalar_lea.hbm %s3735_s3, 1  ;;  %s3738_s18 = scalar_lea.hbm %s4364_s14, 1 }
 0x121   :  { %p3737_p3 = scmp.ne.s32.totalorder %s3735_s3, %s3736_s11  ;;  %p3739_p4 = scmp.lt.s32.totalorder %s3735_s3, %s4364_s14 }
 0x122   :  { %p3740_p5 = scmp.lt.s32.totalorder %s3738_s18, %s3736_s11 }
 0x124   :  { %p3741_p6 = por %p3740_p5, %p3739_p4 }
 0x126   :  { %p3742_p7 = pnand %p3741_p6, %p3737_p3 }
 0x128   :  { %3745 = shalt.err (!%p3742_p7)
}
 0x129   :  { %315 = dma.hbm_to_vmem [thread:$0]  %s311_s9, 16, %s313_s16, [#allocation7]  }
 0x12a   :  { %s356_s4 = sshll.u32 %s4389_s19, 4  ;;  %s4121_s21 = smov [#allocation11]   ;;  %s357_s4 = int_to_ptr.hbm [resolvable:$true] %s356_s4 }
 0x12b   :  { %s334_s23 = sshll.u32 %s4121_s21, 4  ;;  %s3758_s25 = sshra.s32 %s333_s20, 4  ;;  %s335_s23 = int_to_ptr.vmem [resolvable:$true] %s334_s23  ;;  %s3759_s25 = int_to_ptr.hbm [resolvable:$true] %s3758_s25 }
 0x12c   :  { %s3760_s12 = scalar_lea.hbm %s3759_s25, 1  ;;  %s3762_s29 = scalar_lea.hbm %s4374_s8, 1 }
 0x12d   :  { %p3761_p8 = scmp.ne.s32.totalorder %s3759_s25, %s3760_s12  ;;  %p3763_p9 = scmp.lt.s32.totalorder %s3759_s25, %s4374_s8 }
 0x12e   :  { %p3764_p10 = scmp.lt.s32.totalorder %s3762_s29, %s3760_s12 }
 0x130   :  { %p3765_p11 = por %p3764_p10, %p3763_p9 }
 0x132   :  { %p3766_p12 = pnand %p3765_p11, %p3761_p8 }
 0x134   :  { %3769 = shalt.err (!%p3766_p12)
}
 0x135   :  { %337 = dma.hbm_to_vmem [thread:$0]  %s333_s20, 16, %s335_s23, [#allocation10]  }
 0x136   :  { %s4122_s14 = smov [#allocation14]   ;;  %s380_s28 = sshll.u32 %s4404_s27, 4  ;;  %s381_s28 = int_to_ptr.hbm [resolvable:$true] %s380_s28 }
 0x137   :  { %s358_s26 = sshll.u32 %s4122_s14, 4  ;;  %s3782_s2 = sshra.s32 %s357_s4, 4  ;;  %s359_s26 = int_to_ptr.vmem [resolvable:$true] %s358_s26  ;;  %s3783_s2 = int_to_ptr.hbm [resolvable:$true] %s3782_s2 }
 0x138   :  { %s3784_s17 = scalar_lea.hbm %s3783_s2, 1  ;;  %s3786_s9 = scalar_lea.hbm %s4389_s19, 1 }
 0x139   :  { %p3785_p13 = scmp.ne.s32.totalorder %s3783_s2, %s3784_s17  ;;  %p3787_p0 = scmp.lt.s32.totalorder %s3783_s2, %s4389_s19 }
 0x13a   :  { %p3788_p1 = scmp.lt.s32.totalorder %s3786_s9, %s3784_s17 }
 0x13c   :  { %p3789_p2 = por %p3788_p1, %p3787_p0 }
 0x13e   :  { %p3790_p3 = pnand %p3789_p2, %p3785_p13 }
 0x140   :  { %3793 = shalt.err (!%p3790_p3)
}
 0x141   :  { %361 = dma.hbm_to_vmem [thread:$0]  %s357_s4, 16, %s359_s26, [#allocation13]  }
 0x142   :  { %s402_s8 = sshll.u32 %s4414_s30, 4  ;;  %s4123_s0 = smov [#allocation17]   ;;  %s403_s8 = int_to_ptr.hbm [resolvable:$true] %s402_s8 }
 0x143   :  { %s382_s24 = sshll.u32 %s4123_s0, 4  ;;  %s3806_s6 = sshra.s32 %s381_s28, 4  ;;  %s383_s24 = int_to_ptr.vmem [resolvable:$true] %s382_s24  ;;  %s3807_s6 = int_to_ptr.hbm [resolvable:$true] %s3806_s6 }
 0x144   :  { %s3808_s7 = scalar_lea.hbm %s3807_s6, 1  ;;  %s3810_s13 = scalar_lea.hbm %s4404_s27, 1 }
 0x145   :  { %p3809_p4 = scmp.ne.s32.totalorder %s3807_s6, %s3808_s7  ;;  %p3811_p5 = scmp.lt.s32.totalorder %s3807_s6, %s4404_s27 }
 0x146   :  { %p3812_p6 = scmp.lt.s32.totalorder %s3810_s13, %s3808_s7 }
 0x148   :  { %p3813_p7 = por %p3812_p6, %p3811_p5 }
 0x14a   :  { %p3814_p8 = pnand %p3813_p7, %p3809_p4 }
 0x14c   :  { %3817 = shalt.err (!%p3814_p8)
}
 0x14d   :  { %385 = dma.hbm_to_vmem [thread:$0]  %s381_s28, 16, %s383_s24, [#allocation16]  }
 0x14e   :  { %s5248_s19 = sld [smem:[#allocation99_spill]]  ;;  %s4124_s1 = smov [#allocation20]  }
 0x14f   :  { %s404_s16 = sshll.u32 %s4124_s1, 4  ;;  %s3830_s3 = sshra.s32 %s403_s8, 4  ;;  %s405_s16 = int_to_ptr.vmem [resolvable:$true] %s404_s16  ;;  %s3831_s3 = int_to_ptr.hbm [resolvable:$true] %s3830_s3 }
 0x150   :  { %s3832_s11 = scalar_lea.hbm %s3831_s3, 1  ;;  %s3834_s18 = scalar_lea.hbm %s4414_s30, 1 }
 0x151   :  { %p3833_p9 = scmp.ne.s32.totalorder %s3831_s3, %s3832_s11  ;;  %p3835_p10 = scmp.lt.s32.totalorder %s3831_s3, %s4414_s30 }
 0x152   :  { %p3836_p11 = scmp.lt.s32.totalorder %s3834_s18, %s3832_s11 }
 0x154   :  { %s440_s20 = sshll.u32 %s5248_s19, 4  ;;  %p3837_p12 = por %p3836_p11, %p3835_p10  ;;  %s441_s20 = int_to_ptr.hbm [resolvable:$true] %s440_s20 }
 0x156   :  { %p3838_p13 = pnand %p3837_p12, %p3833_p9 }
 0x158   :  { %3841 = shalt.err (!%p3838_p13)
}
 0x159   :  { %407 = dma.hbm_to_vmem [thread:$0]  %s403_s8, 16, %s405_s16, [#allocation19]  }
 0x15a   :  { %s5249_s27 = sld [smem:[#allocation107_spill]]  ;;  %s4125_s21 = smov [#allocation23]  }
 0x15b   :  { %s442_s23 = sshll.u32 %s4125_s21, 4  ;;  %s3854_s25 = sshra.s32 %s441_s20, 4  ;;  %s443_s23 = int_to_ptr.vmem [resolvable:$true] %s442_s23  ;;  %s3855_s25 = int_to_ptr.hbm [resolvable:$true] %s3854_s25 }
 0x15c   :  { %s3856_s12 = scalar_lea.hbm %s3855_s25, 1  ;;  %s3858_s29 = scalar_lea.hbm %s5248_s19, 1 }
 0x15d   :  { %p3857_p0 = scmp.ne.s32.totalorder %s3855_s25, %s3856_s12  ;;  %p3859_p1 = scmp.lt.s32.totalorder %s3855_s25, %s5248_s19 }
 0x15e   :  { %p3860_p2 = scmp.lt.s32.totalorder %s3858_s29, %s3856_s12 }
 0x160   :  { %s478_s4 = sshll.u32 %s5249_s27, 4  ;;  %p3861_p3 = por %p3860_p2, %p3859_p1  ;;  %s479_s4 = int_to_ptr.hbm [resolvable:$true] %s478_s4 }
 0x162   :  { %p3862_p4 = pnand %p3861_p3, %p3857_p0 }
 0x164   :  { %3865 = shalt.err (!%p3862_p4)
}
 0x165   :  { %445 = dma.hbm_to_vmem [thread:$0]  %s441_s20, 16, %s443_s23, [#allocation22]  }
 0x166   :  { %s5250_s30 = sld [smem:[#allocation110_spill]]  ;;  %s4126_s14 = smov [#allocation26]  }
 0x167   :  { %s480_s26 = sshll.u32 %s4126_s14, 4  ;;  %s3878_s2 = sshra.s32 %s479_s4, 4  ;;  %s481_s26 = int_to_ptr.vmem [resolvable:$true] %s480_s26  ;;  %s3879_s2 = int_to_ptr.hbm [resolvable:$true] %s3878_s2 }
 0x168   :  { %s3880_s17 = scalar_lea.hbm %s3879_s2, 1  ;;  %s3882_s9 = scalar_lea.hbm %s5249_s27, 1 }
 0x169   :  { %p3881_p5 = scmp.ne.s32.totalorder %s3879_s2, %s3880_s17  ;;  %p3883_p6 = scmp.lt.s32.totalorder %s3879_s2, %s5249_s27 }
 0x16a   :  { %p3884_p7 = scmp.lt.s32.totalorder %s3882_s9, %s3880_s17 }
 0x16c   :  { %s504_s28 = sshll.u32 %s5250_s30, 4  ;;  %p3885_p8 = por %p3884_p7, %p3883_p6  ;;  %s505_s28 = int_to_ptr.hbm [resolvable:$true] %s504_s28 }
 0x16e   :  { %p3886_p9 = pnand %p3885_p8, %p3881_p5 }
 0x170   :  { %3889 = shalt.err (!%p3886_p9)
}
 0x171   :  { %483 = dma.hbm_to_vmem [thread:$0]  %s479_s4, 16, %s481_s26, [#allocation25]  }
 0x172   :  { %s5251_s8 = sld [smem:[#allocation116_spill]]  ;;  %s4127_s24 = smov [#allocation29]  }
 0x173   :  { %s506_s6 = sshll.u32 %s4127_s24, 4  ;;  %s3902_s7 = sshra.s32 %s505_s28, 4  ;;  %s507_s6 = int_to_ptr.vmem [resolvable:$true] %s506_s6  ;;  %s3903_s7 = int_to_ptr.hbm [resolvable:$true] %s3902_s7 }
 0x174   :  { %s3904_s13 = scalar_lea.hbm %s3903_s7, 1  ;;  %s3906_s19 = scalar_lea.hbm %s5250_s30, 1 }
 0x175   :  { %p3905_p10 = scmp.ne.s32.totalorder %s3903_s7, %s3904_s13  ;;  %p3907_p11 = scmp.lt.s32.totalorder %s3903_s7, %s5250_s30 }
 0x176   :  { %p3908_p12 = scmp.lt.s32.totalorder %s3906_s19, %s3904_s13 }
 0x178   :  { %s525_s0 = sshll.u32 %s5251_s8, 4  ;;  %p3909_p13 = por %p3908_p12, %p3907_p11  ;;  %s526_s0 = int_to_ptr.hbm [resolvable:$true] %s525_s0 }
 0x17a   :  { %p3910_p0 = pnand %p3909_p13, %p3905_p10 }
 0x17c   :  { %3913 = shalt.err (!%p3910_p0)
}
 0x17d   :  { %509 = dma.hbm_to_vmem [thread:$0]  %s505_s28, 16, %s507_s6, [#allocation28]  }
 0x17e   :  { %s4128_s1 = smov [#allocation30]   ;;  %s3926_s20 = sshra.s32 %s526_s0, 4  ;;  %s3927_s20 = int_to_ptr.hbm [resolvable:$true] %s3926_s20 }
 0x17f   :  { %s527_s16 = sshll.u32 %s4128_s1, 4  ;;  %s3928_s3 = scalar_lea.hbm %s3927_s20, 1  ;;  %s528_s16 = int_to_ptr.vmem [resolvable:$true] %s527_s16 }
 0x180   :  { %p3929_p1 = scmp.ne.s32.totalorder %s3927_s20, %s3928_s3  ;;  %s3930_s11 = scalar_lea.hbm %s5251_s8, 1 }
 0x181   :  { %p3931_p2 = scmp.lt.s32.totalorder %s3927_s20, %s5251_s8  ;;  %p3932_p3 = scmp.lt.s32.totalorder %s3930_s11, %s3928_s3 }
 0x183   :  { %p3933_p4 = por %p3932_p3, %p3931_p2 }
 0x185   :  { %p3934_p5 = pnand %p3933_p4, %p3929_p1 }
 0x187   :  { %3937 = shalt.err (!%p3934_p5)
}
 0x188   :  { %530 = dma.hbm_to_vmem [thread:$0]  %s526_s0, 16, %s528_s16, [#allocation31]  }
 0x189   :  { %3998 = dma.done.wait [#allocation4], 16  }
 0x18a   :  { %3999 = vsyncadd [#allocation4], 4294967280 }
 0x18b   :  { %4000 = dma.done.wait [#allocation7], 32  }
 0x18c   :  { %4001 = vsyncadd [#allocation7], 4294967264 }
 0x18d   :  { %4002 = dma.done.wait [#allocation10], 32  }
 0x18e   :  { %4003 = vsyncadd [#allocation10], 4294967264 }
 0x18f   :  { %4004 = dma.done.wait [#allocation13], 32  }
 0x190   :  { %4005 = vsyncadd [#allocation13], 4294967264 }
 0x191   :  { %4006 = dma.done.wait [#allocation16], 32  }
 0x192   :  { %4007 = vsyncadd [#allocation16], 4294967264 }
 0x193   :  { %4008 = dma.done.wait [#allocation19], 32  }
 0x194   :  { %4009 = vsyncadd [#allocation19], 4294967264 }
 0x195   :  { %4010 = dma.done.wait [#allocation22], 32  }
 0x196   :  { %4011 = vsyncadd [#allocation22], 4294967264 }
 0x197   :  { %4012 = dma.done.wait [#allocation25], 32  }
 0x198   :  { %4013 = vsyncadd [#allocation25], 4294967264 }
 0x199   :  { %4014 = dma.done.wait [#allocation28], 32  }
 0x19a   :  { %4015 = vsyncadd [#allocation28], 4294967264 }
 0x19b   :  { %4016 = dma.done.wait [#allocation31], 16  }
 0x19c   :  { %4017 = vsyncadd [#allocation31], 4294967280  ;;  %s5252_s18 = sld [smem:[#allocation117_spill]]  ;;  %vm799_vm0 = vcmask 1043456   ;;  %vm792_vm1 = vcmask 31744   ;;  %vm826_vm2 = vcmask 261120  }
 0x19d   :  { %s5253_s27 = sld [smem:[#allocation47_spill]]  ;;  %v3382_v4 = vld [vmem:[#allocation30] ss:$0 sm:$0xff]  ;;  %v4129_v11 = vmov 32.0   ;;  %v4130_v15 = vmov 8.0   ;;  %v4131_v23 = vmov 0  }
 0x19e   :  { %s5254_s4 = sld [smem:[#allocation50_spill]]  ;;  %3438 = vrcp.f32 %v4129_v11  ;;  %3380 = vset.pattern.permute.xlu0 %v4131_v23  ;;  %3381 = vset.pattern.permute.xlu1 %v4131_v23 }
 0x19f   :  { %3440 = vrcp.f32 %v4130_v15  ;;  %3379 = vset.pattern.permute.xlu2 %v4131_v23  ;;  %s5255_s21 = sld [smem:[#allocation49_spill]] }
 0x1a0   :  { %s5256_s23 = sld [smem:[#allocation48_spill]] }
 0x1a1   :  { %s5257_s25 = sld [smem:[#allocation52_spill]] }
 0x1a2   :  { %v785_v1 = vld [vmem:[%s5252_s18] sm:$0xf]  ;;  %s5258_s12 = sld [smem:[#allocation51_spill]] }
 0x1a3   :  { %v786_v2 = vld [vmem:[%s5253_s27] sm:$0xff]  ;;  %3186 = vmatpush.msk.msra.mxu0 %vm799_vm0, %v785_v1  ;;  %v787_v3 = vld [vmem:[%s5253_s27 + $0x8] sm:$0xff]  ;;  %s5259_s29 = sld [smem:[#allocation84_spill]] }
 0x1a4   :  { %3187 = vmatmul.msk.f32.vlgmr.msra.gmra.mxu0 %vm792_vm1, %v786_v2  ;;  %v3439_v12 = vpop.eup %3438  ;;  %v3383_v21 = vld [vmem:[%s5254_s4 + $0x1] ss:$0 sm:$0xff]  ;;  %v3384_v22 = vld [vmem:[%s5254_s4] ss:$0 sm:$0xff]  ;;  %s5260_s30 = sld [smem:[#allocation80_spill]] }
 0x1a5   :  { %v834_v13 = vmul.f32 32.0, %v3439_v12  ;;  %v3441_v17 = vpop.eup %3440  ;;  %vm838_vm3 = vweird.f32 %v3439_v12  ;;  %918 = vperm.xlu2 %3379, %v3384_v22   ;;  %v3386_v49 = vld [vmem:[%s5255_s21] ss:$0 sm:$0xff]  ;;  %v3385_v53 = vld [vmem:[%s5255_s21 + $0x1] ss:$0 sm:$0xff]  ;;  %s5261_s14 = sld [smem:[#allocation86_spill]] }
 0x1a6   :  { %v855_v19 = vmul.f32 8.0, %v3441_v17  ;;  %vm859_vm4 = vweird.f32 %v3441_v17  ;;  %s5262_s26 = sld [smem:[#allocation65_spill]] }
 0x1a7   :  { %v835_v14 = vsub.f32 1.0, %v834_v13  ;;  %s5263_s28 = sld [smem:[#allocation69_spill]] }
 0x1a8   :  { %v856_v25 = vsub.f32 1.0, %v855_v19  ;;  %s5264_s2 = sld [smem:[#allocation67_spill]] }
 0x1a9   :  { %v836_v16 = vmul.f32 %v3439_v12, %v835_v14  ;;  %s5265_s17 = sld [smem:[#allocation85_spill]] }
 0x1aa   :  { %v857_v28 = vmul.f32 %v3441_v17, %v856_v25  ;;  %s5266_s9 = sld [smem:[#allocation81_spill]] }
 0x1ab   :  { %v837_v18 = vadd.f32 %v3439_v12, %v836_v16  ;;  %s5267_s8 = sld [smem:[#allocation66_spill]] }
 0x1ac   :  { %3188 = vmatmul.msk.f32.gmra.mxu0 %vm792_vm1, %v787_v3  ;;  %v858_v32 = vadd.f32 %v3441_v17, %v857_v28  ;;  %s5268_s0 = sld [smem:[#allocation87_spill]] }
 0x1ad   :  { %v4650_v20 = vsel %vm838_vm3, %v3439_v12, %v837_v18  ;;  %932 = vperm.xlu2 %3379, %v3386_v49   ;;  %vm1127_vm3 = vcmask 130048   ;;  %s5269_s24 = sld [smem:[#allocation68_spill]] }
 0x1ae   :  { %v4656_v37 = vsel %vm859_vm4, %v3441_v17, %v858_v32  ;;  %vm1182_vm4 = vcmask 64512   ;;  %s5270_s6 = sld [smem:[#allocation82_spill]] }
 0x1af   :  { %s5271_s7 = sld [smem:[#allocation70_spill]] }
 0x1b0   :  { %s5272_s13 = sld [smem:[#allocation83_spill]] }
 0x1b1   :  { %s5273_s19 = sld [smem:[#allocation79_spill]] }
 0x1b2   :  { %s5274_s1 = sld [smem:[#allocation72_spill]] }
 0x1b3   :  { %s5275_s16 = sld [smem:[#allocation74_spill]] }
 0x1b4   :  { %s5276_s20 = sld [smem:[#allocation76_spill]] }
 0x1b5   :  { %s5277_s3 = sld [smem:[#allocation75_spill]] }
 0x1b6   :  { %s5278_s11 = sld [smem:[#allocation71_spill]] }
 0x1b7   :  { %s5279_s18 = sld [smem:[#allocation73_spill]] }
 0x1b8   :  { %s5280_s27 = sld [smem:[#allocation95_spill]] }
 0x1b9   :  { %s5281_s4 = sld [smem:[#allocation91_spill]] }
 0x1ba   :  { %s5282_s21 = sld [smem:[#allocation97_spill]] }
 0x1ff   :  { %v919_v14 = vpop.permute.xlu2 %918 }
 0x207   :  { %v933_v25 = vpop.permute.xlu2 %932 }
 0x221   :  { %v820_v5 = vpop.f32.mrf.mxu0 }
 0x222   :  { %v821_v6 = vadd.f32 %v3382_v4, %v820_v5 }
 0x224   :  { %v827_v7 = vsel %vm826_vm2, %v821_v6, 0.0 }
 0x225   :  { %828 = vadd.xlane.f32.xlu0 %v827_v7 }
 0x229   :  { %v823_v8 = vpop.f32.mrf.mxu0 }
 0x22a   :  { %v824_v9 = vadd.f32 %v3382_v4, %v823_v8 }
 0x22c   :  { %v830_v10 = vsel %vm826_vm2, %v824_v9, 0.0 }
 0x22d   :  { %831 = vadd.xlane.f32.xlu0 %v830_v10 }
 0x241   :  { %922 = vperm.xlu0 %3380, %v3383_v21  }
 0x298   :  { %v829_v24 = vpop.xlane.xlu0 %828 }
 0x299   :  { %v840_v26 = vmul.f32 %v4650_v20, %v829_v24 }
 0x29b   :  { %v842_v27 = vrot.slane %v840_v26, 4 }
 0x29d   :  { %v843_v29 = vadd.f32 %v842_v27, %v840_v26  ;;  %v788_v27 = vld [vmem:[%s5256_s23] sm:$0xff]  ;;  %s5283_s23 = sld [smem:[#allocation78_spill]] }
 0x29f   :  { %v844_v30 = vrot.slane %v843_v29, 2 }
 0x2a0   :  { %v832_v31 = vpop.xlane.xlu0 %831 }
 0x2a1   :  { %v845_v33 = vadd.f32 %v844_v30, %v843_v29  ;;  %v841_v34 = vmul.f32 %v4650_v20, %v832_v31 }
 0x2a3   :  { %v846_v35 = vrot.slane %v845_v33, 1  ;;  %v848_v36 = vrot.slane %v841_v34, 4 }
 0x2a5   :  { %v847_v38 = vadd.f32 %v846_v35, %v845_v33  ;;  %v849_v39 = vadd.f32 %v848_v36, %v841_v34 }
 0x2a7   :  { %v850_v40 = vrot.slane %v849_v39, 2  ;;  %v861_v41 = vmul.f32 %v4656_v37, %v847_v38 }
 0x2a9   :  { %v851_v42 = vadd.f32 %v850_v40, %v849_v39  ;;  %v863_v43 = vsub.f32 %v821_v6, %v861_v41  ;;  %v3387_v41 = vld [vmem:[%s5257_s25] ss:$0 sm:$0xff] }
 0x2ab   :  { %v852_v44 = vrot.slane %v851_v42, 1  ;;  %v865_v45 = vmul.f32 %v863_v43, %v863_v43 }
 0x2ad   :  { %v853_v46 = vadd.f32 %v852_v44, %v851_v42  ;;  %v867_v47 = vsel %vm826_vm2, %v865_v45, 0.0  ;;  %v3388_v42 = vld [vmem:[%s5257_s25 + $0x1] ss:$0 sm:$0xff]  ;;  %s5284_s25 = sld [smem:[#allocation77_spill]] }
 0x2ae   :  { %868 = vadd.xlane.f32.xlu1 %v867_v47 }
 0x2af   :  { %v862_v48 = vmul.f32 %v4656_v37, %v853_v46 }
 0x2b1   :  { %v864_v50 = vsub.f32 %v824_v9, %v862_v48 }
 0x2b3   :  { %v866_v51 = vmul.f32 %v864_v50, %v864_v50  ;;  %v923_v32 = vpop.permute.xlu0 %922 }
 0x2b5   :  { %v870_v52 = vsel %vm826_vm2, %v866_v51, 0.0 }
 0x2b6   :  { %871 = vadd.xlane.f32.xlu1 %v870_v52 }
 0x2cf   :  { %936 = vperm.xlu1 %3381, %v3385_v53  }
 0x321   :  { %v869_v54 = vpop.xlane.xlu1 %868 }
 0x322   :  { %v873_v55 = vmul.f32 %v869_v54, %v4650_v20 }
 0x324   :  { %v875_v56 = vrot.slane %v873_v55, 4 }
 0x326   :  { %v876_v57 = vadd.f32 %v875_v56, %v873_v55 }
 0x328   :  { %v877_v58 = vrot.slane %v876_v57, 2 }
 0x329   :  { %v872_v59 = vpop.xlane.xlu1 %871 }
 0x32a   :  { %v878_v60 = vadd.f32 %v877_v58, %v876_v57  ;;  %v874_v61 = vmul.f32 %v872_v59, %v4650_v20 }
 0x32c   :  { %v879_v62 = vrot.slane %v878_v60, 1  ;;  %v881_v63 = vrot.slane %v874_v61, 4 }
 0x32e   :  { %v880_v0 = vadd.f32 %v879_v62, %v878_v60  ;;  %v882_v1 = vadd.f32 %v881_v63, %v874_v61 }
 0x330   :  { %v887_v2 = vmul.f32 %v880_v0, %v4656_v37  ;;  %v883_v3 = vrot.slane %v882_v1, 2 }
 0x332   :  { %v889_v4 = vadd.f32 1e-05, %v887_v2  ;;  %v884_v5 = vadd.f32 %v883_v3, %v882_v1 }
 0x334   :  { %3442 = vrsqrt.f32 %v889_v4  ;;  %v885_v6 = vrot.slane %v884_v5, 1  ;;  %vm897_vm6 = vweird.f32 %v889_v4 }
 0x336   :  { %v886_v7 = vadd.f32 %v885_v6, %v884_v5 }
 0x338   :  { %v888_v8 = vmul.f32 %v886_v7, %v4656_v37 }
 0x33a   :  { %v3443_v9 = vpop.eup %3442  ;;  %v890_v10 = vadd.f32 1e-05, %v888_v8 }
 0x33b   :  { %v892_v11 = vmul.f32 %v3443_v9, %v889_v4  ;;  %vm898_vm5 = vweird.f32 %v3443_v9  ;;  %v3390_v4 = vld [vmem:[%s5258_s12 + $0x1] ss:$0 sm:$0xff] }
 0x33c   :  { %3444 = vrsqrt.f32 %v890_v10  ;;  %vm899_vm7 = vmor %vm897_vm6, %vm898_vm5  ;;  %vm907_vm9 = vweird.f32 %v890_v10 }
 0x33d   :  { %v893_v12 = vmul.f32 %v3443_v9, %v892_v11  ;;  %v664_v11 = vld [vmem:[%s5260_s30 + $0x18] sm:$0xff] }
 0x33e   :  { %1090 = vmatpush.msra.mxu2 %v664_v11 }
 0x33f   :  { %v894_v13 = vmul.f32 0.5, %v893_v12  ;;  %v684_v12 = vld [vmem:[%s5261_s14 + $0x18] sm:$0xff] }
 0x340   :  { %1116 = vmatpush.msra.mxu3 %v684_v12  ;;  %v677_v12 = vld [vmem:[%s5265_s17] sm:$0xff] }
 0x341   :  { %v895_v15 = vsub.f32 1.5, %v894_v13  ;;  %v937_v35 = vpop.permute.xlu1 %936 }
 0x342   :  { %v3445_v16 = vpop.eup %3444 }
 0x343   :  { %v896_v17 = vmul.f32 %v3443_v9, %v895_v15  ;;  %v902_v18 = vmul.f32 %v3445_v16, %v890_v10  ;;  %vm908_vm8 = vweird.f32 %v3445_v16  ;;  %v676_v10 = vld [vmem:[%s5259_s29 + $0x18] sm:$0xff]  ;;  %v663_v15 = vld [vmem:[%s5260_s30 + $0x10] sm:$0xff] }
 0x344   :  { %vm909_vm10 = vmor %vm907_vm9, %vm908_vm8  ;;  %1064 = vmatpush.msra.mxu1 %v676_v10  ;;  %1091 = vmatpush.msra.mxu2 %v663_v15  ;;  %v678_v10 = vld [vmem:[%s5265_s17 + $0x8] sm:$0xff] }
 0x345   :  { %v900_v19 = vsel %vm899_vm7, %v3443_v9, %v896_v17  ;;  %v903_v21 = vmul.f32 %v3445_v16, %v902_v18  ;;  %v674_v18 = vld [vmem:[%s5259_s29 + $0x8] sm:$0xff] }
 0x346   :  { %v911_v22 = vmul.f32 %v900_v19, %v863_v43  ;;  %v3389_v43 = vld [vmem:[%s5258_s12] ss:$0 sm:$0xff]  ;;  %v662_v19 = vld [vmem:[%s5260_s30 + $0x8] sm:$0xff]  ;;  %s5285_s12 = sld [smem:[#allocation88_spill]] }
 0x347   :  { %v904_v23 = vmul.f32 0.5, %v903_v21  ;;  %v682_v21 = vld [vmem:[%s5261_s14 + $0x8] sm:$0xff]  ;;  %1092 = vmatpush.msra.mxu2 %v662_v19  ;;  %v667_v19 = vld [vmem:[%s5266_s9 + $0x10] sm:$0xff] }
 0x348   :  { %v925_v24 = vmul.f32 %v919_v14, %v911_v22  ;;  %v675_v14 = vld [vmem:[%s5259_s29 + $0x10] sm:$0xff] }
 0x349   :  { %v905_v26 = vsub.f32 1.5, %v904_v23  ;;  %1065 = vmatpush.msra.mxu1 %v675_v14 }
 0x34a   :  { %v939_v28 = vadd.f32 %v933_v25, %v925_v24  ;;  %v673_v25 = vld [vmem:[%s5259_s29] sm:$0xff]  ;;  %s5286_s29 = sld [smem:[#allocation96_spill]] }
 0x34b   :  { %v906_v29 = vmul.f32 %v3445_v16, %v905_v26  ;;  %1066 = vmatpush.msra.mxu1 %v674_v18  ;;  %v661_v26 = vld [vmem:[%s5260_s30] sm:$0xff]  ;;  %s5287_s30 = sld [smem:[#allocation92_spill]] }
 0x34c   :  { %v941_v30 = vadd.f32 %v939_v28, %v788_v27  ;;  %1093 = vmatpush.msra.mxu2 %v661_v26 }
 0x34d   :  { %v910_v31 = vsel %vm909_vm10, %v3445_v16, %v906_v29  ;;  %v683_v16 = vld [vmem:[%s5261_s14 + $0x10] sm:$0xff]  ;;  %1067 = vmatpush.msra.mxu1 %v673_v25 }
 0x34e   :  { %v912_v33 = vmul.f32 %v910_v31, %v864_v50  ;;  %v943_v34 = vsel %vm826_vm2, %v941_v30, 0.0  ;;  %1117 = vmatpush.msra.mxu3 %v683_v16  ;;  %v668_v16 = vld [vmem:[%s5266_s9 + $0x18] sm:$0xff] }
 0x34f   :  { %944 = vadd.xlane.f32.xlu2 %v943_v34 }
 0x350   :  { %v926_v36 = vmul.f32 %v923_v32, %v912_v33  ;;  %1118 = vmatpush.msra.mxu3 %v682_v21  ;;  %v666_v21 = vld [vmem:[%s5266_s9 + $0x8] sm:$0xff] }
 0x352   :  { %v940_v38 = vadd.f32 %v937_v35, %v926_v36 }
 0x354   :  { %v942_v39 = vadd.f32 %v940_v38, %v788_v27  ;;  %v681_v27 = vld [vmem:[%s5261_s14] sm:$0xff]  ;;  %s5288_s14 = sld [smem:[#allocation98_spill]] }
 0x355   :  { %1119 = vmatpush.msra.mxu3 %v681_v27  ;;  %v3395_v27 = vld [vmem:[%s5267_s8] ss:$0 sm:$0xff]  ;;  %s5294_s8 = sld [smem:[#allocation53_spill]] }
 0x356   :  { %v946_v40 = vsel %vm826_vm2, %v942_v39, 0.0 }
 0x357   :  { %947 = vadd.xlane.f32.xlu1 %v946_v40 }
 0x367   :  { %1020 = vperm.xlu2 %3379, %v3387_v41  }
 0x36f   :  { %1024 = vperm.xlu2 %3379, %v3388_v42  }
 0x370   :  { %1034 = vperm.xlu1 %3381, %v3389_v43  }
 0x3c2   :  { %v945_v44 = vpop.xlane.xlu2 %944 }
 0x3c3   :  { %v949_v45 = vmul.f32 %v945_v44, %v4650_v20 }
 0x3c5   :  { %v951_v46 = vrot.slane %v949_v45, 4 }
 0x3c7   :  { %v952_v47 = vadd.f32 %v951_v46, %v949_v45 }
 0x3c9   :  { %v953_v48 = vrot.slane %v952_v47, 2 }
 0x3ca   :  { %v948_v49 = vpop.xlane.xlu1 %947  ;;  %v4689_v5 = vpop.permute.xlu2 %1020 }
 0x3cb   :  { %v954_v50 = vadd.f32 %v953_v48, %v952_v47  ;;  %v950_v51 = vmul.f32 %v948_v49, %v4650_v20 }
 0x3cd   :  { %v955_v52 = vrot.slane %v954_v50, 1  ;;  %v957_v53 = vrot.slane %v950_v51, 4 }
 0x3cf   :  { %v956_v54 = vadd.f32 %v955_v52, %v954_v50  ;;  %v958_v55 = vadd.f32 %v957_v53, %v950_v51 }
 0x3d1   :  { %v959_v56 = vrot.slane %v958_v55, 2  ;;  %v963_v57 = vmul.f32 %v956_v54, %v4656_v37 }
 0x3d2   :  { %v4691_v6 = vpop.permute.xlu2 %1024 }
 0x3d3   :  { %v960_v58 = vadd.f32 %v959_v56, %v958_v55  ;;  %v4677_v59 = vsub.f32 %v941_v30, %v963_v57 }
 0x3d5   :  { %v961_v60 = vrot.slane %v960_v58, 1  ;;  %v967_v61 = vmul.f32 %v4677_v59, %v4677_v59 }
 0x3d7   :  { %v962_v62 = vadd.f32 %v961_v60, %v960_v58  ;;  %v969_v63 = vsel %vm826_vm2, %v967_v61, 0.0 }
 0x3d8   :  { %970 = vadd.xlane.f32.xlu0 %v969_v63  ;;  %v3392_v63 = vld [vmem:[%s5262_s26] ss:$0 sm:$0xff]  ;;  %s5289_s26 = sld [smem:[#allocation93_spill]] }
 0x3d9   :  { %v964_v0 = vmul.f32 %v962_v62, %v4656_v37 }
 0x3db   :  { %v4683_v1 = vsub.f32 %v942_v39, %v964_v0  ;;  %v3393_v0 = vld [vmem:[%s5263_s28] ss:$0 sm:$0xff]  ;;  %s5290_s28 = sld [smem:[#allocation94_spill]] }
 0x3dd   :  { %v968_v2 = vmul.f32 %v4683_v1, %v4683_v1 }
 0x3df   :  { %v972_v3 = vsel %vm826_vm2, %v968_v2, 0.0 }
 0x3e0   :  { %973 = vadd.xlane.f32.xlu2 %v972_v3 }
 0x3e2   :  { %v1035_v54 = vpop.permute.xlu1 %1034 }
 0x3f8   :  { %1038 = vperm.xlu2 %3379, %v3390_v4  }
 0x44b   :  { %v971_v7 = vpop.xlane.xlu0 %970 }
 0x44c   :  { %v975_v8 = vmul.f32 %v971_v7, %v4650_v20 }
 0x44e   :  { %v977_v9 = vrot.slane %v975_v8, 4 }
 0x450   :  { %v978_v13 = vadd.f32 %v977_v9, %v975_v8  ;;  %v679_v9 = vld [vmem:[%s5265_s17 + $0x10] sm:$0xff] }
 0x452   :  { %v979_v17 = vrot.slane %v978_v13, 2 }
 0x453   :  { %v974_v22 = vpop.xlane.xlu2 %973 }
 0x454   :  { %v980_v23 = vadd.f32 %v979_v17, %v978_v13  ;;  %v976_v24 = vmul.f32 %v974_v22, %v4650_v20  ;;  %v665_v22 = vld [vmem:[%s5266_s9] sm:$0xff]  ;;  %s5293_s9 = sld [smem:[#allocation54_spill]] }
 0x456   :  { %v981_v28 = vrot.slane %v980_v23, 1  ;;  %v983_v29 = vrot.slane %v976_v24, 4 }
 0x458   :  { %v982_v30 = vadd.f32 %v981_v28, %v980_v23  ;;  %v984_v31 = vadd.f32 %v983_v29, %v976_v24 }
 0x45a   :  { %v989_v32 = vmul.f32 %v982_v30, %v4656_v37  ;;  %v985_v33 = vrot.slane %v984_v31, 2 }
 0x45b   :  { %v1039_v61 = vpop.permute.xlu2 %1038 }
 0x45c   :  { %v991_v34 = vadd.f32 1e-05, %v989_v32  ;;  %v986_v35 = vadd.f32 %v985_v33, %v984_v31 }
 0x45e   :  { %3446 = vrsqrt.f32 %v991_v34  ;;  %v987_v36 = vrot.slane %v986_v35, 1  ;;  %vm999_vm12 = vweird.f32 %v991_v34 }
 0x460   :  { %v988_v38 = vadd.f32 %v987_v36, %v986_v35 }
 0x462   :  { %v990_v39 = vmul.f32 %v988_v38, %v4656_v37 }
 0x464   :  { %v3447_v40 = vpop.eup %3446  ;;  %v992_v41 = vadd.f32 1e-05, %v990_v39 }
 0x465   :  { %v994_v42 = vmul.f32 %v3447_v40, %v991_v34  ;;  %vm1000_vm11 = vweird.f32 %v3447_v40 }
 0x466   :  { %3448 = vrsqrt.f32 %v992_v41  ;;  %vm1001_vm13 = vmor %vm999_vm12, %vm1000_vm11  ;;  %vm1009_vm15 = vweird.f32 %v992_v41  ;;  %vm1607_vm11 = vcmask 523264  }
 0x467   :  { %v995_v43 = vmul.f32 %v3447_v40, %v994_v42 }
 0x469   :  { %v996_v44 = vmul.f32 0.5, %v995_v43  ;;  %v688_v43 = vld [vmem:[%s5268_s0 + $0x18] sm:$0xff] }
 0x46b   :  { %v997_v45 = vsub.f32 1.5, %v996_v44  ;;  %v687_v44 = vld [vmem:[%s5268_s0 + $0x10] sm:$0xff] }
 0x46c   :  { %v3449_v46 = vpop.eup %3448 }
 0x46d   :  { %v998_v47 = vmul.f32 %v3447_v40, %v997_v45  ;;  %v1004_v48 = vmul.f32 %v3449_v46, %v992_v41  ;;  %vm1010_vm14 = vweird.f32 %v3449_v46  ;;  %v686_v45 = vld [vmem:[%s5268_s0 + $0x8] sm:$0xff] }
 0x46e   :  { %vm1011_vm0 = vmor %vm1009_vm15, %vm1010_vm14 }
 0x46f   :  { %v1002_v49 = vsel %vm1001_vm13, %v3447_v40, %v998_v47  ;;  %v1005_v50 = vmul.f32 %v3449_v46, %v1004_v48 }
 0x470   :  { %v1013_v51 = vmul.f32 %v1002_v49, %v4677_v59 }
 0x471   :  { %v1006_v52 = vmul.f32 0.5, %v1005_v50 }
 0x472   :  { %v1027_v53 = vmul.f32 %v4689_v5, %v1013_v51 }
 0x473   :  { %v1007_v55 = vsub.f32 1.5, %v1006_v52 }
 0x474   :  { %v4711_v56 = vadd.f32 %v1035_v54, %v1027_v53  ;;  %v3394_v54 = vld [vmem:[%s5269_s24] ss:$0 sm:$0xff]  ;;  %s5296_s24 = sld [smem:[#allocation56_spill]] }
 0x475   :  { %v1008_v57 = vmul.f32 %v3449_v46, %v1007_v55 }
 0x476   :  { %3189 = vmatmul.msk.f32.vlgmr.msra.gmra.mxu1 %vm826_vm2, %v4711_v56  ;;  %3191 = vmatmul.msk.f32.vlgmr.msra.gmra.mxu2 %vm826_vm2, %v4711_v56 }
 0x477   :  { %v1012_v58 = vsel %vm1011_vm0, %v3449_v46, %v1008_v57  ;;  %3193 = vmatmul.msk.f32.vlgmr.msra.gmra.mxu3 %vm826_vm2, %v4711_v56  ;;  %v685_v46 = vld [vmem:[%s5268_s0] sm:$0xff]  ;;  %s5295_s0 = sld [smem:[#allocation108_spill]] }
 0x478   :  { %v1014_v59 = vmul.f32 %v1012_v58, %v4683_v1  ;;  %v3391_v1 = vld [vmem:[%s5264_s2] ss:$0 sm:$0xff]  ;;  %s5291_s2 = sld [smem:[#allocation89_spill]] }
 0x47a   :  { %v1028_v60 = vmul.f32 %v4691_v6, %v1014_v59  ;;  %v680_v6 = vld [vmem:[%s5265_s17 + $0x18] sm:$0xff]  ;;  %s5292_s17 = sld [smem:[#allocation90_spill]] }
 0x47c   :  { %v4721_v62 = vadd.f32 %v1039_v61, %v1028_v60  ;;  %v670_v61 = vld [vmem:[%s5270_s6 + $0x8] sm:$0xff] }
 0x47e   :  { %3190 = vmatmul.msk.f32.gmra.mxu1 %vm826_vm2, %v4721_v62  ;;  %3192 = vmatmul.msk.f32.gmra.mxu2 %vm826_vm2, %v4721_v62 }
 0x47f   :  { %3194 = vmatmul.msk.f32.gmra.mxu3 %vm826_vm2, %v4721_v62 }
 0x4f3   :  { %v1069_v2 = vpop.f32.mrf.mxu1 }
 0x4f4   :  { %v1070_v8 = vadd.f32 %v3391_v1, %v1069_v2 }
 0x4f9   :  { %v1095_v3 = vpop.f32.mrf.mxu2 }
 0x4fa   :  { %v1096_v4 = vadd.f32 %v3392_v63, %v1095_v3  ;;  %v1121_v5 = vpop.f32.mrf.mxu3 }
 0x4fb   :  { %v1122_v7 = vadd.f32 %v3393_v0, %v1121_v5  ;;  %v1072_v13 = vpop.f32.mrf.mxu1  ;;  %v3396_v5 = vld [vmem:[%s5271_s7] ss:$0 sm:$0xff]  ;;  %s5298_s7 = sld [smem:[#allocation112_spill]] }
 0x4fc   :  { %3195 = vmatpush.xpose.msk.msrb.mxu0 %vm1127_vm3, %v1096_v4  ;;  %v1073_v18 = vadd.f32 %v3391_v1, %v1072_v13 }
 0x4fd   :  { %1223 = vmatpush.msrb.mxu2 %v1122_v7 }
 0x4ff   :  { %3196 = vmatmul.msk.f32.vlgmr.msrb.gmra.mxu0 %vm1127_vm3, %v1070_v8  ;;  %1318 = vmatpush.msra.mxu2 %v688_v43 }
 0x500   :  { %1266 = vmatpush.msra.mxu0 %v680_v6 }
 0x501   :  { %v1098_v11 = vpop.f32.mrf.mxu2  ;;  %1319 = vmatpush.msra.mxu2 %v687_v44 }
 0x502   :  { %1267 = vmatpush.msra.mxu0 %v679_v9  ;;  %v1099_v14 = vadd.f32 %v3392_v63, %v1098_v11  ;;  %v1124_v15 = vpop.f32.mrf.mxu3  ;;  %v669_v63 = vld [vmem:[%s5270_s6] sm:$0xff]  ;;  %s5297_s6 = sld [smem:[#allocation113_spill]] }
 0x503   :  { %v1125_v17 = vadd.f32 %v3393_v0, %v1124_v15  ;;  %1320 = vmatpush.msra.mxu2 %v686_v45 }
 0x504   :  { %1268 = vmatpush.msra.mxu0 %v678_v10  ;;  %3197 = vmatpush.xpose.msk.msrb.mxu1 %vm1127_vm3, %v1099_v14 }
 0x505   :  { %1246 = vmatpush.msrb.mxu3 %v1125_v17  ;;  %1321 = vmatpush.msra.mxu2 %v685_v46 }
 0x506   :  { %1269 = vmatpush.msra.mxu0 %v677_v12 }
 0x507   :  { %3198 = vmatmul.msk.f32.vlgmr.msrb.gmra.mxu1 %vm1127_vm3, %v1073_v18  ;;  %3201 = vmatmul.msk.f32.vlgmr.msra.gmra.mxu0 %vm826_vm2, %v4711_v56 }
 0x508   :  { %1292 = vmatpush.msra.mxu1 %v668_v16 }
 0x50a   :  { %1293 = vmatpush.msra.mxu1 %v667_v19 }
 0x50c   :  { %1294 = vmatpush.msra.mxu1 %v666_v21 }
 0x50e   :  { %1295 = vmatpush.msra.mxu1 %v665_v22 }
 0x50f   :  { %3202 = vmatmul.msk.f32.gmra.mxu0 %vm826_vm2, %v4721_v62  ;;  %3203 = vmatmul.msk.f32.vlgmr.msra.gmra.mxu1 %vm826_vm2, %v4711_v56 }
 0x517   :  { %3204 = vmatmul.msk.f32.gmra.mxu1 %vm826_vm2, %v4721_v62 }
 0x57c   :  { %v1151_v26 = vpop.f32.mrf.mxu0 }
 0x57d   :  { %v1180_v28 = vmul.f32 0.25, %v1151_v26 }
 0x57f   :  { %v1183_v31 = vsel %vm1182_vm4, %v1180_v28, -inf }
 0x584   :  { %v1177_v23 = vpop.f32.mrf.mxu1  ;;  %v1271_v53 = vpop.f32.mrf.mxu0 }
 0x585   :  { %v1181_v24 = vmul.f32 0.25, %v1177_v23  ;;  %v1272_v57 = vadd.f32 %v3394_v54, %v1271_v53 }
 0x587   :  { %v1186_v25 = vsel %vm1182_vm4, %v1181_v24, -inf }
 0x588   :  { %1187 = vmax.xlane.f32.xlu0 %v1186_v25 }
 0x58c   :  { %v1297_v29 = vpop.f32.mrf.mxu1  ;;  %v1274_v59 = vpop.f32.mrf.mxu0 }
 0x58d   :  { %v1298_v30 = vadd.f32 %v3395_v27, %v1297_v29  ;;  %v1275_v60 = vadd.f32 %v3394_v54, %v1274_v59  ;;  %v644_v59 = vld [vmem:[%s5274_s1 + $0x8] sm:$0xff] }
 0x58f   :  { %3207 = vmatpush.xpose.msk.msra.mxu3 %vm1127_vm3, %v1298_v30 }
 0x590   :  { %1184 = vmax.xlane.f32.xlu0 %v1183_v31  ;;  %v671_v31 = vld [vmem:[%s5272_s13] sm:$0xff] }
 0x594   :  { %v1300_v48 = vpop.f32.mrf.mxu1 }
 0x595   :  { %v1301_v52 = vadd.f32 %v3395_v27, %v1300_v48 }
 0x5fb   :  { %v1188_v32 = vpop.xlane.xlu0 %1187 }
 0x5fc   :  { %v1190_v33 = vsub.f32 %v1181_v24, %v1188_v32  ;;  %v672_v24 = vld [vmem:[%s5272_s13 + $0x8] sm:$0xff]  ;;  %s5299_s13 = sld [smem:[#allocation109_spill]] }
 0x5fe   :  { %v1193_v34 = vmul.f32 1.442695, %v1190_v33 }
 0x600   :  { %3450 = vpow2.f32 %v1193_v34 }
 0x603   :  { %v1185_v35 = vpop.xlane.xlu0 %1184 }
 0x604   :  { %v1189_v36 = vsub.f32 %v1180_v28, %v1185_v35  ;;  %v3397_v35 = vld [vmem:[%s5273_s19] ss:$0 sm:$0xff]  ;;  %s5300_s19 = sld [smem:[#allocation115_spill]] }
 0x606   :  { %v3451_v38 = vpop.eup %3450  ;;  %v1191_v39 = vmul.f32 1.442695, %v1189_v36 }
 0x607   :  { %v1198_v40 = vsel %vm1182_vm4, %v3451_v38, 0.0 }
 0x608   :  { %3452 = vpow2.f32 %v1191_v39  ;;  %1199 = vadd.xlane.f32.xlu2 %v1198_v40 }
 0x60e   :  { %v3453_v41 = vpop.eup %3452 }
 0x60f   :  { %v1195_v42 = vsel %vm1182_vm4, %v3453_v41, 0.0 }
 0x610   :  { %1196 = vadd.xlane.f32.xlu1 %v1195_v42 }
 0x67b   :  { %v1200_v47 = vpop.xlane.xlu2 %1199 }
 0x67c   :  { %3454 = vrcp.f32 %v1200_v47 }
 0x682   :  { %v3455_v49 = vpop.eup %3454 }
 0x683   :  { %v1197_v50 = vpop.xlane.xlu1 %1196  ;;  %v1204_v51 = vmul.f32 %v3455_v49, %v3451_v38 }
 0x684   :  { %3456 = vrcp.f32 %v1197_v50 }
 0x685   :  { %3200 = vmatmul.msk.f32.vlgmr.msrb.gmra.mxu3 %vm1182_vm4, %v1204_v51 }
 0x686   :  { %3209 = vmatpush.xpose.msk.msrb.mxu3 %vm1127_vm3, %v1301_v52 }
 0x68a   :  { %v3457_v55 = vpop.eup %3456 }
 0x68b   :  { %v1203_v58 = vmul.f32 %v3457_v55, %v3453_v41 }
 0x68d   :  { %3199 = vmatmul.msk.f32.vlgmr.msrb.gmra.mxu2 %vm1182_vm4, %v1203_v58  ;;  %3208 = vmatmul.msk.f32.vlgmr.msra.gmra.mxu3 %vm1127_vm3, %v1272_v57  ;;  %v646_v57 = vld [vmem:[%s5274_s1 + $0x18] sm:$0xff]  ;;  %v645_v58 = vld [vmem:[%s5274_s1 + $0x10] sm:$0xff] }
 0x68e   :  { %1500 = vmatpush.msra.mxu3 %v670_v61  ;;  %1471 = vmatpush.msrb.mxu2 %v672_v24 }
 0x690   :  { %1501 = vmatpush.msra.mxu3 %v669_v63  ;;  %1472 = vmatpush.msrb.mxu2 %v671_v31 }
 0x695   :  { %3205 = vmatmul.msk.f32.vlgmr.msra.gmra.mxu2 %vm826_vm2, %v4711_v56  ;;  %3210 = vmatmul.msk.f32.vlgmr.msrb.gmra.mxu3 %vm1127_vm3, %v1275_v60  ;;  %v643_v60 = vld [vmem:[%s5274_s1] sm:$0xff]  ;;  %s5301_s1 = sld [smem:[#allocation114_spill]] }
 0x69d   :  { %3206 = vmatmul.msk.f32.gmra.mxu2 %vm826_vm2, %v4721_v62 }
 0x708   :  { %v1248_v0 = vpop.f32.mrf.mxu3 }
 0x710   :  { %v1225_v2 = vpop.f32.mrf.mxu2  ;;  %v1352_v1 = vpop.f32.mrf.mxu3 }
 0x711   :  { %v1381_v3 = vmul.f32 0.25, %v1352_v1  ;;  %3215 = vmatmul.msk.f32.vlgmr.msra.gmra.mxu3 %vm1127_vm3, %v1225_v2  ;;  %v655_v2 = vld [vmem:[%s5275_s16 + $0x38] sm:$0xff]  ;;  %v654_v1 = vld [vmem:[%s5275_s16 + $0x30] sm:$0xff] }
 0x713   :  { %v1383_v4 = vsel %vm1182_vm4, %v1381_v3, -inf }
 0x714   :  { %1384 = vmax.xlane.f32.xlu0 %v1383_v4 }
 0x718   :  { %v1323_v6 = vpop.f32.mrf.mxu2  ;;  %v1378_v7 = vpop.f32.mrf.mxu3 }
 0x719   :  { %v1324_v8 = vadd.f32 %v3396_v5, %v1323_v6  ;;  %v1382_v9 = vmul.f32 0.25, %v1378_v7  ;;  %3216 = vmatmul.msk.f32.gmra.mxu3 %vm1127_vm3, %v1248_v0  ;;  %v652_v6 = vld [vmem:[%s5275_s16 + $0x20] sm:$0xff] }
 0x71b   :  { %1423 = vmatpush.msrb.mxu0 %v1324_v8  ;;  %v1386_v10 = vsel %vm1182_vm4, %v1382_v9, -inf }
 0x71c   :  { %1387 = vmax.xlane.f32.xlu0 %v1386_v10 }
 0x71d   :  { %1591 = vmatpush.msra.mxu0 %v646_v57 }
 0x71f   :  { %1592 = vmatpush.msra.mxu0 %v645_v58 }
 0x720   :  { %v1326_v11 = vpop.f32.mrf.mxu2 }
 0x721   :  { %v1327_v12 = vadd.f32 %v3396_v5, %v1326_v11  ;;  %1593 = vmatpush.msra.mxu0 %v644_v59 }
 0x723   :  { %1446 = vmatpush.msrb.mxu1 %v1327_v12  ;;  %1594 = vmatpush.msra.mxu0 %v643_v60 }
 0x725   :  { %1622 = vmatpush.msra.mxu1 %v655_v2  ;;  %v728_v2 = vld [vmem:[%s5280_s27 + $0x10] sm:$0xff] }
 0x727   :  { %1623 = vmatpush.msra.mxu1 %v654_v1  ;;  %v716_v1 = vld [vmem:[%s5281_s4 + $0x10] sm:$0xff] }
 0x787   :  { %v1385_v13 = vpop.xlane.xlu0 %1384 }
 0x788   :  { %v1389_v14 = vsub.f32 %v1381_v3, %v1385_v13  ;;  %v653_v3 = vld [vmem:[%s5275_s16 + $0x28] sm:$0xff] }
 0x789   :  { %1624 = vmatpush.msra.mxu1 %v653_v3  ;;  %v736_v3 = vld [vmem:[%s5282_s21 + $0x10] sm:$0xff] }
 0x78a   :  { %v1391_v15 = vmul.f32 1.442695, %v1389_v14 }
 0x78b   :  { %1625 = vmatpush.msra.mxu1 %v652_v6  ;;  %v735_v6 = vld [vmem:[%s5282_s21 + $0x8] sm:$0xff] }
 0x78c   :  { %3458 = vpow2.f32 %v1391_v15 }
 0x78f   :  { %v1388_v16 = vpop.xlane.xlu0 %1387 }
 0x790   :  { %v1390_v17 = vsub.f32 %v1382_v9, %v1388_v16  ;;  %v651_v9 = vld [vmem:[%s5275_s16 + $0x18] sm:$0xff] }
 0x791   :  { %1626 = vmatpush.msra.mxu1 %v651_v9  ;;  %v734_v9 = vld [vmem:[%s5282_s21] sm:$0xff] }
 0x792   :  { %v3459_v18 = vpop.eup %3458  ;;  %v1393_v19 = vmul.f32 1.442695, %v1390_v17  ;;  %v3398_v17 = vld [vmem:[%s5276_s20] ss:$0 sm:$0xff]  ;;  %s5303_s20 = sld [smem:[#allocation104_spill]] }
 0x793   :  { %v1395_v21 = vsel %vm1182_vm4, %v3459_v18, 0.0 }
 0x794   :  { %3460 = vpow2.f32 %v1393_v19  ;;  %1396 = vadd.xlane.f32.xlu0 %v1395_v21  ;;  %v1503_v34 = vpop.f32.mrf.mxu3 }
 0x79a   :  { %v3461_v22 = vpop.eup %3460 }
 0x79b   :  { %v1398_v23 = vsel %vm1182_vm4, %v3461_v22, 0.0 }
 0x79c   :  { %1399 = vadd.xlane.f32.xlu0 %v1398_v23  ;;  %v1506_v42 = vpop.f32.mrf.mxu3 }
 0x807   :  { %v1397_v25 = vpop.xlane.xlu0 %1396 }
 0x808   :  { %3462 = vrcp.f32 %v1397_v25 }
 0x80e   :  { %v3463_v26 = vpop.eup %3462 }
 0x80f   :  { %v1403_v27 = vmul.f32 %v3463_v26, %v3459_v18  ;;  %v1400_v28 = vpop.xlane.xlu0 %1399 }
 0x810   :  { %3464 = vrcp.f32 %v1400_v28 }
 0x811   :  { %3211 = vmatmul.msk.f32.vlgmr.msrb.gmra.mxu0 %vm1182_vm4, %v1403_v27 }
 0x816   :  { %v3465_v29 = vpop.eup %3464 }
 0x817   :  { %v1404_v30 = vmul.f32 %v3465_v29, %v3461_v22  ;;  %v3399_v22 = vld [vmem:[%s5277_s3] ss:$0 sm:$0xff]  ;;  %s5304_s3 = sld [smem:[#allocation61_spill]] }
 0x819   :  { %3212 = vmatmul.msk.f32.vlgmr.msrb.gmra.mxu1 %vm1182_vm4, %v1404_v30 }
 0x88e   :  { %v1425_v32 = vpop.f32.mrf.mxu0 }
 0x88f   :  { %3213 = vmatmul.msk.f32.vlgmr.msrb.gmra.mxu2 %vm1127_vm3, %v1425_v32  ;;  %v650_v32 = vld [vmem:[%s5275_s16 + $0x10] sm:$0xff] }
 0x890   :  { %1627 = vmatpush.msra.mxu1 %v650_v32 }
 0x896   :  { %v1448_v33 = vpop.f32.mrf.mxu1 }
 0x897   :  { %3214 = vmatmul.msk.f32.gmra.mxu2 %vm1127_vm3, %v1448_v33  ;;  %v649_v33 = vld [vmem:[%s5275_s16 + $0x8] sm:$0xff] }
 0x898   :  { %1628 = vmatpush.msra.mxu1 %v649_v33 }
 0x912   :  { %v1474_v36 = vpop.f32.mrf.mxu2 }
 0x913   :  { %v1504_v38 = vadd.f32 %v1503_v34, %v1474_v36  ;;  %v648_v34 = vld [vmem:[%s5275_s16] sm:$0xff]  ;;  %s5302_s16 = sld [smem:[#allocation55_spill]] }
 0x914   :  { %1629 = vmatpush.msra.mxu1 %v648_v34 }
 0x915   :  { %v1512_v39 = vadd.f32 %v3397_v35, %v1504_v38 }
 0x917   :  { %v1514_v40 = vadd.f32 %v1512_v39, %v4711_v56 }
 0x919   :  { %v1516_v41 = vsel %vm826_vm2, %v1514_v40, 0.0 }
 0x91a   :  { %1517 = vadd.xlane.f32.xlu0 %v1516_v41  ;;  %v1477_v43 = vpop.f32.mrf.mxu2 }
 0x91b   :  { %v1507_v44 = vadd.f32 %v1506_v42, %v1477_v43  ;;  %v3401_v43 = vld [vmem:[%s5279_s18] ss:$0 sm:$0xff]  ;;  %s5306_s18 = sld [smem:[#allocation100_spill]] }
 0x91d   :  { %v1513_v45 = vadd.f32 %v3397_v35, %v1507_v44  ;;  %v3400_v35 = vld [vmem:[%s5278_s11] ss:$0 sm:$0xff]  ;;  %s5305_s11 = sld [smem:[#allocation111_spill]] }
 0x91f   :  { %v1515_v46 = vadd.f32 %v1513_v45, %v4721_v62 }
 0x921   :  { %v1519_v47 = vsel %vm826_vm2, %v1515_v46, 0.0 }
 0x922   :  { %1520 = vadd.xlane.f32.xlu2 %v1519_v47 }
 0x98d   :  { %v1518_v48 = vpop.xlane.xlu0 %1517 }
 0x98e   :  { %v1522_v49 = vmul.f32 %v1518_v48, %v4650_v20 }
 0x990   :  { %v1524_v50 = vsub.f32 %v1514_v40, %v1522_v49 }
 0x992   :  { %v1526_v56 = vmul.f32 %v1524_v50, %v1524_v50 }
 0x994   :  { %v1528_v51 = vsel %vm826_vm2, %v1526_v56, 0.0 }
 0x995   :  { %v1521_v52 = vpop.xlane.xlu2 %1520  ;;  %1529 = vadd.xlane.f32.xlu1 %v1528_v51 }
 0x996   :  { %v1523_v53 = vmul.f32 %v1521_v52, %v4650_v20 }
 0x998   :  { %v1525_v54 = vsub.f32 %v1515_v46, %v1523_v53 }
 0x99a   :  { %v1527_v62 = vmul.f32 %v1525_v54, %v1525_v54 }
 0x99c   :  { %v1531_v55 = vsel %vm826_vm2, %v1527_v62, 0.0 }
 0x99d   :  { %1532 = vadd.xlane.f32.xlu0 %v1531_v55 }
 0xa08   :  { %v1530_v61 = vpop.xlane.xlu1 %1529 }
 0xa09   :  { %v1534_v63 = vmul.f32 %v1530_v61, %v4650_v20  ;;  %v729_v61 = vld [vmem:[%s5280_s27 + $0x18] sm:$0xff] }
 0xa0a   :  { %1714 = vmatpush.msra.mxu2 %v729_v61  ;;  %v718_v61 = vld [vmem:[%s5287_s30] sm:$0xff] }
 0xa0b   :  { %v1536_v0 = vadd.f32 1e-05, %v1534_v63  ;;  %v717_v63 = vld [vmem:[%s5281_s4 + $0x18] sm:$0xff] }
 0xa0c   :  { %1740 = vmatpush.msrb.mxu3 %v717_v63  ;;  %1715 = vmatpush.msra.mxu2 %v728_v2 }
 0xa0d   :  { %3466 = vrsqrt.f32 %v1536_v0  ;;  %vm1544_vm6 = vweird.f32 %v1536_v0 }
 0xa0e   :  { %1741 = vmatpush.msrb.mxu3 %v716_v1 }
 0xa10   :  { %v1533_v4 = vpop.xlane.xlu0 %1532 }
 0xa11   :  { %v1535_v5 = vmul.f32 %v1533_v4, %v4650_v20  ;;  %v727_v4 = vld [vmem:[%s5280_s27 + $0x8] sm:$0xff] }
 0xa12   :  { %1716 = vmatpush.msra.mxu2 %v727_v4 }
 0xa13   :  { %v3467_v7 = vpop.eup %3466  ;;  %v1537_v8 = vadd.f32 1e-05, %v1535_v5  ;;  %v715_v5 = vld [vmem:[%s5281_s4 + $0x8] sm:$0xff] }
 0xa14   :  { %v1539_v10 = vmul.f32 %v3467_v7, %v1536_v0  ;;  %vm1545_vm5 = vweird.f32 %v3467_v7  ;;  %v737_v0 = vld [vmem:[%s5282_s21 + $0x18] sm:$0xff]  ;;  %1742 = vmatpush.msrb.mxu3 %v715_v5  ;;  %v3408_v5 = vld [vmem:[#allocation3] ss:$0 sm:$0xff]  ;;  %s5310_s21 = sld [smem:[#allocation101_spill]] }
 0xa15   :  { %3468 = vrsqrt.f32 %v1537_v8  ;;  %vm1546_vm7 = vmor %vm1544_vm6, %vm1545_vm5  ;;  %vm1554_vm9 = vweird.f32 %v1537_v8  ;;  %1766 = vmatpush.msrb.mxu0 %v737_v0 }
 0xa16   :  { %v1540_v11 = vmul.f32 %v3467_v7, %v1539_v10 }
 0xa17   :  { %1767 = vmatpush.msrb.mxu0 %v736_v3 }
 0xa18   :  { %v1541_v12 = vmul.f32 0.5, %v1540_v11 }
 0xa19   :  { %1768 = vmatpush.msrb.mxu0 %v735_v6 }
 0xa1a   :  { %v1542_v13 = vsub.f32 1.5, %v1541_v12 }
 0xa1b   :  { %v3469_v14 = vpop.eup %3468  ;;  %1769 = vmatpush.msrb.mxu0 %v734_v9 }
 0xa1c   :  { %v1543_v15 = vmul.f32 %v3467_v7, %v1542_v13  ;;  %v1549_v16 = vmul.f32 %v3469_v14, %v1537_v8  ;;  %vm1555_vm8 = vweird.f32 %v3469_v14  ;;  %v714_v8 = vld [vmem:[%s5281_s4] sm:$0xff]  ;;  %s5308_s4 = sld [smem:[#allocation58_spill]] }
 0xa1d   :  { %vm1556_vm10 = vmor %vm1554_vm9, %vm1555_vm8  ;;  %1743 = vmatpush.msrb.mxu3 %v714_v8 }
 0xa1e   :  { %v1547_v18 = vsel %vm1546_vm7, %v3467_v7, %v1543_v15  ;;  %v1550_v19 = vmul.f32 %v3469_v14, %v1549_v16  ;;  %v726_v7 = vld [vmem:[%s5280_s27] sm:$0xff]  ;;  %s5307_s27 = sld [smem:[#allocation62_spill]] }
 0xa1f   :  { %v1558_v21 = vmul.f32 %v1547_v18, %v1524_v50  ;;  %1717 = vmatpush.msra.mxu2 %v726_v7 }
 0xa20   :  { %v1551_v23 = vmul.f32 0.5, %v1550_v19 }
 0xa21   :  { %v1563_v24 = vmul.f32 %v3398_v17, %v1558_v21 }
 0xa22   :  { %v1552_v25 = vsub.f32 1.5, %v1551_v23 }
 0xa23   :  { %v1568_v26 = vadd.f32 %v3399_v22, %v1563_v24 }
 0xa24   :  { %v1553_v27 = vmul.f32 %v3469_v14, %v1552_v25  ;;  %v3402_v25 = vld [vmem:[%s5283_s23] ss:$0 sm:$0xff]  ;;  %s5311_s23 = sld [smem:[#allocation57_spill]] }
 0xa25   :  { %3217 = vmatmul.msk.f32.vlgmr.msra.gmra.mxu0 %vm826_vm2, %v1568_v26 }
 0xa26   :  { %v1557_v28 = vsel %vm1556_vm10, %v3469_v14, %v1553_v27 }
 0xa27   :  { %v1559_v29 = vmul.f32 %v1557_v28, %v1525_v54  ;;  %v3403_v28 = vld [vmem:[%s5284_s25] ss:$0 sm:$0xff]  ;;  %s5312_s25 = sld [smem:[#allocation106_spill]] }
 0xa29   :  { %v1564_v30 = vmul.f32 %v3398_v17, %v1559_v29 }
 0xa2b   :  { %v1569_v31 = vadd.f32 %v3399_v22, %v1564_v30 }
 0xa2d   :  { %3218 = vmatmul.msk.f32.gmra.mxu0 %vm826_vm2, %v1569_v31 }
 0xaa2   :  { %v1596_v36 = vpop.f32.mrf.mxu0 }
 0xaa3   :  { %v1597_v38 = vadd.f32 %v3400_v35, %v1596_v36 }
 0xaa5   :  { %v1602_v39 = vmax.f32 %v1597_v38, 0.0 }
 0xaa7   :  { %3219 = vmatmul.msk.f32.vlgmr.msra.gmra.mxu1 %vm1607_vm11, %v1602_v39 }
 0xaaa   :  { %v1599_v40 = vpop.f32.mrf.mxu0 }
 0xaab   :  { %v1600_v41 = vadd.f32 %v3400_v35, %v1599_v40  ;;  %v3404_v40 = vld [vmem:[#allocation9] ss:$0 sm:$0xff] }
 0xaad   :  { %v1603_v42 = vmax.f32 %v1600_v41, 0.0 }
 0xaaf   :  { %3220 = vmatmul.msk.f32.gmra.mxu1 %vm1607_vm11, %v1603_v42 }
 0xb24   :  { %v1631_v44 = vpop.f32.mrf.mxu1 }
 0xb25   :  { %v1632_v45 = vadd.f32 %v3401_v43, %v1631_v44  ;;  %v3405_v44 = vld [vmem:[#allocation6] ss:$0 sm:$0xff] }
 0xb27   :  { %v1637_v46 = vadd.f32 %v1632_v45, %v1568_v26 }
 0xb29   :  { %v1639_v47 = vsel %vm826_vm2, %v1637_v46, 0.0 }
 0xb2a   :  { %1640 = vadd.xlane.f32.xlu2 %v1639_v47 }
 0xb2c   :  { %v1634_v48 = vpop.f32.mrf.mxu1 }
 0xb2d   :  { %v1635_v49 = vadd.f32 %v3401_v43, %v1634_v48  ;;  %v3406_v43 = vld [vmem:[%s5285_s12] ss:$0 sm:$0xff]  ;;  %v733_v48 = vld [vmem:[%s5286_s29 + $0x18] sm:$0xff]  ;;  %s5313_s12 = sld [smem:[#allocation63_spill]] }
 0xb2f   :  { %v1638_v50 = vadd.f32 %v1635_v49, %v1569_v31 }
 0xb31   :  { %v1642_v56 = vsel %vm826_vm2, %v1638_v50, 0.0 }
 0xb32   :  { %1643 = vadd.xlane.f32.xlu1 %v1642_v56 }
 0xb9d   :  { %v1641_v51 = vpop.xlane.xlu2 %1640 }
 0xb9e   :  { %v1645_v52 = vmul.f32 %v1641_v51, %v4650_v20  ;;  %v732_v51 = vld [vmem:[%s5286_s29 + $0x10] sm:$0xff] }
 0xba0   :  { %v1647_v53 = vsub.f32 %v1637_v46, %v1645_v52  ;;  %v731_v52 = vld [vmem:[%s5286_s29 + $0x8] sm:$0xff] }
 0xba2   :  { %v1649_v54 = vmul.f32 %v1647_v53, %v1647_v53 }
 0xba4   :  { %v1651_v62 = vsel %vm826_vm2, %v1649_v54, 0.0  ;;  %v730_v54 = vld [vmem:[%s5286_s29] sm:$0xff]  ;;  %s5314_s29 = sld [smem:[#allocation64_spill]] }
 0xba5   :  { %1652 = vadd.xlane.f32.xlu0 %v1651_v62  ;;  %v1644_v55 = vpop.xlane.xlu1 %1643 }
 0xba6   :  { %v1646_v57 = vmul.f32 %v1644_v55, %v4650_v20 }
 0xba8   :  { %v4823_v58 = vsub.f32 %v1638_v50, %v1646_v57  ;;  %v721_v57 = vld [vmem:[%s5287_s30 + $0x18] sm:$0xff] }
 0xbaa   :  { %v1650_v59 = vmul.f32 %v4823_v58, %v4823_v58 }
 0xbac   :  { %v1654_v60 = vsel %vm826_vm2, %v1650_v59, 0.0  ;;  %v720_v59 = vld [vmem:[%s5287_s30 + $0x10] sm:$0xff] }
 0xbad   :  { %1655 = vadd.xlane.f32.xlu2 %v1654_v60  ;;  %v719_v60 = vld [vmem:[%s5287_s30 + $0x8] sm:$0xff]  ;;  %s5315_s30 = sld [smem:[#allocation60_spill]] }
 0xc18   :  { %v1653_v10 = vpop.xlane.xlu0 %1652 }
 0xc19   :  { %v1657_v11 = vmul.f32 %v1653_v10, %v4650_v20 }
 0xc1b   :  { %v1659_v12 = vadd.f32 1e-05, %v1657_v11 }
 0xc1d   :  { %3470 = vrsqrt.f32 %v1659_v12  ;;  %vm1667_vm13 = vweird.f32 %v1659_v12 }
 0xc20   :  { %v1656_v13 = vpop.xlane.xlu2 %1655 }
 0xc21   :  { %v1658_v14 = vmul.f32 %v1656_v13, %v4650_v20 }
 0xc23   :  { %v3471_v15 = vpop.eup %3470  ;;  %v1660_v16 = vadd.f32 1e-05, %v1658_v14 }
 0xc24   :  { %v1662_v17 = vmul.f32 %v3471_v15, %v1659_v12  ;;  %vm1668_vm12 = vweird.f32 %v3471_v15 }
 0xc25   :  { %3472 = vrsqrt.f32 %v1660_v16  ;;  %vm1669_vm14 = vmor %vm1667_vm13, %vm1668_vm12  ;;  %vm1677_vm0 = vweird.f32 %v1660_v16 }
 0xc26   :  { %v1663_v18 = vmul.f32 %v3471_v15, %v1662_v17 }
 0xc28   :  { %v1664_v19 = vmul.f32 0.5, %v1663_v18  ;;  %v741_v18 = vld [vmem:[%s5288_s14 + $0x18] sm:$0xff] }
 0xc2a   :  { %v1665_v21 = vsub.f32 1.5, %v1664_v19  ;;  %v740_v19 = vld [vmem:[%s5288_s14 + $0x10] sm:$0xff] }
 0xc2b   :  { %v3473_v22 = vpop.eup %3472 }
 0xc2c   :  { %v1666_v23 = vmul.f32 %v3471_v15, %v1665_v21  ;;  %v1672_v24 = vmul.f32 %v3473_v22, %v1660_v16  ;;  %vm1678_vm15 = vweird.f32 %v3473_v22  ;;  %v739_v21 = vld [vmem:[%s5288_s14 + $0x8] sm:$0xff] }
 0xc2d   :  { %vm1679_vm5 = vmor %vm1677_vm0, %vm1678_vm15 }
 0xc2e   :  { %v1670_v26 = vsel %vm1669_vm14, %v3471_v15, %v1666_v23  ;;  %v1673_v27 = vmul.f32 %v3473_v22, %v1672_v24 }
 0xc2f   :  { %v1681_v29 = vmul.f32 %v1670_v26, %v1647_v53 }
 0xc30   :  { %v1674_v30 = vmul.f32 0.5, %v1673_v27 }
 0xc31   :  { %v1686_v31 = vmul.f32 %v3402_v25, %v1681_v29 }
 0xc32   :  { %v1675_v32 = vsub.f32 1.5, %v1674_v30 }
 0xc33   :  { %v4844_v33 = vadd.f32 %v3403_v28, %v1686_v31 }
 0xc34   :  { %v1676_v34 = vmul.f32 %v3473_v22, %v1675_v32  ;;  %v3407_v32 = vld [vmem:[#allocation8] ss:$0 sm:$0xff] }
 0xc35   :  { %3221 = vmatmul.msk.f32.vlgmr.msra.gmra.mxu2 %vm826_vm2, %v4844_v33  ;;  %3223 = vmatmul.msk.f32.vlgmr.msrb.gmra.mxu3 %vm826_vm2, %v4844_v33 }
 0xc36   :  { %v1680_v35 = vsel %vm1679_vm5, %v3473_v22, %v1676_v34  ;;  %3225 = vmatmul.msk.f32.vlgmr.msrb.gmra.mxu0 %vm826_vm2, %v4844_v33  ;;  %v738_v22 = vld [vmem:[%s5288_s14] sm:$0xff]  ;;  %s5316_s14 = sld [smem:[#allocation105_spill]] }
 0xc37   :  { %v1682_v36 = vmul.f32 %v1680_v35, %v4823_v58  ;;  %v723_v35 = vld [vmem:[%s5289_s26 + $0x8] sm:$0xff] }
 0xc39   :  { %v1687_v38 = vmul.f32 %v3402_v25, %v1682_v36 }
 0xc3b   :  { %v4853_v39 = vadd.f32 %v3403_v28, %v1687_v38 }
 0xc3d   :  { %3222 = vmatmul.msk.f32.gmra.mxu2 %vm826_vm2, %v4853_v39  ;;  %3224 = vmatmul.msk.f32.gmra.mxu3 %vm826_vm2, %v4853_v39 }
 0xc3e   :  { %3226 = vmatmul.msk.f32.gmra.mxu0 %vm826_vm2, %v4853_v39 }
 0xcb3   :  { %v1771_v41 = vpop.f32.mrf.mxu0 }
 0xcb4   :  { %v1772_v42 = vadd.f32 %v3404_v40, %v1771_v41 }
 0xcb6   :  { %1871 = vmatpush.msra.mxu3 %v1772_v42  ;;  %v3409_v42 = vld [vmem:[#allocation11] ss:$0 sm:$0xff] }
 0xcb8   :  { %v1719_v45 = vpop.f32.mrf.mxu2  ;;  %v1745_v46 = vpop.f32.mrf.mxu3  ;;  %1966 = vmatpush.msrb.mxu3 %v741_v18 }
 0xcb9   :  { %v1746_v47 = vadd.f32 %v3406_v43, %v1745_v46  ;;  %v1720_v50 = vadd.f32 %v3405_v44, %v1719_v45 }
 0xcba   :  { %1967 = vmatpush.msrb.mxu3 %v740_v19 }
 0xcbb   :  { %v1774_v49 = vpop.f32.mrf.mxu0  ;;  %3227 = vmatpush.xpose.msk.msrb.mxu1 %vm1127_vm3, %v1746_v47 }
 0xcbc   :  { %v1775_v56 = vadd.f32 %v3404_v40, %v1774_v49  ;;  %1968 = vmatpush.msrb.mxu3 %v739_v21  ;;  %v722_v40 = vld [vmem:[%s5289_s26] sm:$0xff]  ;;  %s5317_s26 = sld [smem:[#allocation102_spill]] }
 0xcbe   :  { %1894 = vmatpush.msra.mxu0 %v1775_v56  ;;  %3228 = vmatmul.msk.f32.vlgmr.msrb.gmra.mxu1 %vm1127_vm3, %v1720_v50 }
 0xcbf   :  { %1914 = vmatpush.msra.mxu1 %v733_v48  ;;  %1969 = vmatpush.msrb.mxu3 %v738_v22 }
 0xcc0   :  { %v1748_v53 = vpop.f32.mrf.mxu3  ;;  %v1722_v62 = vpop.f32.mrf.mxu2 }
 0xcc1   :  { %1915 = vmatpush.msra.mxu1 %v732_v51  ;;  %v1749_v55 = vadd.f32 %v3406_v43, %v1748_v53  ;;  %v1723_v58 = vadd.f32 %v3405_v44, %v1722_v62 }
 0xcc3   :  { %1916 = vmatpush.msra.mxu1 %v731_v52  ;;  %3229 = vmatpush.xpose.msk.msrb.mxu2 %vm1127_vm3, %v1749_v55 }
 0xcc5   :  { %1917 = vmatpush.msra.mxu1 %v730_v54 }
 0xcc6   :  { %3230 = vmatmul.msk.f32.vlgmr.msrb.gmra.mxu2 %vm1127_vm3, %v1723_v58  ;;  %3233 = vmatmul.msk.f32.vlgmr.msra.gmra.mxu1 %vm826_vm2, %v4844_v33 }
 0xcc7   :  { %1940 = vmatpush.msra.mxu2 %v721_v57 }
 0xcc9   :  { %1941 = vmatpush.msra.mxu2 %v720_v59 }
 0xccb   :  { %1942 = vmatpush.msra.mxu2 %v719_v60 }
 0xccd   :  { %1943 = vmatpush.msra.mxu2 %v718_v61 }
 0xcce   :  { %3234 = vmatmul.msk.f32.gmra.mxu1 %vm826_vm2, %v4853_v39  ;;  %3235 = vmatmul.msk.f32.vlgmr.msra.gmra.mxu2 %vm826_vm2, %v4844_v33 }
 0xcd6   :  { %3236 = vmatmul.msk.f32.gmra.mxu2 %vm826_vm2, %v4853_v39 }
 0xd3b   :  { %v1800_v63 = vpop.f32.mrf.mxu1 }
 0xd3c   :  { %v1829_v0 = vmul.f32 0.25, %v1800_v63 }
 0xd3e   :  { %v1831_v2 = vsel %vm1182_vm4, %v1829_v0, -inf }
 0xd3f   :  { %1832 = vmax.xlane.f32.xlu2 %v1831_v2 }
 0xd43   :  { %v1919_v31 = vpop.f32.mrf.mxu1 }
 0xd44   :  { %v1920_v34 = vadd.f32 %v3407_v32, %v1919_v31 }
 0xd49   :  { %v1826_v1 = vpop.f32.mrf.mxu2 }
 0xd4a   :  { %v1830_v3 = vmul.f32 0.25, %v1826_v1 }
 0xd4b   :  { %v1922_v36 = vpop.f32.mrf.mxu1 }
 0xd4c   :  { %v1834_v4 = vsel %vm1182_vm4, %v1830_v3, -inf  ;;  %v1923_v38 = vadd.f32 %v3407_v32, %v1922_v36 }
 0xd4d   :  { %1835 = vmax.xlane.f32.xlu1 %v1834_v4 }
 0xd51   :  { %v1945_v6 = vpop.f32.mrf.mxu2 }
 0xd52   :  { %v1946_v7 = vadd.f32 %v3408_v5, %v1945_v6 }
 0xd54   :  { %3239 = vmatpush.xpose.msk.msrb.mxu0 %vm1127_vm3, %v1946_v7 }
 0xd59   :  { %v1948_v27 = vpop.f32.mrf.mxu2 }
 0xd5a   :  { %v1949_v30 = vadd.f32 %v3408_v5, %v1948_v27 }
 0xdb2   :  { %v1833_v8 = vpop.xlane.xlu2 %1832 }
 0xdb3   :  { %v1837_v9 = vsub.f32 %v1829_v0, %v1833_v8  ;;  %v725_v0 = vld [vmem:[%s5290_s28 + $0x8] sm:$0xff] }
 0xdb5   :  { %v1839_v10 = vmul.f32 1.442695, %v1837_v9 }
 0xdb7   :  { %3474 = vpow2.f32 %v1839_v10 }
 0xdbd   :  { %v3475_v11 = vpop.eup %3474 }
 0xdbe   :  { %v1843_v12 = vsel %vm1182_vm4, %v3475_v11, 0.0 }
 0xdbf   :  { %1844 = vadd.xlane.f32.xlu1 %v1843_v12 }
 0xdc0   :  { %v1836_v13 = vpop.xlane.xlu1 %1835 }
 0xdc1   :  { %v1838_v14 = vsub.f32 %v1830_v3, %v1836_v13 }
 0xdc3   :  { %v1841_v15 = vmul.f32 1.442695, %v1838_v14  ;;  %v3410_v14 = vld [vmem:[#allocation21] ss:$0 sm:$0xff] }
 0xdc5   :  { %3476 = vpow2.f32 %v1841_v15 }
 0xdcb   :  { %v3477_v16 = vpop.eup %3476 }
 0xdcc   :  { %v1846_v17 = vsel %vm1182_vm4, %v3477_v16, 0.0 }
 0xdcd   :  { %1847 = vadd.xlane.f32.xlu0 %v1846_v17 }
 0xe32   :  { %v1845_v23 = vpop.xlane.xlu1 %1844 }
 0xe33   :  { %3478 = vrcp.f32 %v1845_v23 }
 0xe39   :  { %v3479_v24 = vpop.eup %3478 }
 0xe3a   :  { %v4891_v25 = vmul.f32 %v3479_v24, %v3475_v11  ;;  %v724_v11 = vld [vmem:[%s5290_s28] sm:$0xff]  ;;  %s5318_s28 = sld [smem:[#allocation59_spill]] }
 0xe3c   :  { %3231 = vmatmul.msk.f32.vlgmr.msra.gmra.mxu3 %vm1182_vm4, %v4891_v25 }
 0xe3d   :  { %2119 = vmatpush.msra.mxu3 %v725_v0 }
 0xe3f   :  { %2120 = vmatpush.msra.mxu3 %v724_v11 }
 0xe40   :  { %v1848_v26 = vpop.xlane.xlu0 %1847 }
 0xe41   :  { %3480 = vrcp.f32 %v1848_v26 }
 0xe44   :  { %3237 = vmatmul.msk.f32.vlgmr.msrb.gmra.mxu3 %vm826_vm2, %v4844_v33 }
 0xe47   :  { %v3481_v28 = vpop.eup %3480 }
 0xe48   :  { %v4897_v29 = vmul.f32 %v3481_v28, %v3477_v16 }
 0xe4a   :  { %3232 = vmatmul.msk.f32.vlgmr.msra.gmra.mxu0 %vm1182_vm4, %v4897_v29 }
 0xe4b   :  { %3241 = vmatpush.xpose.msk.msra.mxu0 %vm1127_vm3, %v1949_v30 }
 0xe4c   :  { %3238 = vmatmul.msk.f32.gmra.mxu3 %vm826_vm2, %v4853_v39 }
 0xe52   :  { %3240 = vmatmul.msk.f32.vlgmr.msrb.gmra.mxu0 %vm1127_vm3, %v1920_v34 }
 0xe53   :  { %2148 = vmatpush.msrb.mxu0 %v723_v35 }
 0xe55   :  { %2149 = vmatpush.msrb.mxu0 %v722_v40  ;;  %v698_v40 = vld [vmem:[%s5291_s2 + $0x10] sm:$0xff] }
 0xe5a   :  { %3242 = vmatmul.msk.f32.vlgmr.msra.gmra.mxu0 %vm1127_vm3, %v1923_v38  ;;  %v699_v38 = vld [vmem:[%s5291_s2 + $0x18] sm:$0xff] }
 0xebf   :  { %v1873_v41 = vpop.f32.mrf.mxu3 }
 0xec0   :  { %3247 = vmatmul.msk.f32.vlgmr.msrb.gmra.mxu0 %vm1127_vm3, %v1873_v41  ;;  %v697_v41 = vld [vmem:[%s5291_s2 + $0x8] sm:$0xff] }
 0xec7   :  { %v1896_v43 = vpop.f32.mrf.mxu0  ;;  %v1971_v44 = vpop.f32.mrf.mxu3 }
 0xec8   :  { %v1972_v45 = vadd.f32 %v3409_v42, %v1971_v44  ;;  %3248 = vmatmul.msk.f32.gmra.mxu0 %vm1127_vm3, %v1896_v43 }
 0xeca   :  { %2071 = vmatpush.msrb.mxu1 %v1972_v45 }
 0xecc   :  { %2241 = vmatpush.msra.mxu1 %v699_v38 }
 0xece   :  { %2242 = vmatpush.msra.mxu1 %v698_v40 }
 0xecf   :  { %v1974_v46 = vpop.f32.mrf.mxu3  ;;  %v2000_v47 = vpop.f32.mrf.mxu0 }
 0xed0   :  { %v1975_v48 = vadd.f32 %v3409_v42, %v1974_v46  ;;  %v2029_v49 = vmul.f32 0.25, %v2000_v47  ;;  %2243 = vmatpush.msra.mxu1 %v697_v41  ;;  %v696_v42 = vld [vmem:[%s5291_s2] sm:$0xff]  ;;  %v708_v47 = vld [vmem:[%s5292_s17 + $0x38] sm:$0xff]  ;;  %s4132_s2 = smov [#allocation32]  }
 0xed2   :  { %2094 = vmatpush.msrb.mxu2 %v1975_v48  ;;  %v2031_v50 = vsel %vm1182_vm4, %v2029_v49, -inf  ;;  %2244 = vmatpush.msra.mxu1 %v696_v42  ;;  %v707_v48 = vld [vmem:[%s5292_s17 + $0x30] sm:$0xff] }
 0xed3   :  { %2032 = vmax.xlane.f32.xlu0 %v2031_v50  ;;  %v706_v50 = vld [vmem:[%s5292_s17 + $0x28] sm:$0xff] }
 0xed4   :  { %2271 = vmatpush.msra.mxu2 %v708_v47 }
 0xed6   :  { %2272 = vmatpush.msra.mxu2 %v707_v48 }
 0xed7   :  { %v2026_v56 = vpop.f32.mrf.mxu0 }
 0xed8   :  { %v2030_v51 = vmul.f32 0.25, %v2026_v56  ;;  %2273 = vmatpush.msra.mxu2 %v706_v50 }
 0xeda   :  { %v2034_v52 = vsel %vm1182_vm4, %v2030_v51, -inf }
 0xedb   :  { %2035 = vmax.xlane.f32.xlu2 %v2034_v52 }
 0xf3d   :  { %v2151_v15 = vpop.f32.mrf.mxu0 }
 0xf45   :  { %v2154_v22 = vpop.f32.mrf.mxu0 }
 0xf46   :  { %v2033_v53 = vpop.xlane.xlu0 %2032 }
 0xf47   :  { %v2037_v54 = vsub.f32 %v2029_v49, %v2033_v53  ;;  %v705_v53 = vld [vmem:[%s5292_s17 + $0x20] sm:$0xff] }
 0xf48   :  { %2274 = vmatpush.msra.mxu2 %v705_v53 }
 0xf49   :  { %v2039_v62 = vmul.f32 1.442695, %v2037_v54 }
 0xf4b   :  { %3482 = vpow2.f32 %v2039_v62 }
 0xf4e   :  { %v2036_v55 = vpop.xlane.xlu2 %2035 }
 0xf4f   :  { %v2038_v57 = vsub.f32 %v2030_v51, %v2036_v55  ;;  %v704_v55 = vld [vmem:[%s5292_s17 + $0x18] sm:$0xff] }
 0xf50   :  { %2275 = vmatpush.msra.mxu2 %v704_v55 }
 0xf51   :  { %v3483_v58 = vpop.eup %3482  ;;  %v2041_v59 = vmul.f32 1.442695, %v2038_v57 }
 0xf52   :  { %v2043_v60 = vsel %vm1182_vm4, %v3483_v58, 0.0 }
 0xf53   :  { %3484 = vpow2.f32 %v2041_v59  ;;  %2044 = vadd.xlane.f32.xlu1 %v2043_v60  ;;  %v3411_v59 = vld [vmem:[#allocation17] ss:$0 sm:$0xff] }
 0xf59   :  { %v3485_v61 = vpop.eup %3484 }
 0xf5a   :  { %v2046_v63 = vsel %vm1182_vm4, %v3485_v61, 0.0 }
 0xf5b   :  { %2047 = vadd.xlane.f32.xlu0 %v2046_v63  ;;  %v3412_v63 = vld [vmem:[#allocation15] ss:$0 sm:$0xff] }
 0xfc6   :  { %v2045_v2 = vpop.xlane.xlu1 %2044 }
 0xfc7   :  { %3486 = vrcp.f32 %v2045_v2 }
 0xfcd   :  { %v3487_v1 = vpop.eup %3486 }
 0xfce   :  { %v2051_v3 = vmul.f32 %v3487_v1, %v3483_v58  ;;  %v2048_v4 = vpop.xlane.xlu0 %2047 }
 0xfcf   :  { %3488 = vrcp.f32 %v2048_v4 }
 0xfd0   :  { %v2157_v5 = vadd.f32 %v2051_v3, %v4891_v25  ;;  %3243 = vmatmul.msk.f32.vlgmr.msrb.gmra.mxu1 %vm1182_vm4, %v2051_v3 }
 0xfd2   :  { %v2342_v6 = vmul.f32 0.5, %v2157_v5 }
 0xfd4   :  { %3043 = vst.msk [vmem:[#allocation33] sm:$0xff] %vm1182_vm4, %v2342_v6 }
 0xfd5   :  { %v3489_v7 = vpop.eup %3488 }
 0xfd6   :  { %v2052_v8 = vmul.f32 %v3489_v7, %v3485_v61 }
 0xfd8   :  { %v2158_v9 = vadd.f32 %v2052_v8, %v4897_v29  ;;  %3244 = vmatmul.msk.f32.vlgmr.msrb.gmra.mxu2 %vm1182_vm4, %v2052_v8 }
 0xfda   :  { %v2343_v10 = vmul.f32 0.5, %v2158_v9 }
 0xfdc   :  { %3044 = vst.msk [vmem:[#allocation33 + $0x8] sm:$0xff] %vm1182_vm4, %v2343_v10 }
0x104d   :  { %v2073_v12 = vpop.f32.mrf.mxu1 }
0x104e   :  { %3245 = vmatmul.msk.f32.vlgmr.msra.gmra.mxu3 %vm1127_vm3, %v2073_v12  ;;  %v703_v12 = vld [vmem:[%s5292_s17 + $0x10] sm:$0xff] }
0x104f   :  { %2276 = vmatpush.msra.mxu2 %v703_v12 }
0x105b   :  { %v2096_v13 = vpop.f32.mrf.mxu2 }
0x105c   :  { %3246 = vmatmul.msk.f32.gmra.mxu3 %vm1127_vm3, %v2096_v13  ;;  %v702_v13 = vld [vmem:[%s5292_s17 + $0x8] sm:$0xff] }
0x105d   :  { %2277 = vmatpush.msra.mxu2 %v702_v13 }
0x10d1   :  { %v2122_v16 = vpop.f32.mrf.mxu3 }
0x10d2   :  { %v2152_v17 = vadd.f32 %v2151_v15, %v2122_v16  ;;  %v3413_v15 = vld [vmem:[#allocation12] ss:$0 sm:$0xff] }
0x10d4   :  { %v2162_v18 = vadd.f32 %v3410_v14, %v2152_v17 }
0x10d6   :  { %v2164_v19 = vadd.f32 %v2162_v18, %v4844_v33 }
0x10d8   :  { %v2166_v21 = vsel %vm826_vm2, %v2164_v19, 0.0 }
0x10d9   :  { %2167 = vadd.xlane.f32.xlu2 %v2166_v21 }
0x10df   :  { %v2125_v23 = vpop.f32.mrf.mxu3 }
0x10e0   :  { %v2155_v24 = vadd.f32 %v2154_v22, %v2125_v23  ;;  %v3414_v23 = vld [vmem:[#allocation14] ss:$0 sm:$0xff] }
0x10e2   :  { %v2163_v25 = vadd.f32 %v3410_v14, %v2155_v24  ;;  %v701_v14 = vld [vmem:[%s5292_s17] sm:$0xff]  ;;  %s5120_s17 = sshll.u32 %s4132_s2, 4  ;;  %s3053_s17 = int_to_ptr.vmem [resolvable:$true] %s5120_s17 }
0x10e3   :  { %2278 = vmatpush.msra.mxu2 %v701_v14 }
0x10e4   :  { %v2165_v26 = vadd.f32 %v2163_v25, %v4853_v39 }
0x10e6   :  { %v2169_v27 = vsel %vm826_vm2, %v2165_v26, 0.0 }
0x10e7   :  { %2170 = vadd.xlane.f32.xlu1 %v2169_v27 }
0x114c   :  { %v2168_v28 = vpop.xlane.xlu2 %2167 }
0x114d   :  { %v2172_v29 = vmul.f32 %v2168_v28, %v4650_v20 }
0x114f   :  { %v2174_v30 = vsub.f32 %v2164_v19, %v2172_v29 }
0x1151   :  { %v2176_v33 = vmul.f32 %v2174_v30, %v2174_v30 }
0x1153   :  { %v2178_v31 = vsel %vm826_vm2, %v2176_v33, 0.0 }
0x1154   :  { %2179 = vadd.xlane.f32.xlu0 %v2178_v31 }
0x115a   :  { %v2171_v32 = vpop.xlane.xlu1 %2170 }
0x115b   :  { %v2173_v34 = vmul.f32 %v2171_v32, %v4650_v20 }
0x115d   :  { %v2175_v35 = vsub.f32 %v2165_v26, %v2173_v34 }
0x115f   :  { %v2177_v36 = vmul.f32 %v2175_v35, %v2175_v35 }
0x1161   :  { %v2181_v39 = vsel %vm826_vm2, %v2177_v36, 0.0 }
0x1162   :  { %2182 = vadd.xlane.f32.xlu2 %v2181_v39 }
0x11c7   :  { %v2180_v43 = vpop.xlane.xlu0 %2179 }
0x11c8   :  { %v2184_v44 = vmul.f32 %v2180_v43, %v4650_v20 }
0x11ca   :  { %v2186_v45 = vadd.f32 1e-05, %v2184_v44 }
0x11cc   :  { %3490 = vrsqrt.f32 %v2186_v45  ;;  %vm2194_vm4 = vweird.f32 %v2186_v45 }
0x11d2   :  { %v3491_v46 = vpop.eup %3490 }
0x11d3   :  { %v2189_v49 = vmul.f32 %v3491_v46, %v2186_v45  ;;  %vm2195_vm3 = vweird.f32 %v3491_v46 }
0x11d4   :  { %vm2196_vm6 = vmor %vm2194_vm4, %vm2195_vm3 }
0x11d5   :  { %v2190_v56 = vmul.f32 %v3491_v46, %v2189_v49  ;;  %v2183_v51 = vpop.xlane.xlu2 %2182 }
0x11d6   :  { %v2185_v52 = vmul.f32 %v2183_v51, %v4650_v20 }
0x11d7   :  { %v2191_v54 = vmul.f32 0.5, %v2190_v56 }
0x11d8   :  { %v2187_v62 = vadd.f32 1e-05, %v2185_v52 }
0x11d9   :  { %v2192_v57 = vsub.f32 1.5, %v2191_v54  ;;  %v3415_v54 = vld [vmem:[#allocation20] ss:$0 sm:$0xff] }
0x11da   :  { %3492 = vrsqrt.f32 %v2187_v62  ;;  %vm2204_vm8 = vweird.f32 %v2187_v62 }
0x11db   :  { %v2193_v58 = vmul.f32 %v3491_v46, %v2192_v57  ;;  %v3416_v57 = vld [vmem:[#allocation18] ss:$0 sm:$0xff] }
0x11dd   :  { %v2197_v60 = vsel %vm2196_vm6, %v3491_v46, %v2193_v58 }
0x11de   :  { %v2208_v61 = vmul.f32 %v2197_v60, %v2174_v30 }
0x11e0   :  { %v3493_v0 = vpop.eup %3492  ;;  %v2213_v2 = vmul.f32 %v3411_v59, %v2208_v61 }
0x11e1   :  { %v2199_v1 = vmul.f32 %v3493_v0, %v2187_v62  ;;  %vm2205_vm7 = vweird.f32 %v3493_v0 }
0x11e2   :  { %v2218_v3 = vadd.f32 %v3412_v63, %v2213_v2  ;;  %vm2206_vm9 = vmor %vm2204_vm8, %vm2205_vm7  ;;  %vm2745_vm8 = vcmask 1041409  }
0x11e3   :  { %v2200_v4 = vmul.f32 %v3493_v0, %v2199_v1 }
0x11e4   :  { %3249 = vmatmul.msk.f32.vlgmr.msra.gmra.mxu1 %vm826_vm2, %v2218_v3 }
0x11e5   :  { %v2201_v5 = vmul.f32 0.5, %v2200_v4 }
0x11e7   :  { %v2202_v6 = vsub.f32 1.5, %v2201_v5 }
0x11e9   :  { %v2203_v7 = vmul.f32 %v3493_v0, %v2202_v6 }
0x11eb   :  { %v2207_v8 = vsel %vm2206_vm9, %v3493_v0, %v2203_v7 }
0x11ec   :  { %v2209_v9 = vmul.f32 %v2207_v8, %v2175_v35 }
0x11ee   :  { %v2214_v10 = vmul.f32 %v3411_v59, %v2209_v9  ;;  %v3417_v9 = vld [vmem:[%s5293_s9] ss:$0 sm:$0xff] }
0x11f0   :  { %v2219_v11 = vadd.f32 %v3412_v63, %v2214_v10  ;;  %v3418_v10 = vld [vmem:[%s5294_s8 + $0x1] ss:$0 sm:$0xff] }
0x11f2   :  { %3250 = vmatmul.msk.f32.gmra.mxu1 %vm826_vm2, %v2219_v11 }
0x1261   :  { %v2246_v16 = vpop.f32.mrf.mxu1 }
0x1262   :  { %v2247_v17 = vadd.f32 %v3413_v15, %v2246_v16 }
0x1264   :  { %v2252_v18 = vmax.f32 %v2247_v17, 0.0 }
0x1266   :  { %3251 = vmatmul.msk.f32.vlgmr.msra.gmra.mxu2 %vm1607_vm11, %v2252_v18 }
0x126f   :  { %v2249_v19 = vpop.f32.mrf.mxu1 }
0x1270   :  { %v2250_v21 = vadd.f32 %v3413_v15, %v2249_v19 }
0x1272   :  { %v2253_v22 = vmax.f32 %v2250_v21, 0.0 }
0x1274   :  { %3252 = vmatmul.msk.f32.gmra.mxu2 %vm1607_vm11, %v2253_v22 }
0x12e9   :  { %v2280_v24 = vpop.f32.mrf.mxu2 }
0x12ea   :  { %v2281_v25 = vadd.f32 %v3414_v23, %v2280_v24 }
0x12ec   :  { %v2286_v26 = vadd.f32 %v2281_v25, %v2218_v3 }
0x12ee   :  { %v2288_v27 = vsel %vm826_vm2, %v2286_v26, 0.0 }
0x12ef   :  { %2289 = vadd.xlane.f32.xlu1 %v2288_v27 }
0x12f7   :  { %v2283_v28 = vpop.f32.mrf.mxu2 }
0x12f8   :  { %v2284_v29 = vadd.f32 %v3414_v23, %v2283_v28 }
0x12fa   :  { %v2287_v30 = vadd.f32 %v2284_v29, %v2219_v11 }
0x12fc   :  { %v2291_v33 = vsel %vm826_vm2, %v2287_v30, 0.0 }
0x12fd   :  { %2292 = vadd.xlane.f32.xlu0 %v2291_v33 }
0x1362   :  { %v2290_v31 = vpop.xlane.xlu1 %2289 }
0x1363   :  { %v2294_v32 = vmul.f32 %v2290_v31, %v4650_v20 }
0x1365   :  { %v2296_v34 = vsub.f32 %v2286_v26, %v2294_v32 }
0x1367   :  { %v2298_v35 = vmul.f32 %v2296_v34, %v2296_v34 }
0x1369   :  { %v2300_v36 = vsel %vm826_vm2, %v2298_v35, 0.0 }
0x136a   :  { %2301 = vadd.xlane.f32.xlu2 %v2300_v36  ;;  %v3419_v36 = vld [vmem:[%s5294_s8] ss:$0 sm:$0xff]  ;;  %s4133_s8 = smov [#allocation33]  }
0x1370   :  { %v2293_v39 = vpop.xlane.xlu0 %2292 }
0x1371   :  { %v2295_v38 = vmul.f32 %v2293_v39, %v4650_v20  ;;  %v3420_v39 = vld [vmem:[%s5293_s9 + $0x1] ss:$0 sm:$0xff]  ;;  %s3054_s9 = sshll.u32 %s4577_s22, 4  ;;  %s3055_s9 = int_to_ptr.hbm [resolvable:$true] %s3054_s9 }
0x1373   :  { %v2297_v40 = vsub.f32 %v2287_v30, %v2295_v38 }
0x1375   :  { %v2299_v41 = vmul.f32 %v2297_v40, %v2297_v40 }
0x1377   :  { %v2303_v42 = vsel %vm826_vm2, %v2299_v41, 0.0 }
0x1378   :  { %2304 = vadd.xlane.f32.xlu1 %v2303_v42  ;;  %v765_v42 = vld [vmem:[%s5295_s0 + $0x18] sm:$0xff] }
0x1379   :  { %2465 = vmatpush.msrb.mxu3 %v765_v42 }
0x13dd   :  { %v2302_v43 = vpop.xlane.xlu2 %2301 }
0x13de   :  { %v2306_v44 = vmul.f32 %v2302_v43, %v4650_v20 }
0x13e0   :  { %v2308_v45 = vadd.f32 1e-05, %v2306_v44  ;;  %v764_v44 = vld [vmem:[%s5295_s0 + $0x10] sm:$0xff] }
0x13e1   :  { %2466 = vmatpush.msrb.mxu3 %v764_v44 }
0x13e2   :  { %3494 = vrsqrt.f32 %v2308_v45  ;;  %vm2316_vm11 = vweird.f32 %v2308_v45 }
0x13e8   :  { %v3495_v46 = vpop.eup %3494 }
0x13e9   :  { %v2311_v47 = vmul.f32 %v3495_v46, %v2308_v45  ;;  %vm2317_vm10 = vweird.f32 %v3495_v46 }
0x13ea   :  { %vm2318_vm12 = vmor %vm2316_vm11, %vm2317_vm10 }
0x13eb   :  { %v2312_v48 = vmul.f32 %v3495_v46, %v2311_v47  ;;  %v2305_v49 = vpop.xlane.xlu1 %2304 }
0x13ec   :  { %v2307_v50 = vmul.f32 %v2305_v49, %v4650_v20 }
0x13ed   :  { %v2313_v56 = vmul.f32 0.5, %v2312_v48  ;;  %v762_v48 = vld [vmem:[%s5295_s0] sm:$0xff] }
0x13ee   :  { %v2309_v51 = vadd.f32 1e-05, %v2307_v50 }
0x13ef   :  { %v2314_v52 = vsub.f32 1.5, %v2313_v56 }
0x13f0   :  { %3496 = vrsqrt.f32 %v2309_v51  ;;  %vm2326_vm14 = vweird.f32 %v2309_v51 }
0x13f1   :  { %v2315_v53 = vmul.f32 %v3495_v46, %v2314_v52 }
0x13f3   :  { %v2319_v62 = vsel %vm2318_vm12, %v3495_v46, %v2315_v53  ;;  %v763_v46 = vld [vmem:[%s5295_s0 + $0x8] sm:$0xff]  ;;  %s3064_s0 = sshll.u32 %s4133_s8, 4  ;;  %s3065_s0 = int_to_ptr.vmem [resolvable:$true] %s3064_s0 }
0x13f4   :  { %v2330_v55 = vmul.f32 %v2319_v62, %v2296_v34  ;;  %2467 = vmatpush.msrb.mxu3 %v763_v46 }
0x13f6   :  { %v3497_v58 = vpop.eup %3496  ;;  %v2335_v59 = vmul.f32 %v3415_v54, %v2330_v55  ;;  %2468 = vmatpush.msrb.mxu3 %v762_v48 }
0x13f7   :  { %v2321_v60 = vmul.f32 %v3497_v58, %v2309_v51  ;;  %vm2327_vm13 = vweird.f32 %v3497_v58 }
0x13f8   :  { %v2340_v61 = vadd.f32 %v3416_v57, %v2335_v59  ;;  %vm2328_vm15 = vmor %vm2326_vm14, %vm2327_vm13  ;;  %v620_v59 = vld [vmem:[%s5296_s24 + $0x10] sm:$0xff] }
0x13f9   :  { %v2322_v63 = vmul.f32 %v3497_v58, %v2321_v60 }
0x13fa   :  { %v2344_v0 = vsel %vm826_vm2, %v2340_v61, 0.0 }
0x13fb   :  { %v2323_v2 = vmul.f32 0.5, %v2322_v63  ;;  %2345 = vadd.xlane.f32.xlu0 %v2344_v0  ;;  %v619_v63 = vld [vmem:[%s5296_s24 + $0x8] sm:$0xff]  ;;  %v618_v0 = vld [vmem:[%s5296_s24] sm:$0xff] }
0x13fd   :  { %v2324_v1 = vsub.f32 1.5, %v2323_v2 }
0x13ff   :  { %v2325_v3 = vmul.f32 %v3497_v58, %v2324_v1 }
0x1401   :  { %v2329_v4 = vsel %vm2328_vm15, %v3497_v58, %v2325_v3  ;;  %vm2770_vm15 = vcmask 254976  }
0x1402   :  { %v2331_v5 = vmul.f32 %v2329_v4, %v2297_v40 }
0x1404   :  { %v2336_v6 = vmul.f32 %v3415_v54, %v2331_v5 }
0x1406   :  { %v2341_v7 = vadd.f32 %v3416_v57, %v2336_v6  ;;  %v621_v57 = vld [vmem:[%s5296_s24 + $0x18] sm:$0xff]  ;;  %s3066_s24 = sshll.u32 %s4587_s10, 4  ;;  %s3067_s24 = int_to_ptr.hbm [resolvable:$true] %s3066_s24 }
0x1407   :  { %2761 = vmatpush.msrb.mxu2 %v621_v57 }
0x1408   :  { %v2347_v8 = vsel %vm826_vm2, %v2341_v7, 0.0 }
0x1409   :  { %2348 = vadd.xlane.f32.xlu2 %v2347_v8  ;;  %2762 = vmatpush.msrb.mxu2 %v620_v59 }
0x140b   :  { %2763 = vmatpush.msrb.mxu2 %v619_v63 }
0x140d   :  { %2764 = vmatpush.msrb.mxu2 %v618_v0 }
0x1421   :  { %2421 = vperm.xlu2 %3379, %v3417_v9  }
0x1429   :  { %2439 = vperm.xlu2 %3379, %v3418_v10  }
0x146e   :  { %v2346_v11 = vpop.xlane.xlu0 %2345 }
0x146f   :  { %v2350_v12 = vmul.f32 %v2346_v11, %v4650_v20 }
0x1471   :  { %v2352_v13 = vrot.slane %v2350_v12, 4 }
0x1473   :  { %v2353_v14 = vadd.f32 %v2352_v13, %v2350_v12 }
0x1475   :  { %v2354_v15 = vrot.slane %v2353_v14, 2 }
0x1477   :  { %v2355_v16 = vadd.f32 %v2354_v15, %v2353_v14 }
0x1479   :  { %v2356_v17 = vrot.slane %v2355_v16, 1 }
0x147b   :  { %v2357_v18 = vadd.f32 %v2356_v17, %v2355_v16 }
0x147c   :  { %v2349_v19 = vpop.xlane.xlu2 %2348 }
0x147d   :  { %v2351_v21 = vmul.f32 %v2349_v19, %v4650_v20  ;;  %v2364_v22 = vmul.f32 %v2357_v18, %v4656_v37 }
0x147f   :  { %v2358_v23 = vrot.slane %v2351_v21, 4  ;;  %v4965_v24 = vsub.f32 %v2340_v61, %v2364_v22 }
0x1481   :  { %v2359_v25 = vadd.f32 %v2358_v23, %v2351_v21  ;;  %v2368_v26 = vmul.f32 %v4965_v24, %v4965_v24 }
0x1483   :  { %v2360_v27 = vrot.slane %v2359_v25, 2  ;;  %v2370_v28 = vsel %vm826_vm2, %v2368_v26, 0.0 }
0x1484   :  { %2371 = vadd.xlane.f32.xlu1 %v2370_v28  ;;  %v2422_v11 = vpop.permute.xlu2 %2421 }
0x1485   :  { %v2361_v29 = vadd.f32 %v2360_v27, %v2359_v25 }
0x1487   :  { %v2362_v30 = vrot.slane %v2361_v29, 1 }
0x1489   :  { %v2363_v33 = vadd.f32 %v2362_v30, %v2361_v29 }
0x148b   :  { %v2365_v31 = vmul.f32 %v2363_v33, %v4656_v37  ;;  %v3421_v33 = vld [vmem:[#allocation26] ss:$0 sm:$0xff] }
0x148c   :  { %v2440_v26 = vpop.permute.xlu2 %2439 }
0x148d   :  { %v4971_v32 = vsub.f32 %v2341_v7, %v2365_v31 }
0x148f   :  { %v2369_v34 = vmul.f32 %v4971_v32, %v4971_v32 }
0x1491   :  { %v2373_v35 = vsel %vm826_vm2, %v2369_v34, 0.0 }
0x1492   :  { %2374 = vadd.xlane.f32.xlu0 %v2373_v35 }
0x149d   :  { %2435 = vperm.xlu1 %3381, %v3419_v36  }
0x14a6   :  { %2425 = vperm.xlu0 %3380, %v3420_v39  }
0x14f7   :  { %v2372_v38 = vpop.xlane.xlu1 %2371 }
0x14f8   :  { %v2376_v40 = vmul.f32 %v2372_v38, %v4650_v20  ;;  %v3423_v38 = vld [vmem:[%s5297_s6] ss:$0 sm:$0xff] }
0x14fa   :  { %v2378_v41 = vrot.slane %v2376_v40, 4 }
0x14fc   :  { %v2379_v43 = vadd.f32 %v2378_v41, %v2376_v40  ;;  %v3424_v40 = vld [vmem:[%s5298_s7 + $0x1] ss:$0 sm:$0xff] }
0x14fe   :  { %v2380_v45 = vrot.slane %v2379_v43, 2 }
0x1500   :  { %v2381_v47 = vadd.f32 %v2380_v45, %v2379_v43 }
0x1502   :  { %v2382_v49 = vrot.slane %v2381_v47, 1 }
0x1504   :  { %v2383_v50 = vadd.f32 %v2382_v49, %v2381_v47 }
0x1505   :  { %v2375_v56 = vpop.xlane.xlu0 %2374 }
0x1506   :  { %v2390_v51 = vmul.f32 %v2383_v50, %v4656_v37  ;;  %v2377_v52 = vmul.f32 %v2375_v56, %v4650_v20 }
0x1508   :  { %v2392_v53 = vadd.f32 1e-05, %v2390_v51  ;;  %v2384_v54 = vrot.slane %v2377_v52, 4 }
0x150a   :  { %3498 = vrsqrt.f32 %v2392_v53  ;;  %v2385_v62 = vadd.f32 %v2384_v54, %v2377_v52  ;;  %vm2400_vm5 = vweird.f32 %v2392_v53 }
0x150c   :  { %v2386_v55 = vrot.slane %v2385_v62, 2 }
0x150e   :  { %v2387_v58 = vadd.f32 %v2386_v55, %v2385_v62 }
0x150f   :  { %v2436_v14 = vpop.permute.xlu1 %2435 }
0x1510   :  { %v3499_v60 = vpop.eup %3498  ;;  %v2388_v61 = vrot.slane %v2387_v58, 1 }
0x1511   :  { %v2395_v2 = vmul.f32 %v3499_v60, %v2392_v53  ;;  %vm2401_vm0 = vweird.f32 %v3499_v60 }
0x1512   :  { %v2389_v1 = vadd.f32 %v2388_v61, %v2387_v58  ;;  %vm2402_vm3 = vmor %vm2400_vm5, %vm2401_vm0 }
0x1513   :  { %v2396_v3 = vmul.f32 %v3499_v60, %v2395_v2  ;;  %v3425_v2 = vld [vmem:[%s5298_s7] ss:$0 sm:$0xff] }
0x1514   :  { %v2391_v4 = vmul.f32 %v2389_v1, %v4656_v37  ;;  %v3426_v1 = vld [vmem:[%s5297_s6 + $0x1] ss:$0 sm:$0xff]  ;;  %s3962_s6 = sshra.s32 %s3067_s24, 4  ;;  %s3963_s6 = int_to_ptr.hbm [resolvable:$true] %s3962_s6 }
0x1515   :  { %v2397_v5 = vmul.f32 0.5, %v2396_v3  ;;  %s3964_s7 = scalar_lea.hbm %s3963_s6, 16  ;;  %p3967_p7 = scmp.lt.s32.totalorder %s3963_s6, %s4587_s10 }
0x1516   :  { %v2393_v6 = vadd.f32 1e-05, %v2391_v4  ;;  %p3965_p6 = scmp.ne.s32.totalorder %s3963_s6, %s3964_s7 }
0x1517   :  { %v2398_v7 = vsub.f32 1.5, %v2397_v5 }
0x1518   :  { %3500 = vrsqrt.f32 %v2393_v6  ;;  %vm2410_vm6 = vweird.f32 %v2393_v6  ;;  %v2426_v25 = vpop.permute.xlu0 %2425 }
0x1519   :  { %v2399_v8 = vmul.f32 %v3499_v60, %v2398_v7 }
0x151b   :  { %v2403_v9 = vsel %vm2402_vm3, %v3499_v60, %v2399_v8  ;;  %v769_v8 = vld [vmem:[%s5299_s13 + $0x10] sm:$0xff] }
0x151c   :  { %v2414_v10 = vmul.f32 %v2403_v9, %v4965_v24 }
0x151e   :  { %v3501_v12 = vpop.eup %3500  ;;  %v2428_v13 = vmul.f32 %v2422_v11, %v2414_v10  ;;  %v768_v10 = vld [vmem:[%s5299_s13 + $0x8] sm:$0xff] }
0x151f   :  { %v2405_v15 = vmul.f32 %v3501_v12, %v2393_v6  ;;  %vm2411_vm4 = vweird.f32 %v3501_v12  ;;  %v770_v6 = vld [vmem:[%s5299_s13 + $0x18] sm:$0xff] }
0x1520   :  { %v2442_v16 = vadd.f32 %v2436_v14, %v2428_v13  ;;  %vm2412_vm7 = vmor %vm2410_vm6, %vm2411_vm4  ;;  %2597 = vmatpush.msra.mxu0 %v770_v6 }
0x1521   :  { %v2406_v17 = vmul.f32 %v3501_v12, %v2405_v15 }
0x1522   :  { %3253 = vmatmul.msk.f32.vlgmr.msrb.gmra.mxu3 %vm826_vm2, %v2442_v16  ;;  %v2743_v28 = vrot.slane %v2442_v16, 7  ;;  %2598 = vmatpush.msra.mxu0 %v769_v8 }
0x1523   :  { %v2407_v18 = vmul.f32 0.5, %v2406_v17 }
0x1524   :  { %2599 = vmatpush.msra.mxu0 %v768_v10 }
0x1525   :  { %v2408_v19 = vsub.f32 1.5, %v2407_v18 }
0x1527   :  { %v2409_v21 = vmul.f32 %v3501_v12, %v2408_v19 }
0x1529   :  { %v2413_v22 = vsel %vm2412_vm7, %v3501_v12, %v2409_v21  ;;  %v767_v12 = vld [vmem:[%s5299_s13] sm:$0xff]  ;;  %s3966_s13 = scalar_lea.hbm %s4587_s10, 16 }
0x152a   :  { %v2415_v23 = vmul.f32 %v2413_v22, %v4971_v32  ;;  %2600 = vmatpush.msra.mxu0 %v767_v12  ;;  %p3968_p8 = scmp.lt.s32.totalorder %s3966_s13, %s3964_s7 }
0x152c   :  { %v2429_v24 = vmul.f32 %v2426_v25, %v2415_v23  ;;  %p3969_p9 = por %p3968_p8, %p3967_p7 }
0x152e   :  { %v2443_v27 = vadd.f32 %v2440_v26, %v2429_v24  ;;  %p3970_p10 = pnand %p3969_p9, %p3965_p6 }
0x1530   :  { %v2744_v29 = vrot.slane %v2443_v27, 6  ;;  %3254 = vmatmul.msk.f32.gmra.mxu3 %vm826_vm2, %v2443_v27 }
0x1532   :  { %v4994_v30 = vsel %vm2745_vm8, %v2744_v29, %v2743_v28 }
0x1533   :  { %3259 = vmatmul.msk.f32.vlgmr.msrb.gmra.mxu2 %vm826_vm2, %v4994_v30 }
0x15a5   :  { %v2470_v31 = vpop.f32.mrf.mxu3 }
0x15a6   :  { %v2471_v34 = vadd.f32 %v3421_v33, %v2470_v31 }
0x15a8   :  { %v2476_v32 = vsel %vm826_vm2, %v2471_v34, 0.0 }
0x15a9   :  { %2477 = vadd.xlane.f32.xlu0 %v2476_v32 }
0x15b3   :  { %v2473_v35 = vpop.f32.mrf.mxu3 }
0x15b4   :  { %v2474_v36 = vadd.f32 %v3421_v33, %v2473_v35 }
0x15b6   :  { %v2479_v39 = vsel %vm826_vm2, %v2474_v36, 0.0 }
0x15b7   :  { %2480 = vadd.xlane.f32.xlu1 %v2479_v39 }
0x15d0   :  { %2553 = vperm.xlu1 %3381, %v3423_v38  }
0x15d8   :  { %2571 = vperm.xlu1 %3381, %v3424_v40  }
0x161c   :  { %v2478_v41 = vpop.xlane.xlu0 %2477 }
0x161d   :  { %v2482_v42 = vmul.f32 %v2478_v41, %v4650_v20 }
0x161f   :  { %v2484_v43 = vrot.slane %v2482_v42, 4 }
0x1621   :  { %v2485_v44 = vadd.f32 %v2484_v43, %v2482_v42 }
0x1623   :  { %v2486_v45 = vrot.slane %v2485_v44, 2 }
0x1625   :  { %v2487_v46 = vadd.f32 %v2486_v45, %v2485_v44 }
0x1627   :  { %v2488_v47 = vrot.slane %v2487_v46, 1 }
0x1629   :  { %v2489_v48 = vadd.f32 %v2488_v47, %v2487_v46 }
0x162a   :  { %v2481_v49 = vpop.xlane.xlu1 %2480 }
0x162b   :  { %v2483_v50 = vmul.f32 %v2481_v49, %v4650_v20  ;;  %v2496_v56 = vmul.f32 %v2489_v48, %v4656_v37 }
0x162d   :  { %v2490_v51 = vrot.slane %v2483_v50, 4  ;;  %v2498_v52 = vsub.f32 %v2471_v34, %v2496_v56 }
0x162f   :  { %v2491_v53 = vadd.f32 %v2490_v51, %v2483_v50  ;;  %v2500_v54 = vmul.f32 %v2498_v52, %v2498_v52 }
0x1631   :  { %v2492_v62 = vrot.slane %v2491_v53, 2  ;;  %v2502_v55 = vsel %vm826_vm2, %v2500_v54, 0.0 }
0x1632   :  { %2503 = vadd.xlane.f32.xlu2 %v2502_v55 }
0x1633   :  { %v2493_v57 = vadd.f32 %v2492_v62, %v2491_v53  ;;  %v3427_v53 = vld [vmem:[#allocation27] ss:$0 sm:$0xff] }
0x1635   :  { %v2494_v58 = vrot.slane %v2493_v57, 1 }
0x1637   :  { %v2495_v59 = vadd.f32 %v2494_v58, %v2493_v57 }
0x1639   :  { %v2497_v60 = vmul.f32 %v2495_v59, %v4656_v37 }
0x163b   :  { %v5007_v61 = vsub.f32 %v2474_v36, %v2497_v60  ;;  %v3428_v60 = vld [vmem:[%s5300_s19] ss:$0 sm:$0xff] }
0x163d   :  { %v2501_v63 = vmul.f32 %v5007_v61, %v5007_v61 }
0x163f   :  { %v2505_v0 = vsel %vm826_vm2, %v2501_v63, 0.0 }
0x1640   :  { %2506 = vadd.xlane.f32.xlu0 %v2505_v0 }
0x1642   :  { %v2554_v39 = vpop.permute.xlu1 %2553 }
0x164a   :  { %2567 = vperm.xlu2 %3379, %v3425_v2   ;;  %v2572_v51 = vpop.permute.xlu1 %2571 }
0x1654   :  { %2557 = vperm.xlu0 %3380, %v3426_v1  }
0x16a5   :  { %v2504_v3 = vpop.xlane.xlu2 %2503 }
0x16a6   :  { %v2508_v4 = vmul.f32 %v2504_v3, %v4650_v20 }
0x16a8   :  { %v2510_v5 = vrot.slane %v2508_v4, 4 }
0x16aa   :  { %v2511_v7 = vadd.f32 %v2510_v5, %v2508_v4 }
0x16ac   :  { %v2512_v9 = vrot.slane %v2511_v7, 2 }
0x16ad   :  { %v2568_v41 = vpop.permute.xlu2 %2567 }
0x16ae   :  { %v2513_v11 = vadd.f32 %v2512_v9, %v2511_v7 }
0x16b0   :  { %v2514_v13 = vrot.slane %v2513_v11, 1 }
0x16b2   :  { %v2515_v14 = vadd.f32 %v2514_v13, %v2513_v11 }
0x16b3   :  { %v2507_v15 = vpop.xlane.xlu0 %2506 }
0x16b4   :  { %v2522_v16 = vmul.f32 %v2515_v14, %v4656_v37  ;;  %v2509_v17 = vmul.f32 %v2507_v15, %v4650_v20 }
0x16b6   :  { %v2524_v18 = vadd.f32 1e-05, %v2522_v16  ;;  %v2516_v19 = vrot.slane %v2509_v17, 4 }
0x16b8   :  { %3502 = vrsqrt.f32 %v2524_v18  ;;  %v2517_v21 = vadd.f32 %v2516_v19, %v2509_v17  ;;  %vm2532_vm10 = vweird.f32 %v2524_v18 }
0x16ba   :  { %v2518_v22 = vrot.slane %v2517_v21, 2 }
0x16bc   :  { %v2519_v23 = vadd.f32 %v2518_v22, %v2517_v21 }
0x16be   :  { %v3503_v25 = vpop.eup %3502  ;;  %v2520_v24 = vrot.slane %v2519_v23, 1 }
0x16bf   :  { %v2527_v26 = vmul.f32 %v3503_v25, %v2524_v18  ;;  %vm2533_vm9 = vweird.f32 %v3503_v25 }
0x16c0   :  { %v2521_v27 = vadd.f32 %v2520_v24, %v2519_v23  ;;  %vm2534_vm11 = vmor %vm2532_vm10, %vm2533_vm9  ;;  %v3431_v24 = vld [vmem:[%s5300_s19 + $0x1] ss:$0 sm:$0xff] }
0x16c1   :  { %v2528_v28 = vmul.f32 %v3503_v25, %v2527_v26  ;;  %v3422_v26 = vld [vmem:[%s5302_s16] ss:$0 sm:$0xff] }
0x16c2   :  { %v2523_v29 = vmul.f32 %v2521_v27, %v4656_v37  ;;  %v2766_v27 = vpop.f32.mrf.mxu2 }
0x16c3   :  { %v2529_v33 = vmul.f32 0.5, %v2528_v28  ;;  %v5046_v28 = vadd.f32 %v3422_v26, %v2766_v27 }
0x16c4   :  { %v2525_v31 = vadd.f32 1e-05, %v2523_v29 }
0x16c5   :  { %v2530_v34 = vsub.f32 1.5, %v2529_v33  ;;  %v2769_v29 = vmax.f32 %v5046_v28, 0.0 }
0x16c6   :  { %3504 = vrsqrt.f32 %v2525_v31  ;;  %vm2542_vm13 = vweird.f32 %v2525_v31  ;;  %v2558_v50 = vpop.permute.xlu0 %2557 }
0x16c7   :  { %v2531_v32 = vmul.f32 %v3503_v25, %v2530_v34  ;;  %v2771_v33 = vsel %vm2770_vm15, %v2769_v29, 0.0  ;;  %v632_v34 = vld [vmem:[%s5304_s3] sm:$0x3] }
0x16c9   :  { %v2535_v35 = vsel %vm2534_vm11, %v3503_v25, %v2531_v32  ;;  %v3430_v25 = vld [vmem:[%s5301_s1] ss:$0 sm:$0xff] }
0x16ca   :  { %v2546_v36 = vmul.f32 %v2535_v35, %v2498_v52 }
0x16cc   :  { %v3505_v38 = vpop.eup %3504  ;;  %v2560_v40 = vmul.f32 %v2554_v39, %v2546_v36  ;;  %v775_v39 = vld [vmem:[%s5305_s11 + $0x18] sm:$0xff] }
0x16cd   :  { %v2537_v42 = vmul.f32 %v3505_v38, %v2525_v31  ;;  %vm2543_vm12 = vweird.f32 %v3505_v38  ;;  %v758_v31 = vld [vmem:[%s5303_s20] sm:$0x3]  ;;  %2729 = vmatpush.msrb.mxu1 %v775_v39 }
0x16ce   :  { %v2574_v43 = vadd.f32 %v2568_v41, %v2560_v40  ;;  %vm2544_vm14 = vmor %vm2542_vm13, %vm2543_vm12  ;;  %v774_v40 = vld [vmem:[%s5305_s11 + $0x10] sm:$0xff] }
0x16cf   :  { %v2538_v44 = vmul.f32 %v3505_v38, %v2537_v42  ;;  %2730 = vmatpush.msrb.mxu1 %v774_v40  ;;  %v773_v42 = vld [vmem:[%s5305_s11 + $0x8] sm:$0xff] }
0x16d0   :  { %3255 = vmatmul.msk.f32.vlgmr.msra.gmra.mxu0 %vm826_vm2, %v2574_v43 }
0x16d1   :  { %v2539_v45 = vmul.f32 0.5, %v2538_v44  ;;  %2731 = vmatpush.msrb.mxu1 %v773_v42  ;;  %v772_v44 = vld [vmem:[%s5305_s11] sm:$0xff]  ;;  %v626_v42 = vld [vmem:[%s5308_s4 + $0x18] sm:$0xff] }
0x16d2   :  { %2823 = vmatpush.msra.mxu3 %v626_v42 }
0x16d3   :  { %v2540_v46 = vsub.f32 1.5, %v2539_v45  ;;  %2732 = vmatpush.msrb.mxu1 %v772_v44  ;;  %v625_v44 = vld [vmem:[%s5308_s4 + $0x10] sm:$0xff] }
0x16d4   :  { %2824 = vmatpush.msra.mxu3 %v625_v44 }
0x16d5   :  { %v2541_v47 = vmul.f32 %v3505_v38, %v2540_v46 }
0x16d7   :  { %v2545_v48 = vsel %vm2544_vm14, %v3505_v38, %v2541_v47 }
0x16d8   :  { %v2547_v49 = vmul.f32 %v2545_v48, %v5007_v61  ;;  %v3429_v61 = vld [vmem:[%s5301_s1 + $0x1] ss:$0 sm:$0xff] }
0x16da   :  { %v2561_v56 = vmul.f32 %v2558_v50, %v2547_v49 }
0x16dc   :  { %v2575_v52 = vadd.f32 %v2572_v51, %v2561_v56 }
0x16de   :  { %3256 = vmatmul.msk.f32.gmra.mxu0 %vm826_vm2, %v2575_v52 }
0x174d   :  { %v2602_v54 = vpop.f32.mrf.mxu0 }
0x174e   :  { %v2603_v62 = vadd.f32 %v3427_v53, %v2602_v54 }
0x1750   :  { %v2608_v55 = vsel %vm826_vm2, %v2603_v62, 0.0 }
0x1751   :  { %2609 = vadd.xlane.f32.xlu2 %v2608_v55  ;;  %v746_v55 = vld [vmem:[%s5306_s18 + $0x18] sm:$0xff] }
0x1752   :  { %2907 = vmatpush.msra.mxu1 %v746_v55 }
0x175b   :  { %v2605_v57 = vpop.f32.mrf.mxu0 }
0x175c   :  { %v2606_v58 = vadd.f32 %v3427_v53, %v2605_v57  ;;  %v745_v57 = vld [vmem:[%s5306_s18 + $0x10] sm:$0xff] }
0x175d   :  { %2908 = vmatpush.msra.mxu1 %v745_v57 }
0x175e   :  { %v2611_v59 = vsel %vm826_vm2, %v2606_v58, 0.0 }
0x175f   :  { %2612 = vadd.xlane.f32.xlu0 %v2611_v59 }
0x1773   :  { %2685 = vperm.xlu0 %3380, %v3428_v60   ;;  %v744_v60 = vld [vmem:[%s5306_s18 + $0x8] sm:$0xff] }
0x1774   :  { %2909 = vmatpush.msra.mxu1 %v744_v60 }
0x177b   :  { %2703 = vperm.xlu0 %3380, %v3429_v61  }
0x17c4   :  { %v2610_v63 = vpop.xlane.xlu2 %2609 }
0x17c5   :  { %v2614_v0 = vmul.f32 %v2610_v63, %v4650_v20 }
0x17c7   :  { %v2616_v2 = vrot.slane %v2614_v0, 4 }
0x17c9   :  { %v2617_v1 = vadd.f32 %v2616_v2, %v2614_v0  ;;  %v743_v0 = vld [vmem:[%s5306_s18] sm:$0xff] }
0x17ca   :  { %2910 = vmatpush.msra.mxu1 %v743_v0 }
0x17cb   :  { %v2618_v3 = vrot.slane %v2617_v1, 2 }
0x17cd   :  { %v2619_v4 = vadd.f32 %v2618_v3, %v2617_v1 }
0x17cf   :  { %v2620_v5 = vrot.slane %v2619_v4, 1 }
0x17d1   :  { %v2621_v6 = vadd.f32 %v2620_v5, %v2619_v4 }
0x17d2   :  { %v2613_v7 = vpop.xlane.xlu0 %2612 }
0x17d3   :  { %v2615_v8 = vmul.f32 %v2613_v7, %v4650_v20  ;;  %v2628_v9 = vmul.f32 %v2621_v6, %v4656_v37 }
0x17d5   :  { %v2622_v10 = vrot.slane %v2615_v8, 4  ;;  %v5032_v11 = vsub.f32 %v2603_v62, %v2628_v9 }
0x17d7   :  { %v2623_v12 = vadd.f32 %v2622_v10, %v2615_v8  ;;  %v2632_v13 = vmul.f32 %v5032_v11, %v5032_v11 }
0x17d9   :  { %v2624_v14 = vrot.slane %v2623_v12, 2  ;;  %v2634_v15 = vsel %vm826_vm2, %v2632_v13, 0.0 }
0x17da   :  { %2635 = vadd.xlane.f32.xlu1 %v2634_v15 }
0x17db   :  { %v2625_v16 = vadd.f32 %v2624_v14, %v2623_v12 }
0x17dd   :  { %v2626_v17 = vrot.slane %v2625_v16, 1 }
0x17df   :  { %v2627_v18 = vadd.f32 %v2626_v17, %v2625_v16 }
0x17e1   :  { %v2629_v19 = vmul.f32 %v2627_v18, %v4656_v37 }
0x17e3   :  { %v5038_v21 = vsub.f32 %v2606_v58, %v2629_v19 }
0x17e5   :  { %v2633_v22 = vmul.f32 %v5038_v21, %v5038_v21  ;;  %v2686_v7 = vpop.permute.xlu0 %2685 }
0x17e7   :  { %v2637_v23 = vsel %vm826_vm2, %v2633_v22, 0.0 }
0x17e8   :  { %2638 = vadd.xlane.f32.xlu2 %v2637_v23 }
0x17ed   :  { %v2704_v22 = vpop.permute.xlu0 %2703 }
0x17f3   :  { %2699 = vperm.xlu1 %3381, %v3430_v25   ;;  %v3432_v25 = vld [vmem:[#allocation29] ss:$0 sm:$0xff] }
0x1800   :  { %2689 = vperm.xlu2 %3379, %v3431_v24  }
0x1829   :  { %2772 = vadd.xlane.f32.xlu2 %v2771_v33 }
0x1841   :  { %2940 = vperm.xlu2 %3379, %v758_v31  }
0x1849   :  { %2801 = vperm.xlu2 %3379, %v632_v34  }
0x184d   :  { %v2636_v32 = vpop.xlane.xlu1 %2635 }
0x184e   :  { %v2640_v35 = vmul.f32 %v2636_v32, %v4650_v20 }
0x1850   :  { %v2642_v36 = vrot.slane %v2640_v35, 4 }
0x1852   :  { %v2643_v38 = vadd.f32 %v2642_v36, %v2640_v35 }
0x1854   :  { %v2644_v41 = vrot.slane %v2643_v38, 2 }
0x1856   :  { %v2645_v43 = vadd.f32 %v2644_v41, %v2643_v38  ;;  %v633_v41 = vld [vmem:[%s5307_s27] sm:$0x3] }
0x1858   :  { %v2646_v45 = vrot.slane %v2645_v43, 1 }
0x185a   :  { %v2647_v46 = vadd.f32 %v2646_v45, %v2645_v43 }
0x185b   :  { %v2639_v47 = vpop.xlane.xlu2 %2638 }
0x185c   :  { %v2654_v48 = vmul.f32 %v2647_v46, %v4656_v37  ;;  %v2641_v49 = vmul.f32 %v2639_v47, %v4650_v20  ;;  %v624_v46 = vld [vmem:[%s5308_s4 + $0x8] sm:$0xff] }
0x185d   :  { %2825 = vmatpush.msra.mxu3 %v624_v46 }
0x185e   :  { %v2656_v50 = vadd.f32 1e-05, %v2654_v48  ;;  %v2648_v56 = vrot.slane %v2641_v49, 4 }
0x1860   :  { %3506 = vrsqrt.f32 %v2656_v50  ;;  %v2649_v51 = vadd.f32 %v2648_v56, %v2641_v49  ;;  %vm2664_vm5 = vweird.f32 %v2656_v50 }
0x1862   :  { %v2650_v52 = vrot.slane %v2649_v51, 2 }
0x1863   :  { %v2690_v18 = vpop.permute.xlu2 %2689 }
0x1864   :  { %v2651_v53 = vadd.f32 %v2650_v52, %v2649_v51 }
0x1865   :  { %v2700_v12 = vpop.permute.xlu1 %2699 }
0x1866   :  { %v3507_v54 = vpop.eup %3506  ;;  %v2652_v62 = vrot.slane %v2651_v53, 1 }
0x1867   :  { %v2659_v58 = vmul.f32 %v3507_v54, %v2656_v50  ;;  %vm2665_vm0 = vweird.f32 %v3507_v54 }
0x1868   :  { %v2653_v59 = vadd.f32 %v2652_v62, %v2651_v53  ;;  %vm2666_vm3 = vmor %vm2664_vm5, %vm2665_vm0 }
0x1869   :  { %v2660_v61 = vmul.f32 %v3507_v54, %v2659_v58 }
0x186a   :  { %v2655_v63 = vmul.f32 %v2653_v59, %v4656_v37 }
0x186b   :  { %v2661_v2 = vmul.f32 0.5, %v2660_v61 }
0x186c   :  { %v2657_v1 = vadd.f32 1e-05, %v2655_v63 }
0x186d   :  { %v2662_v3 = vsub.f32 1.5, %v2661_v2 }
0x186e   :  { %3508 = vrsqrt.f32 %v2657_v1  ;;  %vm2674_vm6 = vweird.f32 %v2657_v1 }
0x186f   :  { %v2663_v4 = vmul.f32 %v3507_v54, %v2662_v3  ;;  %v750_v3 = vld [vmem:[%s5310_s21 + $0x10] sm:$0xff] }
0x1871   :  { %v2667_v5 = vsel %vm2666_vm3, %v3507_v54, %v2663_v4  ;;  %v749_v4 = vld [vmem:[%s5310_s21 + $0x8] sm:$0xff] }
0x1872   :  { %v2678_v6 = vmul.f32 %v2667_v5, %v5032_v11  ;;  %v748_v5 = vld [vmem:[%s5310_s21] sm:$0xff] }
0x1874   :  { %v3509_v8 = vpop.eup %3508  ;;  %v2692_v9 = vmul.f32 %v2686_v7, %v2678_v6 }
0x1875   :  { %v2669_v10 = vmul.f32 %v3509_v8, %v2657_v1  ;;  %vm2675_vm4 = vweird.f32 %v3509_v8  ;;  %v751_v1 = vld [vmem:[%s5310_s21 + $0x18] sm:$0xff] }
0x1876   :  { %v2706_v37 = vadd.f32 %v2700_v12, %v2692_v9  ;;  %vm2676_vm7 = vmor %vm2674_vm6, %vm2675_vm4  ;;  %2968 = vmatpush.msra.mxu2 %v751_v1  ;;  %v755_v1 = vld [vmem:[%s5317_s26 + $0x10] sm:$0xff]  ;;  %vm3039_vm4 = vcmask 17408  }
0x1877   :  { %v2670_v13 = vmul.f32 %v3509_v8, %v2669_v10 }
0x1878   :  { %3257 = vmatmul.msk.f32.vlgmr.msrb.gmra.mxu1 %vm826_vm2, %v2706_v37  ;;  %2969 = vmatpush.msra.mxu2 %v750_v3  ;;  %v754_v3 = vld [vmem:[%s5317_s26 + $0x8] sm:$0xff] }
0x1879   :  { %v2671_v14 = vmul.f32 0.5, %v2670_v13 }
0x187a   :  { %2970 = vmatpush.msra.mxu2 %v749_v4  ;;  %v753_v4 = vld [vmem:[%s5317_s26] sm:$0xff] }
0x187b   :  { %v2672_v15 = vsub.f32 1.5, %v2671_v14 }
0x187c   :  { %2971 = vmatpush.msra.mxu2 %v748_v5 }
0x187d   :  { %v2673_v16 = vmul.f32 %v3509_v8, %v2672_v15 }
0x187f   :  { %v2677_v17 = vsel %vm2676_vm7, %v3509_v8, %v2673_v16 }
0x1880   :  { %v2679_v11 = vmul.f32 %v2677_v17, %v5038_v21  ;;  %v3433_v21 = vld [vmem:[#allocation23] ss:$0 sm:$0xff] }
0x1882   :  { %v2693_v19 = vmul.f32 %v2690_v18, %v2679_v11 }
0x1884   :  { %v2707_v23 = vadd.f32 %v2704_v22, %v2693_v19  ;;  %v3434_v19 = vld [vmem:[%s5311_s23] ss:$0 sm:$0xff] }
0x1886   :  { %3258 = vmatmul.msk.f32.gmra.mxu1 %vm826_vm2, %v2707_v23 }
0x188e   :  { %3262 = vmatmul.msk.f32.vlgmr.msra.gmra.mxu1 %vm826_vm2, %v4994_v30 }
0x189c   :  { %v2773_v31 = vpop.xlane.xlu2 %2772 }
0x189d   :  { %v2774_v32 = vmul.f32 %v2773_v31, %v4650_v20 }
0x189f   :  { %v2775_v36 = vsub.f32 %v2769_v29, %v2774_v32  ;;  %v623_v29 = vld [vmem:[%s5308_s4] sm:$0xff] }
0x18a0   :  { %2826 = vmatpush.msra.mxu3 %v623_v29 }
0x18a1   :  { %v2776_v38 = vmul.f32 %v2775_v36, %v2775_v36 }
0x18a3   :  { %v2777_v40 = vsel %vm2770_vm15, %v2776_v38, 0.0 }
0x18a4   :  { %v2941_v54 = vpop.permute.xlu2 %2940 }
0x18ac   :  { %v2802_v0 = vpop.permute.xlu2 %2801 }
0x18f5   :  { %v2734_v24 = vpop.f32.mrf.mxu1 }
0x18f6   :  { %v2735_v26 = vadd.f32 %v3432_v25, %v2734_v24 }
0x18f8   :  { %3037 = vst.msk [vmem:[%s4572_s15] sm:$0xff] %vm792_vm1, %v2735_v26  ;;  %v760_v26 = vld [vmem:[%s5312_s25] sm:$0x3] }
0x1903   :  { %v2737_v27 = vpop.f32.mrf.mxu1 }
0x1904   :  { %v2738_v33 = vadd.f32 %v3432_v25, %v2737_v27  ;;  %v634_v27 = vld [vmem:[%s5313_s12] sm:$0x3] }
0x1906   :  { %3038 = vst.msk [vmem:[%s4572_s15 + $0x8] sm:$0xff] %vm792_vm1, %v2738_v33  ;;  %s5309_s15 = sld [smem:[#allocation103_spill]]  ;;  %v3435_v33 = vld [vmem:[#allocation24] ss:$0 sm:$0xff] }
0x190b   :  { %v2912_v34 = vpop.f32.mrf.mxu1 }
0x190c   :  { %v2913_v35 = vadd.f32 %v3433_v21, %v2912_v34  ;;  %v757_v59 = vld [vmem:[%s5309_s15] sm:$0x3] }
0x190e   :  { %v2915_v30 = vmax.f32 %v2913_v35, 0.0 }
0x1910   :  { %v2916_v39 = vsel %vm2770_vm15, %v2915_v30, 0.0 }
0x1911   :  { %2917 = vadd.xlane.f32.xlu0 %v2916_v39 }
0x1919   :  { %2778 = vadd.xlane.f32.xlu0 %v2777_v40  ;;  %v635_v40 = vld [vmem:[%s5314_s29] sm:$0x3] }
0x192d   :  { %2795 = vperm.xlu0 %3380, %v633_v41   ;;  %v631_v41 = vld [vmem:[%s5315_s30 + $0x18] sm:$0xff] }
0x192e   :  { %2884 = vmatpush.msrb.mxu0 %v631_v41 }
0x1984   :  { %v2918_v43 = vpop.xlane.xlu0 %2917 }
0x1985   :  { %v2919_v45 = vmul.f32 %v2918_v43, %v4650_v20  ;;  %v630_v43 = vld [vmem:[%s5315_s30 + $0x10] sm:$0xff] }
0x1986   :  { %2885 = vmatpush.msrb.mxu0 %v630_v43 }
0x1987   :  { %v2920_v28 = vsub.f32 %v2915_v30, %v2919_v45  ;;  %v629_v45 = vld [vmem:[%s5315_s30 + $0x8] sm:$0xff] }
0x1988   :  { %2886 = vmatpush.msrb.mxu0 %v629_v45 }
0x1989   :  { %v2921_v47 = vmul.f32 %v2920_v28, %v2920_v28 }
0x198b   :  { %v2922_v48 = vsel %vm2770_vm15, %v2921_v47, 0.0 }
0x198c   :  { %2923 = vadd.xlane.f32.xlu1 %v2922_v48  ;;  %v2779_v49 = vpop.xlane.xlu0 %2778 }
0x198d   :  { %v2780_v50 = vmul.f32 %v2779_v49, %v4650_v20 }
0x198f   :  { %v2781_v56 = vadd.f32 1e-05, %v2780_v50 }
0x1991   :  { %3510 = vrsqrt.f32 %v2781_v56  ;;  %vm2788_vm8 = vweird.f32 %v2781_v56 }
0x1997   :  { %v3511_v51 = vpop.eup %3510 }
0x1998   :  { %v2783_v52 = vmul.f32 %v3511_v51, %v2781_v56  ;;  %vm2789_vm1 = vweird.f32 %v3511_v51 }
0x1999   :  { %vm2790_vm9 = vmor %vm2788_vm8, %vm2789_vm1 }
0x199a   :  { %v2784_v53 = vmul.f32 %v3511_v51, %v2783_v52 }
0x199c   :  { %v2785_v62 = vmul.f32 0.5, %v2784_v53 }
0x199e   :  { %v2786_v55 = vsub.f32 1.5, %v2785_v62 }
0x199f   :  { %v2796_v61 = vpop.permute.xlu0 %2795 }
0x19a0   :  { %v2787_v57 = vmul.f32 %v3511_v51, %v2786_v55 }
0x19a2   :  { %v2791_v58 = vsel %vm2790_vm9, %v3511_v51, %v2787_v57  ;;  %v759_v57 = vld [vmem:[%s5316_s14] sm:$0x3] }
0x19a3   :  { %v2792_v60 = vmul.f32 %v2791_v58, %v2775_v36 }
0x19a5   :  { %v2798_v63 = vmul.f32 %v2796_v61, %v2792_v60  ;;  %2946 = vperm.xlu1 %3381, %v757_v59  }
0x19a7   :  { %v2804_v2 = vadd.f32 %v2802_v0, %v2798_v63 }
0x19a9   :  { %3260 = vmatmul.msk.f32.vlgmr.msra.gmra.mxu3 %vm826_vm2, %v2804_v2  ;;  %v756_v2 = vld [vmem:[%s5317_s26 + $0x18] sm:$0xff] }
0x19aa   :  { %3029 = vmatpush.msrb.mxu3 %v756_v2 }
0x19ac   :  { %3030 = vmatpush.msrb.mxu3 %v755_v1 }
0x19ae   :  { %3031 = vmatpush.msrb.mxu3 %v754_v3 }
0x19b0   :  { %3032 = vmatpush.msrb.mxu3 %v753_v4 }
0x19ff   :  { %v2924_v6 = vpop.xlane.xlu1 %2923 }
0x1a00   :  { %v2925_v7 = vmul.f32 %v2924_v6, %v4650_v20 }
0x1a02   :  { %v2926_v8 = vadd.f32 1e-05, %v2925_v7 }
0x1a04   :  { %3512 = vrsqrt.f32 %v2926_v8  ;;  %vm2933_vm11 = vweird.f32 %v2926_v8 }
0x1a0a   :  { %v3513_v9 = vpop.eup %3512 }
0x1a0b   :  { %v2928_v10 = vmul.f32 %v3513_v9, %v2926_v8  ;;  %vm2934_vm10 = vweird.f32 %v3513_v9 }
0x1a0c   :  { %vm2935_vm12 = vmor %vm2933_vm11, %vm2934_vm10 }
0x1a0d   :  { %v2929_v12 = vmul.f32 %v3513_v9, %v2928_v10 }
0x1a0f   :  { %v2930_v37 = vmul.f32 0.5, %v2929_v12 }
0x1a11   :  { %v2931_v13 = vsub.f32 1.5, %v2930_v37 }
0x1a13   :  { %v2932_v14 = vmul.f32 %v3513_v9, %v2931_v13 }
0x1a15   :  { %v2936_v15 = vsel %vm2935_vm12, %v3513_v9, %v2932_v14 }
0x1a16   :  { %v2937_v16 = vmul.f32 %v2936_v15, %v2920_v28  ;;  %v628_v28 = vld [vmem:[%s5315_s30] sm:$0xff] }
0x1a17   :  { %v2947_v11 = vpop.permute.xlu1 %2946  ;;  %2887 = vmatpush.msrb.mxu0 %v628_v28 }
0x1a18   :  { %v2943_v17 = vmul.f32 %v2941_v54, %v2937_v16 }
0x1a1a   :  { %v2949_v18 = vadd.f32 %v2947_v11, %v2943_v17 }
0x1a1c   :  { %3263 = vmatmul.msk.f32.vlgmr.msra.gmra.mxu2 %vm826_vm2, %v2949_v18 }
0x1a2c   :  { %v2828_v22 = vpop.f32.mrf.mxu3 }
0x1a2d   :  { %v2829_v23 = vadd.f32 %v3434_v19, %v2828_v22 }
0x1a2f   :  { %v2831_v25 = vmax.f32 %v2829_v23, 0.0 }
0x1a31   :  { %v2832_v24 = vsel %vm2770_vm15, %v2831_v25, 0.0 }
0x1a32   :  { %2833 = vadd.xlane.f32.xlu1 %v2832_v24 }
0x1a4b   :  { %3001 = vperm.xlu1 %3381, %v760_v26  }
0x1a53   :  { %2862 = vperm.xlu1 %3381, %v634_v27  }
0x1a9f   :  { %v2973_v21 = vpop.f32.mrf.mxu2 }
0x1aa0   :  { %v2974_v31 = vadd.f32 %v3435_v33, %v2973_v21 }
0x1aa2   :  { %v2976_v34 = vmax.f32 %v2974_v31, 0.0 }
0x1aa4   :  { %v2977_v32 = vsel %vm2770_vm15, %v2976_v34, 0.0 }
0x1aa5   :  { %2978 = vadd.xlane.f32.xlu0 %v2977_v32  ;;  %v2834_v35 = vpop.xlane.xlu1 %2833 }
0x1aa6   :  { %v2835_v30 = vmul.f32 %v2834_v35, %v4650_v20 }
0x1aa8   :  { %v2836_v36 = vsub.f32 %v2831_v25, %v2835_v30 }
0x1aaa   :  { %v2837_v39 = vmul.f32 %v2836_v36, %v2836_v36 }
0x1aac   :  { %v2838_v38 = vsel %vm2770_vm15, %v2837_v39, 0.0 }
0x1aad   :  { %2839 = vadd.xlane.f32.xlu0 %v2838_v38 }
0x1abd   :  { %v3002_v53 = vpop.permute.xlu1 %3001 }
0x1ac1   :  { %2856 = vperm.xlu0 %3380, %v635_v40  }
0x1ac5   :  { %v2863_v63 = vpop.permute.xlu1 %2862 }
0x1b18   :  { %v2979_v42 = vpop.xlane.xlu0 %2978 }
0x1b19   :  { %v2980_v44 = vmul.f32 %v2979_v42, %v4650_v20 }
0x1b1b   :  { %v2981_v46 = vsub.f32 %v2976_v34, %v2980_v44 }
0x1b1d   :  { %v2982_v29 = vmul.f32 %v2981_v46, %v2981_v46 }
0x1b1f   :  { %v2983_v47 = vsel %vm2770_vm15, %v2982_v29, 0.0 }
0x1b20   :  { %2984 = vadd.xlane.f32.xlu2 %v2983_v47  ;;  %v2840_v48 = vpop.xlane.xlu0 %2839 }
0x1b21   :  { %v2841_v49 = vmul.f32 %v2840_v48, %v4650_v20 }
0x1b23   :  { %v2842_v50 = vadd.f32 1e-05, %v2841_v49 }
0x1b25   :  { %3514 = vrsqrt.f32 %v2842_v50  ;;  %vm2849_vm14 = vweird.f32 %v2842_v50 }
0x1b2b   :  { %v3515_v56 = vpop.eup %3514 }
0x1b2c   :  { %v2844_v51 = vmul.f32 %v3515_v56, %v2842_v50  ;;  %vm2850_vm13 = vweird.f32 %v3515_v56 }
0x1b2d   :  { %vm2851_vm15 = vmor %vm2849_vm14, %vm2850_vm13 }
0x1b2e   :  { %v2845_v52 = vmul.f32 %v3515_v56, %v2844_v51 }
0x1b30   :  { %v2846_v54 = vmul.f32 0.5, %v2845_v52 }
0x1b32   :  { %v2847_v62 = vsub.f32 1.5, %v2846_v54 }
0x1b33   :  { %v2857_v60 = vpop.permute.xlu0 %2856 }
0x1b34   :  { %v2848_v55 = vmul.f32 %v3515_v56, %v2847_v62 }
0x1b36   :  { %v2852_v58 = vsel %vm2851_vm15, %v3515_v56, %v2848_v55 }
0x1b37   :  { %v2853_v59 = vmul.f32 %v2852_v58, %v2836_v36 }
0x1b38   :  { %3007 = vperm.xlu2 %3379, %v759_v57  }
0x1b39   :  { %v2859_v61 = vmul.f32 %v2857_v60, %v2853_v59 }
0x1b3b   :  { %v2865_v0 = vadd.f32 %v2863_v63, %v2859_v61 }
0x1b3d   :  { %3261 = vmatmul.msk.f32.vlgmr.msrb.gmra.mxu0 %vm826_vm2, %v2865_v0 }
0x1b93   :  { %v2985_v5 = vpop.xlane.xlu2 %2984 }
0x1b94   :  { %v2986_v6 = vmul.f32 %v2985_v5, %v4650_v20  ;;  %v3436_v20 = vld [vmem:[%s5318_s28] ss:$0 sm:$0xff] }
0x1b96   :  { %v2987_v7 = vadd.f32 1e-05, %v2986_v6 }
0x1b98   :  { %3516 = vrsqrt.f32 %v2987_v7  ;;  %vm2994_vm5 = vweird.f32 %v2987_v7 }
0x1b9b   :  { %v3008_v17 = vpop.permute.xlu2 %3007 }
0x1b9e   :  { %v3517_v8 = vpop.eup %3516 }
0x1b9f   :  { %v2989_v9 = vmul.f32 %v3517_v8, %v2987_v7  ;;  %vm2995_vm0 = vweird.f32 %v3517_v8 }
0x1ba0   :  { %vm2996_vm3 = vmor %vm2994_vm5, %vm2995_vm0 }
0x1ba1   :  { %v2990_v10 = vmul.f32 %v3517_v8, %v2989_v9 }
0x1ba3   :  { %v2991_v12 = vmul.f32 0.5, %v2990_v10 }
0x1ba5   :  { %v2992_v37 = vsub.f32 1.5, %v2991_v12 }
0x1ba7   :  { %v2993_v13 = vmul.f32 %v3517_v8, %v2992_v37 }
0x1ba9   :  { %v2997_v14 = vsel %vm2996_vm3, %v3517_v8, %v2993_v13 }
0x1baa   :  { %v2998_v15 = vmul.f32 %v2997_v14, %v2981_v46 }
0x1bac   :  { %v3004_v16 = vmul.f32 %v3002_v53, %v2998_v15 }
0x1bae   :  { %v3010_v11 = vadd.f32 %v3008_v17, %v3004_v16 }
0x1bb0   :  { %3264 = vmatmul.msk.f32.vlgmr.msrb.gmra.mxu3 %vm826_vm2, %v3010_v11 }
0x1bba   :  { %v2889_v18 = vpop.f32.mrf.mxu0 }
0x1bbb   :  { %3973 = shalt.err (!%p3970_p10)
}
0x1bbc   :  { %s4134_s19 = smov 128   ;;  %s4135_s1 = smov 8   ;;  %v2890_v19 = vadd.f32 %v3436_v20, %v2889_v18 }
0x1bbd   :  { %3072 = dma.vmem_to_hbm [thread:$0]  %s3065_s0, 256, %s3067_s24, [#allocation34], %s4134_s19, %s4134_s19, %s4135_s1  }
0x1bbe   :  { %3040 = vst.msk [vmem:[#allocation32] sm:$0x3] %vm3039_vm4, %v2890_v19  ;;  %s3986_s16 = sshra.s32 %s3055_s9, 4  ;;  %s3990_s10 = scalar_lea.hbm %s4577_s22, 2  ;;  %s3987_s16 = int_to_ptr.hbm [resolvable:$true] %s3986_s16 }
0x1bbf   :  { %s3988_s20 = scalar_lea.hbm %s3987_s16, 2  ;;  %p3991_p12 = scmp.lt.s32.totalorder %s3987_s16, %s4577_s22 }
0x1bc0   :  { %p3989_p11 = scmp.ne.s32.totalorder %s3987_s16, %s3988_s20  ;;  %p3992_p13 = scmp.lt.s32.totalorder %s3990_s10, %s3988_s20 }
0x1bc2   :  { %p3993_p0 = por %p3992_p13, %p3991_p12 }
0x1bc4   :  { %p3994_p1 = pnand %p3993_p0, %p3989_p11 }
0x1bc6   :  { %3997 = shalt.err (!%p3994_p1)
}
0x1bc7   :  { %3057 = dma.vmem_to_hbm [thread:$0]  %s3053_s17, 32, %s3055_s9, [#allocation5]   ;;  %v3437_v22 = vld [vmem:[#allocation2] ss:$0 sm:$0xff]  ;;  %vm3041_vm2 = vcmask 1024  }
0x1c33   :  { %v3034_v23 = vpop.f32.mrf.mxu3 }
0x1c34   :  { %v3035_v25 = vadd.f32 %v3437_v22, %v3034_v23 }
0x1c36   :  { %3042 = vst.msk [vmem:[%s4582_s5] sm:$0x3] %vm3041_vm2, %v3035_v25 }
0x1c37   :  { %4018 = dma.done.wait [#allocation5], 32  }
0x1c38   :  { %4019 = vsyncadd [#allocation5], 4294967264 }
0x1c39   :  { %4020 = dma.done.wait [#allocation34], 256  }
0x1c3a   :  { %4021 = vsyncadd [#allocation34], 4294967040 }
0x1c3b   :  { %3085 = vsyncpa [#allocation4], 1 }
0x1c3c   :  { %3086 = vsyncpa [#allocation7], 1 }
0x1c3d   :  { %3087 = vsyncpa [#allocation10], 1 }
0x1c3e   :  { %3088 = vsyncpa [#allocation13], 1 }
0x1c3f   :  { %3089 = vsyncpa [#allocation16], 1 }
0x1c40   :  { %3090 = vsyncpa [#allocation19], 1 }
0x1c41   :  { %3091 = vsyncpa [#allocation22], 1 }
0x1c42   :  { %3092 = vsyncpa [#allocation25], 1 }
0x1c43   :  { %3093 = vsyncpa [#allocation28], 1 }
0x1c44   :  { %3094 = vsyncpa [#allocation31], 1 }
0x1c45   :  { %3095 = vsyncpa [#allocation5], 1 }
0x1c46   :  { %3096 = vsyncpa [#allocation34], 1 }

</bundles_post_ra>
